<compile_context>
chip_gen: v5e
topology: v5e:2x2
jax: 0.10.0
libtpu: 0.0.40
codegen_flags: <defaults>
</compile_context>

<pallas_src>
import functools

import numpy as np
import jax
import jax.numpy as jnp
from jax import lax
from jax.experimental import pallas as pl
from jax.experimental.pallas import tpu as pltpu


def _round_up(v, m):
    return ((v + m - 1) // m) * m


# ----------------------------- Pallas kernel -------------------------------- #

def fused_gru_encoder_kernel(x_ref, mask_ref, wih_ref, whh_ref, bih_ref, bhh_ref,
                             y_ref, hlast_ref, h_scr, seq_scr, gi_scr,
                             *, matmul_dtype):
    """Fused multi-layer GRU encoder.

    x_ref    : (T, Bp, W)    padded, time-major input
    mask_ref : (T, Bp, 1)    {0,1} f32 validity mask (t < xlen[b])
    wih_ref  : (L, W, 3W)    input weights, gate g in columns [g*W, g*W+H)
    whh_ref  : (L, W, 3W)    hidden weights, same gate layout
    bih_ref  : (L, 1, 3W)
    bhh_ref  : (L, 1, 3W)
    y_ref    : (T, Bp, W)    last-layer per-timestep output (zero past xlen)
    hlast_ref: (L, Bp, W)    final hidden state per layer
    h_scr    : (Bp, W)  f32  carried hidden state
    seq_scr  : (T, Bp, W) f32  current layer's input/output sequence (VMEM resident)
    gi_scr   : (T, Bp, 3W) f32 hoisted input projection for the current layer
    """
    T, Bp, W = seq_scr.shape
    L = wih_ref.shape[0]

    # Layer 0 input = padded source sequence; stays in VMEM for the whole call.
    seq_scr[...] = x_ref[...]

    for l in range(L):  # static unroll over layers — no HBM traffic between layers
        # ---- hoisted input projection: ONE batched matmul over all timesteps ----
        xin = seq_scr[...].reshape(T * Bp, W).astype(matmul_dtype)
        gi = jnp.dot(xin, wih_ref[l].astype(matmul_dtype),
                     preferred_element_type=jnp.float32) + bih_ref[l]
        gi_scr[...] = gi.reshape(T, Bp, 3 * W)

        h_scr[...] = jnp.zeros_like(h_scr)
        whh_l = whh_ref[l].astype(matmul_dtype)   # loop-invariant, hoisted
        bhh_l = bhh_ref[l]

        # ---- serial recurrence: only h @ Whh + elementwise gates remain ---------
        def step(t, carry):
            h_prev = h_scr[...]                                       # (Bp, W) f32
            gh = jnp.dot(h_prev.astype(matmul_dtype), whh_l,
                         preferred_element_type=jnp.float32) + bhh_l  # (Bp, 3W) f32
            gi_t = gi_scr[t]                                          # (Bp, 3W) f32
            # 128-lane-aligned gate slices (gates ordered r, z, n as in PyTorch).
            r = jax.nn.sigmoid(gi_t[:, :W] + gh[:, :W])
            z = jax.nn.sigmoid(gi_t[:, W:2 * W] + gh[:, W:2 * W])
            n = jnp.tanh(gi_t[:, 2 * W:] + r * gh[:, 2 * W:])
            h_new = (1.0 - z) * n + z * h_prev
            m = mask_ref[t]                                           # (Bp, 1) {0,1}
            h_scr[...] = h_prev + m * (h_new - h_prev)   # freeze h past xlen[b]
            seq_scr[t] = m * h_new                       # zero outputs past xlen[b]
            return carry

        lax.fori_loop(0, T, step, 0, unroll=(T <= 32))

        hlast_ref[l] = h_scr[...]

    y_ref[...] = seq_scr[...]


# --------------------------- Encoder forward (glue) -------------------------- #

def rnn_encoder_forward(x, xlen, params, hidden_size, matmul_dtype=jnp.float32):
    """Equivalent of RNNEncoder.forward(x, xlen).

    x: (B, T, input_dim) float32, batch-first (PyTorch convention)
    xlen: (B,) int valid lengths
    params: list of (w_ih (3H,Din_l), w_hh (3H,H), b_ih (3H,), b_hh (3H,)) per layer
    Returns (y (B, max(xlen), H), hidden (B, num_layers*H)).
    """
    x = jnp.asarray(x, jnp.float32)
    xlen_np = np.asarray(xlen, np.int64)
    B, _, Din = x.shape
    H = int(hidden_size)
    L = len(params)
    max_len = int(xlen_np.max())   # host concretization — eager use only
    T = max_len

    W = _round_up(max(Din, H), 128)   # each gate gets its own 128-lane-aligned block
    Bp = _round_up(max(B, 8), 8)      # sublane-aligned batch

    # Time-major, trimmed to max_len, zero-padded to (T, Bp, W).
    x_tm = jnp.transpose(x[:, :T, :], (1, 0, 2))
    x_pad = jnp.zeros((T, Bp, W), jnp.float32).at[:, :B, :Din].set(x_tm)

    # Precomputed {0,1} validity mask per (t, b) — replaces in-kernel length compare.
    mask_np = (np.arange(T)[:, None] < xlen_np[None, :]).astype(np.float32)  # (T, B)
    mask_full = np.zeros((T, Bp, 1), np.float32)
    mask_full[:, :B, 0] = mask_np
    mask = jnp.asarray(mask_full)

    # Repack weights: gate g of layer l lives in columns [g*W, g*W+H); padded rows
    # and columns are zero, so padded hidden lanes stay exactly zero.
    wih_all = np.zeros((L, W, 3 * W), np.float32)
    whh_all = np.zeros((L, W, 3 * W), np.float32)
    bih_all = np.zeros((L, 1, 3 * W), np.float32)
    bhh_all = np.zeros((L, 1, 3 * W), np.float32)
    in_dim = Din
    for l, (w_ih, w_hh, b_ih, b_hh) in enumerate(params):
        w_ih = np.asarray(w_ih, np.float32)
        w_hh = np.asarray(w_hh, np.float32)
        b_ih = np.asarray(b_ih, np.float32)
        b_hh = np.asarray(b_hh, np.float32)
        for g in range(3):
            wih_all[l, :in_dim, g * W:g * W + H] = w_ih[g * H:(g + 1) * H, :].T
            whh_all[l, :H, g * W:g * W + H] = w_hh[g * H:(g + 1) * H, :].T
            bih_all[l, 0, g * W:g * W + H] = b_ih[g * H:(g + 1) * H]
            bhh_all[l, 0, g * W:g * W + H] = b_hh[g * H:(g + 1) * H]
        in_dim = H

    kernel = functools.partial(fused_gru_encoder_kernel, matmul_dtype=matmul_dtype)

    def full(shape):
        return pl.BlockSpec(shape, lambda i, _s=shape: (0,) * len(_s))

    # TODO(synk): for large B on v7x, add a leading batch grid axis marked "parallel"
    # to shard the (inherently serial) recurrence across the two TensorCores.
    y_pad, hlast_pad = pl.pallas_call(
        kernel,
        grid=(1,),
        in_specs=[
            full((T, Bp, W)),          # x
            full((T, Bp, 1)),          # mask
            full((L, W, 3 * W)),       # W_ih (all layers)
            full((L, W, 3 * W)),       # W_hh (all layers)
            full((L, 1, 3 * W)),       # b_ih
            full((L, 1, 3 * W)),       # b_hh
        ],
        out_specs=[
            full((T, Bp, W)),          # y (last layer outputs)
            full((L, Bp, W)),          # final hidden per layer
        ],
        out_shape=[
            jax.ShapeDtypeStruct((T, Bp, W), jnp.float32),
            jax.ShapeDtypeStruct((L, Bp, W), jnp.float32),
        ],
        scratch_shapes=[
            pltpu.VMEM((Bp, W), jnp.float32),          # h carry
            pltpu.VMEM((T, Bp, W), jnp.float32),       # layer sequence buffer
            pltpu.VMEM((T, Bp, 3 * W), jnp.float32),   # hoisted input projection
        ],
        compiler_params=pltpu.CompilerParams(
            dimension_semantics=("arbitrary",)),
    )(x_pad, mask, jnp.asarray(wih_all), jnp.asarray(whh_all),
      jnp.asarray(bih_all), jnp.asarray(bhh_all))

    y = jnp.transpose(y_pad[:, :B, :H], (1, 0, 2))                      # (B, max_len, H)
    hidden = jnp.transpose(hlast_pad[:, :B, :H], (1, 0, 2)).reshape(B, L * H)
    return y, hidden


# ------------------------------ reference (numpy) ---------------------------- #

def _sigmoid(v):
    return 1.0 / (1.0 + np.exp(-v))


def ref_forward(x, xlen, params):
    x = np.asarray(x, np.float32)
    xlen = np.asarray(xlen)
    B, T, _ = x.shape
    layer_in = x
    hiddens = []
    for (w_ih, w_hh, b_ih, b_hh) in params:
        w_ih = np.asarray(w_ih); w_hh = np.asarray(w_hh)
        b_ih = np.asarray(b_ih); b_hh = np.asarray(b_hh)
        H = w_hh.shape[1]
        y = np.zeros((B, T, H), np.float32)
        h_fin = np.zeros((B, H), np.float32)
        for b in range(B):
            h = np.zeros((H,), np.float32)
            for t in range(int(xlen[b])):
                gi = w_ih @ layer_in[b, t] + b_ih
                gh = w_hh @ h + b_hh
                i_r, i_z, i_n = gi[:H], gi[H:2 * H], gi[2 * H:]
                h_r, h_z, h_n = gh[:H], gh[H:2 * H], gh[2 * H:]
                r = _sigmoid(i_r + h_r)
                z = _sigmoid(i_z + h_z)
                n = np.tanh(i_n + r * h_n)
                h = (1.0 - z) * n + z * h
                y[b, t] = h
            h_fin[b] = h
        hiddens.append(h_fin)
        layer_in = y
    max_len = int(xlen.max())
    y_out = layer_in[:, :max_len]
    hidden = np.stack(hiddens, 0).transpose(1, 0, 2).reshape(B, -1)
    return y_out, hidden


# --------------------------------- main -------------------------------------- #

if __name__ == "__main__":
    # RNNEncoder(input_dim=16, hidden_size=32, n_hidden=2)
    input_dim, hidden_size, n_hidden = 16, 32, 2
    B, T = 2, 8

    key = jax.random.PRNGKey(0)
    k_x, key = jax.random.split(key)
    x = jax.random.normal(k_x, (B, T, input_dim), jnp.float32)
    xlen = jnp.array([7, 5], jnp.int32)   # exercises both max_len trim and padding

    # Deterministic GRU parameter init (PyTorch layout: gates ordered r, z, n).
    bound = 1.0 / np.sqrt(hidden_size)
    params = []
    in_dim = input_dim
    for _ in range(n_hidden):
        k1, k2, k3, k4, key = jax.random.split(key, 5)
        w_ih = jax.random.uniform(k1, (3 * hidden_size, in_dim), jnp.float32, -bound, bound)
        w_hh = jax.random.uniform(k2, (3 * hidden_size, hidden_size), jnp.float32, -bound, bound)
        b_ih = jax.random.uniform(k3, (3 * hidden_size,), jnp.float32, -bound, bound)
        b_hh = jax.random.uniform(k4, (3 * hidden_size,), jnp.float32, -bound, bound)
        params.append((w_ih, w_hh, b_ih, b_hh))
        in_dim = hidden_size

    # f32 matmuls for strict numerical checking; pass matmul_dtype=jnp.bfloat16 on
    # v6e/v7x for the bf16-MXU throughput path (elementwise math stays f32 either way).
    y, hidden = rnn_encoder_forward(x, xlen, params, hidden_size,
                                    matmul_dtype=jnp.float32)
    y = jax.block_until_ready(y)
    hidden = jax.block_until_ready(hidden)

    y_ref, hidden_ref = ref_forward(x, xlen, params)
    assert y.shape == y_ref.shape, (y.shape, y_ref.shape)
    assert hidden.shape == (B, n_hidden * hidden_size)
    np.testing.assert_allclose(np.asarray(y), y_ref, rtol=1e-4, atol=1e-4)
    np.testing.assert_allclose(np.asarray(hidden), hidden_ref, rtol=1e-4, atol=1e-4)

    print("KERNEL_OK")
</pallas_src>

<mosaic_0001>
module attributes {stable_mosaic.version = 11 : i64} {
  func.func @fused_gru_encoder_kernel(%arg0: i32, %arg1: memref<7x8x128xf32, #tpu.memory_space<vmem>>, %arg2: memref<7x8x1xf32, #tpu.memory_space<vmem>>, %arg3: memref<2x128x384xf32, #tpu.memory_space<vmem>>, %arg4: memref<2x128x384xf32, #tpu.memory_space<vmem>>, %arg5: memref<2x1x384xf32, #tpu.memory_space<vmem>>, %arg6: memref<2x1x384xf32, #tpu.memory_space<vmem>>, %arg7: memref<7x8x128xf32, #tpu.memory_space<vmem>>, %arg8: memref<2x8x128xf32, #tpu.memory_space<vmem>>, %arg9: memref<8x128xf32, #tpu.memory_space<vmem>>, %arg10: memref<7x8x128xf32, #tpu.memory_space<vmem>>, %arg11: memref<7x8x384xf32, #tpu.memory_space<vmem>>) attributes {dimension_semantics = [#tpu.dimension_semantics<arbitrary>], iteration_bounds = array<i64: 1>, scalar_prefetch = 0 : i64, scratch_operands = 3 : i64, tpu.core_type = #tpu.core_type<tc>, window_params = [{pipeline_mode = #tpu.pipeline_mode<synchronous>, transform_indices = @transform_0, window_bounds = array<i64: 7, 8, 128>}, {pipeline_mode = #tpu.pipeline_mode<synchronous>, transform_indices = @transform_1, window_bounds = array<i64: 7, 8, 1>}, {pipeline_mode = #tpu.pipeline_mode<synchronous>, transform_indices = @transform_2, window_bounds = array<i64: 2, 128, 384>}, {pipeline_mode = #tpu.pipeline_mode<synchronous>, transform_indices = @transform_3, window_bounds = array<i64: 2, 128, 384>}, {pipeline_mode = #tpu.pipeline_mode<synchronous>, transform_indices = @transform_4, window_bounds = array<i64: 2, 1, 384>}, {pipeline_mode = #tpu.pipeline_mode<synchronous>, transform_indices = @transform_5, window_bounds = array<i64: 2, 1, 384>}, {pipeline_mode = #tpu.pipeline_mode<synchronous>, transform_indices = @transform_6, window_bounds = array<i64: 7, 8, 128>}, {pipeline_mode = #tpu.pipeline_mode<synchronous>, transform_indices = @transform_7, window_bounds = array<i64: 2, 8, 128>}]} {
    %c0 = arith.constant 0 : index
    %c0_0 = arith.constant 0 : index
    %c0_1 = arith.constant 0 : index
    %0 = vector.load %arg1[%c0, %c0_0, %c0_1] : memref<7x8x128xf32, #tpu.memory_space<vmem>>, vector<7x8x128xf32>
    %c0_2 = arith.constant 0 : index
    %c0_3 = arith.constant 0 : index
    %c0_4 = arith.constant 0 : index
    %1 = vector.load %arg10[%c0_2, %c0_3, %c0_4] : memref<7x8x128xf32, #tpu.memory_space<vmem>>, vector<7x8x128xf32>
    tpu.vector_store %arg10[%c0_2, %c0_3, %c0_4], %0 {strides = array<i32>} : memref<7x8x128xf32, #tpu.memory_space<vmem>>, vector<7x8x128xf32>,
    %c0_5 = arith.constant 0 : index
    %c0_6 = arith.constant 0 : index
    %c0_7 = arith.constant 0 : index
    %2 = vector.load %arg10[%c0_5, %c0_6, %c0_7] : memref<7x8x128xf32, #tpu.memory_space<vmem>>, vector<7x8x128xf32>
    %3 = vector.shape_cast %2 : vector<7x8x128xf32> to vector<56x128xf32>
    %c0_8 = arith.constant 0 : index
    %c0_9 = arith.constant 0 : index
    %c0_10 = arith.constant 0 : index
    %4 = vector.load %arg3[%c0_8, %c0_9, %c0_10] : memref<2x128x384xf32, #tpu.memory_space<vmem>>, vector<1x128x384xf32>
    %5 = vector.shape_cast %4 : vector<1x128x384xf32> to vector<128x384xf32>
    %cst = arith.constant dense<0.000000e+00> : vector<56x384xf32>
    %6 = tpu.matmul %3, %5, %cst {dimension_numbers = #tpu.dot_dimension_numbers<[1], [0], [0], [1], [0, 0, 1, 1], [], []>} : vector<56x128xf32>, vector<128x384xf32>, vector<56x384xf32> -> vector<56x384xf32>
    %c0_11 = arith.constant 0 : index
    %c0_12 = arith.constant 0 : index
    %c0_13 = arith.constant 0 : index
    %7 = vector.load %arg5[%c0_11, %c0_12, %c0_13] : memref<2x1x384xf32, #tpu.memory_space<vmem>>, vector<1x1x384xf32>
    %8 = vector.shape_cast %7 : vector<1x1x384xf32> to vector<1x384xf32>
    %9 = vector.broadcast %8 : vector<1x384xf32> to vector<56x384xf32>
    %10 = arith.addf %6, %9 : vector<56x384xf32>
    %11 = vector.shape_cast %10 : vector<56x384xf32> to vector<7x8x384xf32>
    %c0_14 = arith.constant 0 : index
    %c0_15 = arith.constant 0 : index
    %c0_16 = arith.constant 0 : index
    %12 = vector.load %arg11[%c0_14, %c0_15, %c0_16] : memref<7x8x384xf32, #tpu.memory_space<vmem>>, vector<7x8x384xf32>
    tpu.vector_store %arg11[%c0_14, %c0_15, %c0_16], %11 {strides = array<i32>} : memref<7x8x384xf32, #tpu.memory_space<vmem>>, vector<7x8x384xf32>,
    %cst_17 = arith.constant 0.000000e+00 : f32
    %13 = vector.broadcast %cst_17 : f32 to vector<8x128xf32>
    %c0_18 = arith.constant 0 : index
    %c0_19 = arith.constant 0 : index
    %14 = vector.load %arg9[%c0_18, %c0_19] : memref<8x128xf32, #tpu.memory_space<vmem>>, vector<8x128xf32>
    tpu.vector_store %arg9[%c0_18, %c0_19], %13 {strides = array<i32>} : memref<8x128xf32, #tpu.memory_space<vmem>>, vector<8x128xf32>,
    %c0_20 = arith.constant 0 : index
    %c0_21 = arith.constant 0 : index
    %c0_22 = arith.constant 0 : index
    %15 = vector.load %arg4[%c0_20, %c0_21, %c0_22] : memref<2x128x384xf32, #tpu.memory_space<vmem>>, vector<1x128x384xf32>
    %16 = vector.shape_cast %15 : vector<1x128x384xf32> to vector<128x384xf32>
    %c0_23 = arith.constant 0 : index
    %c0_24 = arith.constant 0 : index
    %c0_25 = arith.constant 0 : index
    %17 = vector.load %arg6[%c0_23, %c0_24, %c0_25] : memref<2x1x384xf32, #tpu.memory_space<vmem>>, vector<1x1x384xf32>
    %18 = vector.shape_cast %17 : vector<1x1x384xf32> to vector<1x384xf32>
    %c0_i32 = arith.constant 0 : i32
    %c0_26 = arith.constant 0 : index
    %c0_27 = arith.constant 0 : index
    %19 = vector.load %arg9[%c0_26, %c0_27] : memref<8x128xf32, #tpu.memory_space<vmem>>, vector<8x128xf32>
    %cst_28 = arith.constant dense<0.000000e+00> : vector<8x384xf32>
    %20 = tpu.matmul %19, %16, %cst_28 {dimension_numbers = #tpu.dot_dimension_numbers<[1], [0], [0], [1], [0, 0, 1, 1], [], []>} : vector<8x128xf32>, vector<128x384xf32>, vector<8x384xf32> -> vector<8x384xf32>
    %21 = vector.broadcast %18 : vector<1x384xf32> to vector<8x384xf32>
    %22 = arith.addf %20, %21 : vector<8x384xf32>
    %23 = arith.index_cast %c0_i32 : i32 to index
    %c0_29 = arith.constant 0 : index
    %c0_30 = arith.constant 0 : index
    %24 = vector.load %arg11[%23, %c0_29, %c0_30] : memref<7x8x384xf32, #tpu.memory_space<vmem>>, vector<1x8x384xf32>
    %25 = vector.shape_cast %24 : vector<1x8x384xf32> to vector<8x384xf32>
    %26 = vector.extract_strided_slice %25 {offsets = [0, 0], sizes = [8, 128], strides = [1, 1]} : vector<8x384xf32> to vector<8x128xf32>
    %27 = vector.extract_strided_slice %22 {offsets = [0, 0], sizes = [8, 128], strides = [1, 1]} : vector<8x384xf32> to vector<8x128xf32>
    %28 = arith.addf %26, %27 : vector<8x128xf32>
    %29 = arith.negf %28 : vector<8x128xf32>
    %30 = math.exp %29 : vector<8x128xf32>
    %cst_31 = arith.constant 1.000000e+00 : f32
    %31 = vector.broadcast %cst_31 : f32 to vector<8x128xf32>
    %32 = arith.addf %31, %30 : vector<8x128xf32>
    %33 = arith.divf %31, %32 : vector<8x128xf32>
    %34 = vector.extract_strided_slice %25 {offsets = [0, 128], sizes = [8, 128], strides = [1, 1]} : vector<8x384xf32> to vector<8x128xf32>
    %35 = vector.extract_strided_slice %22 {offsets = [0, 128], sizes = [8, 128], strides = [1, 1]} : vector<8x384xf32> to vector<8x128xf32>
    %36 = arith.addf %34, %35 : vector<8x128xf32>
    %37 = arith.negf %36 : vector<8x128xf32>
    %38 = math.exp %37 : vector<8x128xf32>
    %cst_32 = arith.constant 1.000000e+00 : f32
    %39 = vector.broadcast %cst_32 : f32 to vector<8x128xf32>
    %40 = arith.addf %39, %38 : vector<8x128xf32>
    %41 = arith.divf %39, %40 : vector<8x128xf32>
    %42 = vector.extract_strided_slice %25 {offsets = [0, 256], sizes = [8, 128], strides = [1, 1]} : vector<8x384xf32> to vector<8x128xf32>
    %43 = vector.extract_strided_slice %22 {offsets = [0, 256], sizes = [8, 128], strides = [1, 1]} : vector<8x384xf32> to vector<8x128xf32>
    %44 = arith.mulf %33, %43 : vector<8x128xf32>
    %45 = arith.addf %42, %44 : vector<8x128xf32>
    %46 = math.tanh %45 : vector<8x128xf32>
    %cst_33 = arith.constant 1.000000e+00 : f32
    %47 = vector.broadcast %cst_33 : f32 to vector<8x128xf32>
    %48 = arith.subf %47, %41 : vector<8x128xf32>
    %49 = arith.mulf %48, %46 : vector<8x128xf32>
    %50 = arith.mulf %41, %19 : vector<8x128xf32>
    %51 = arith.addf %49, %50 : vector<8x128xf32>
    %52 = arith.index_cast %c0_i32 : i32 to index
    %c0_34 = arith.constant 0 : index
    %c0_35 = arith.constant 0 : index
    %53 = vector.load %arg2[%52, %c0_34, %c0_35] : memref<7x8x1xf32, #tpu.memory_space<vmem>>, vector<1x8x1xf32>
    %54 = vector.shape_cast %53 : vector<1x8x1xf32> to vector<8x1xf32>
    %55 = arith.subf %51, %19 : vector<8x128xf32>
    %56 = vector.broadcast %54 : vector<8x1xf32> to vector<8x128xf32>
    %57 = arith.mulf %56, %55 : vector<8x128xf32>
    %58 = arith.addf %19, %57 : vector<8x128xf32>
    %c0_36 = arith.constant 0 : index
    %c0_37 = arith.constant 0 : index
    %59 = vector.load %arg9[%c0_36, %c0_37] : memref<8x128xf32, #tpu.memory_space<vmem>>, vector<8x128xf32>
    tpu.vector_store %arg9[%c0_36, %c0_37], %58 {strides = array<i32>} : memref<8x128xf32, #tpu.memory_space<vmem>>, vector<8x128xf32>,
    %60 = vector.broadcast %54 : vector<8x1xf32> to vector<8x128xf32>
    %61 = arith.mulf %60, %51 : vector<8x128xf32>
    %62 = arith.index_cast %c0_i32 : i32 to index
    %c0_38 = arith.constant 0 : index
    %c0_39 = arith.constant 0 : index
    %63 = vector.load %arg10[%62, %c0_38, %c0_39] : memref<7x8x128xf32, #tpu.memory_space<vmem>>, vector<1x8x128xf32>
    %64 = vector.shape_cast %63 : vector<1x8x128xf32> to vector<8x128xf32>
    %65 = vector.shape_cast %61 : vector<8x128xf32> to vector<1x8x128xf32>
    tpu.vector_store %arg10[%62, %c0_38, %c0_39], %65 {strides = array<i32>} : memref<7x8x128xf32, #tpu.memory_space<vmem>>, vector<1x8x128xf32>,
    %c1_i32 = arith.constant 1 : i32
    %c0_40 = arith.constant 0 : index
    %c0_41 = arith.constant 0 : index
    %66 = vector.load %arg9[%c0_40, %c0_41] : memref<8x128xf32, #tpu.memory_space<vmem>>, vector<8x128xf32>
    %cst_42 = arith.constant dense<0.000000e+00> : vector<8x384xf32>
    %67 = tpu.matmul %66, %16, %cst_42 {dimension_numbers = #tpu.dot_dimension_numbers<[1], [0], [0], [1], [0, 0, 1, 1], [], []>} : vector<8x128xf32>, vector<128x384xf32>, vector<8x384xf32> -> vector<8x384xf32>
    %68 = vector.broadcast %18 : vector<1x384xf32> to vector<8x384xf32>
    %69 = arith.addf %67, %68 : vector<8x384xf32>
    %70 = arith.index_cast %c1_i32 : i32 to index
    %c0_43 = arith.constant 0 : index
    %c0_44 = arith.constant 0 : index
    %71 = vector.load %arg11[%70, %c0_43, %c0_44] : memref<7x8x384xf32, #tpu.memory_space<vmem>>, vector<1x8x384xf32>
    %72 = vector.shape_cast %71 : vector<1x8x384xf32> to vector<8x384xf32>
    %73 = vector.extract_strided_slice %72 {offsets = [0, 0], sizes = [8, 128], strides = [1, 1]} : vector<8x384xf32> to vector<8x128xf32>
    %74 = vector.extract_strided_slice %69 {offsets = [0, 0], sizes = [8, 128], strides = [1, 1]} : vector<8x384xf32> to vector<8x128xf32>
    %75 = arith.addf %73, %74 : vector<8x128xf32>
    %76 = arith.negf %75 : vector<8x128xf32>
    %77 = math.exp %76 : vector<8x128xf32>
    %cst_45 = arith.constant 1.000000e+00 : f32
    %78 = vector.broadcast %cst_45 : f32 to vector<8x128xf32>
    %79 = arith.addf %78, %77 : vector<8x128xf32>
    %80 = arith.divf %78, %79 : vector<8x128xf32>
    %81 = vector.extract_strided_slice %72 {offsets = [0, 128], sizes = [8, 128], strides = [1, 1]} : vector<8x384xf32> to vector<8x128xf32>
    %82 = vector.extract_strided_slice %69 {offsets = [0, 128], sizes = [8, 128], strides = [1, 1]} : vector<8x384xf32> to vector<8x128xf32>
    %83 = arith.addf %81, %82 : vector<8x128xf32>
    %84 = arith.negf %83 : vector<8x128xf32>
    %85 = math.exp %84 : vector<8x128xf32>
    %cst_46 = arith.constant 1.000000e+00 : f32
    %86 = vector.broadcast %cst_46 : f32 to vector<8x128xf32>
    %87 = arith.addf %86, %85 : vector<8x128xf32>
    %88 = arith.divf %86, %87 : vector<8x128xf32>
    %89 = vector.extract_strided_slice %72 {offsets = [0, 256], sizes = [8, 128], strides = [1, 1]} : vector<8x384xf32> to vector<8x128xf32>
    %90 = vector.extract_strided_slice %69 {offsets = [0, 256], sizes = [8, 128], strides = [1, 1]} : vector<8x384xf32> to vector<8x128xf32>
    %91 = arith.mulf %80, %90 : vector<8x128xf32>
    %92 = arith.addf %89, %91 : vector<8x128xf32>
    %93 = math.tanh %92 : vector<8x128xf32>
    %cst_47 = arith.constant 1.000000e+00 : f32
    %94 = vector.broadcast %cst_47 : f32 to vector<8x128xf32>
    %95 = arith.subf %94, %88 : vector<8x128xf32>
    %96 = arith.mulf %95, %93 : vector<8x128xf32>
    %97 = arith.mulf %88, %66 : vector<8x128xf32>
    %98 = arith.addf %96, %97 : vector<8x128xf32>
    %99 = arith.index_cast %c1_i32 : i32 to index
    %c0_48 = arith.constant 0 : index
    %c0_49 = arith.constant 0 : index
    %100 = vector.load %arg2[%99, %c0_48, %c0_49] : memref<7x8x1xf32, #tpu.memory_space<vmem>>, vector<1x8x1xf32>
    %101 = vector.shape_cast %100 : vector<1x8x1xf32> to vector<8x1xf32>
    %102 = arith.subf %98, %66 : vector<8x128xf32>
    %103 = vector.broadcast %101 : vector<8x1xf32> to vector<8x128xf32>
    %104 = arith.mulf %103, %102 : vector<8x128xf32>
    %105 = arith.addf %66, %104 : vector<8x128xf32>
    %c0_50 = arith.constant 0 : index
    %c0_51 = arith.constant 0 : index
    %106 = vector.load %arg9[%c0_50, %c0_51] : memref<8x128xf32, #tpu.memory_space<vmem>>, vector<8x128xf32>
    tpu.vector_store %arg9[%c0_50, %c0_51], %105 {strides = array<i32>} : memref<8x128xf32, #tpu.memory_space<vmem>>, vector<8x128xf32>,
    %107 = vector.broadcast %101 : vector<8x1xf32> to vector<8x128xf32>
    %108 = arith.mulf %107, %98 : vector<8x128xf32>
    %109 = arith.index_cast %c1_i32 : i32 to index
    %c0_52 = arith.constant 0 : index
    %c0_53 = arith.constant 0 : index
    %110 = vector.load %arg10[%109, %c0_52, %c0_53] : memref<7x8x128xf32, #tpu.memory_space<vmem>>, vector<1x8x128xf32>
    %111 = vector.shape_cast %110 : vector<1x8x128xf32> to vector<8x128xf32>
    %112 = vector.shape_cast %108 : vector<8x128xf32> to vector<1x8x128xf32>
    tpu.vector_store %arg10[%109, %c0_52, %c0_53], %112 {strides = array<i32>} : memref<7x8x128xf32, #tpu.memory_space<vmem>>, vector<1x8x128xf32>,
    %c2_i32 = arith.constant 2 : i32
    %c0_54 = arith.constant 0 : index
    %c0_55 = arith.constant 0 : index
    %113 = vector.load %arg9[%c0_54, %c0_55] : memref<8x128xf32, #tpu.memory_space<vmem>>, vector<8x128xf32>
    %cst_56 = arith.constant dense<0.000000e+00> : vector<8x384xf32>
    %114 = tpu.matmul %113, %16, %cst_56 {dimension_numbers = #tpu.dot_dimension_numbers<[1], [0], [0], [1], [0, 0, 1, 1], [], []>} : vector<8x128xf32>, vector<128x384xf32>, vector<8x384xf32> -> vector<8x384xf32>
    %115 = vector.broadcast %18 : vector<1x384xf32> to vector<8x384xf32>
    %116 = arith.addf %114, %115 : vector<8x384xf32>
    %117 = arith.index_cast %c2_i32 : i32 to index
    %c0_57 = arith.constant 0 : index
    %c0_58 = arith.constant 0 : index
    %118 = vector.load %arg11[%117, %c0_57, %c0_58] : memref<7x8x384xf32, #tpu.memory_space<vmem>>, vector<1x8x384xf32>
    %119 = vector.shape_cast %118 : vector<1x8x384xf32> to vector<8x384xf32>
    %120 = vector.extract_strided_slice %119 {offsets = [0, 0], sizes = [8, 128], strides = [1, 1]} : vector<8x384xf32> to vector<8x128xf32>
    %121 = vector.extract_strided_slice %116 {offsets = [0, 0], sizes = [8, 128], strides = [1, 1]} : vector<8x384xf32> to vector<8x128xf32>
    %122 = arith.addf %120, %121 : vector<8x128xf32>
    %123 = arith.negf %122 : vector<8x128xf32>
    %124 = math.exp %123 : vector<8x128xf32>
    %cst_59 = arith.constant 1.000000e+00 : f32
    %125 = vector.broadcast %cst_59 : f32 to vector<8x128xf32>
    %126 = arith.addf %125, %124 : vector<8x128xf32>
    %127 = arith.divf %125, %126 : vector<8x128xf32>
    %128 = vector.extract_strided_slice %119 {offsets = [0, 128], sizes = [8, 128], strides = [1, 1]} : vector<8x384xf32> to vector<8x128xf32>
    %129 = vector.extract_strided_slice %116 {offsets = [0, 128], sizes = [8, 128], strides = [1, 1]} : vector<8x384xf32> to vector<8x128xf32>
    %130 = arith.addf %128, %129 : vector<8x128xf32>
    %131 = arith.negf %130 : vector<8x128xf32>
    %132 = math.exp %131 : vector<8x128xf32>
    %cst_60 = arith.constant 1.000000e+00 : f32
    %133 = vector.broadcast %cst_60 : f32 to vector<8x128xf32>
    %134 = arith.addf %133, %132 : vector<8x128xf32>
    %135 = arith.divf %133, %134 : vector<8x128xf32>
    %136 = vector.extract_strided_slice %119 {offsets = [0, 256], sizes = [8, 128], strides = [1, 1]} : vector<8x384xf32> to vector<8x128xf32>
    %137 = vector.extract_strided_slice %116 {offsets = [0, 256], sizes = [8, 128], strides = [1, 1]} : vector<8x384xf32> to vector<8x128xf32>
    %138 = arith.mulf %127, %137 : vector<8x128xf32>
    %139 = arith.addf %136, %138 : vector<8x128xf32>
    %140 = math.tanh %139 : vector<8x128xf32>
    %cst_61 = arith.constant 1.000000e+00 : f32
    %141 = vector.broadcast %cst_61 : f32 to vector<8x128xf32>
    %142 = arith.subf %141, %135 : vector<8x128xf32>
    %143 = arith.mulf %142, %140 : vector<8x128xf32>
    %144 = arith.mulf %135, %113 : vector<8x128xf32>
    %145 = arith.addf %143, %144 : vector<8x128xf32>
    %146 = arith.index_cast %c2_i32 : i32 to index
    %c0_62 = arith.constant 0 : index
    %c0_63 = arith.constant 0 : index
    %147 = vector.load %arg2[%146, %c0_62, %c0_63] : memref<7x8x1xf32, #tpu.memory_space<vmem>>, vector<1x8x1xf32>
    %148 = vector.shape_cast %147 : vector<1x8x1xf32> to vector<8x1xf32>
    %149 = arith.subf %145, %113 : vector<8x128xf32>
    %150 = vector.broadcast %148 : vector<8x1xf32> to vector<8x128xf32>
    %151 = arith.mulf %150, %149 : vector<8x128xf32>
    %152 = arith.addf %113, %151 : vector<8x128xf32>
    %c0_64 = arith.constant 0 : index
    %c0_65 = arith.constant 0 : index
    %153 = vector.load %arg9[%c0_64, %c0_65] : memref<8x128xf32, #tpu.memory_space<vmem>>, vector<8x128xf32>
    tpu.vector_store %arg9[%c0_64, %c0_65], %152 {strides = array<i32>} : memref<8x128xf32, #tpu.memory_space<vmem>>, vector<8x128xf32>,
    %154 = vector.broadcast %148 : vector<8x1xf32> to vector<8x128xf32>
    %155 = arith.mulf %154, %145 : vector<8x128xf32>
    %156 = arith.index_cast %c2_i32 : i32 to index
    %c0_66 = arith.constant 0 : index
    %c0_67 = arith.constant 0 : index
    %157 = vector.load %arg10[%156, %c0_66, %c0_67] : memref<7x8x128xf32, #tpu.memory_space<vmem>>, vector<1x8x128xf32>
    %158 = vector.shape_cast %157 : vector<1x8x128xf32> to vector<8x128xf32>
    %159 = vector.shape_cast %155 : vector<8x128xf32> to vector<1x8x128xf32>
    tpu.vector_store %arg10[%156, %c0_66, %c0_67], %159 {strides = array<i32>} : memref<7x8x128xf32, #tpu.memory_space<vmem>>, vector<1x8x128xf32>,
    %c3_i32 = arith.constant 3 : i32
    %c0_68 = arith.constant 0 : index
    %c0_69 = arith.constant 0 : index
    %160 = vector.load %arg9[%c0_68, %c0_69] : memref<8x128xf32, #tpu.memory_space<vmem>>, vector<8x128xf32>
    %cst_70 = arith.constant dense<0.000000e+00> : vector<8x384xf32>
    %161 = tpu.matmul %160, %16, %cst_70 {dimension_numbers = #tpu.dot_dimension_numbers<[1], [0], [0], [1], [0, 0, 1, 1], [], []>} : vector<8x128xf32>, vector<128x384xf32>, vector<8x384xf32> -> vector<8x384xf32>
    %162 = vector.broadcast %18 : vector<1x384xf32> to vector<8x384xf32>
    %163 = arith.addf %161, %162 : vector<8x384xf32>
    %164 = arith.index_cast %c3_i32 : i32 to index
    %c0_71 = arith.constant 0 : index
    %c0_72 = arith.constant 0 : index
    %165 = vector.load %arg11[%164, %c0_71, %c0_72] : memref<7x8x384xf32, #tpu.memory_space<vmem>>, vector<1x8x384xf32>
    %166 = vector.shape_cast %165 : vector<1x8x384xf32> to vector<8x384xf32>
    %167 = vector.extract_strided_slice %166 {offsets = [0, 0], sizes = [8, 128], strides = [1, 1]} : vector<8x384xf32> to vector<8x128xf32>
    %168 = vector.extract_strided_slice %163 {offsets = [0, 0], sizes = [8, 128], strides = [1, 1]} : vector<8x384xf32> to vector<8x128xf32>
    %169 = arith.addf %167, %168 : vector<8x128xf32>
    %170 = arith.negf %169 : vector<8x128xf32>
    %171 = math.exp %170 : vector<8x128xf32>
    %cst_73 = arith.constant 1.000000e+00 : f32
    %172 = vector.broadcast %cst_73 : f32 to vector<8x128xf32>
    %173 = arith.addf %172, %171 : vector<8x128xf32>
    %174 = arith.divf %172, %173 : vector<8x128xf32>
    %175 = vector.extract_strided_slice %166 {offsets = [0, 128], sizes = [8, 128], strides = [1, 1]} : vector<8x384xf32> to vector<8x128xf32>
    %176 = vector.extract_strided_slice %163 {offsets = [0, 128], sizes = [8, 128], strides = [1, 1]} : vector<8x384xf32> to vector<8x128xf32>
    %177 = arith.addf %175, %176 : vector<8x128xf32>
    %178 = arith.negf %177 : vector<8x128xf32>
    %179 = math.exp %178 : vector<8x128xf32>
    %cst_74 = arith.constant 1.000000e+00 : f32
    %180 = vector.broadcast %cst_74 : f32 to vector<8x128xf32>
    %181 = arith.addf %180, %179 : vector<8x128xf32>
    %182 = arith.divf %180, %181 : vector<8x128xf32>
    %183 = vector.extract_strided_slice %166 {offsets = [0, 256], sizes = [8, 128], strides = [1, 1]} : vector<8x384xf32> to vector<8x128xf32>
    %184 = vector.extract_strided_slice %163 {offsets = [0, 256], sizes = [8, 128], strides = [1, 1]} : vector<8x384xf32> to vector<8x128xf32>
    %185 = arith.mulf %174, %184 : vector<8x128xf32>
    %186 = arith.addf %183, %185 : vector<8x128xf32>
    %187 = math.tanh %186 : vector<8x128xf32>
    %cst_75 = arith.constant 1.000000e+00 : f32
    %188 = vector.broadcast %cst_75 : f32 to vector<8x128xf32>
    %189 = arith.subf %188, %182 : vector<8x128xf32>
    %190 = arith.mulf %189, %187 : vector<8x128xf32>
    %191 = arith.mulf %182, %160 : vector<8x128xf32>
    %192 = arith.addf %190, %191 : vector<8x128xf32>
    %193 = arith.index_cast %c3_i32 : i32 to index
    %c0_76 = arith.constant 0 : index
    %c0_77 = arith.constant 0 : index
    %194 = vector.load %arg2[%193, %c0_76, %c0_77] : memref<7x8x1xf32, #tpu.memory_space<vmem>>, vector<1x8x1xf32>
    %195 = vector.shape_cast %194 : vector<1x8x1xf32> to vector<8x1xf32>
    %196 = arith.subf %192, %160 : vector<8x128xf32>
    %197 = vector.broadcast %195 : vector<8x1xf32> to vector<8x128xf32>
    %198 = arith.mulf %197, %196 : vector<8x128xf32>
    %199 = arith.addf %160, %198 : vector<8x128xf32>
    %c0_78 = arith.constant 0 : index
    %c0_79 = arith.constant 0 : index
    %200 = vector.load %arg9[%c0_78, %c0_79] : memref<8x128xf32, #tpu.memory_space<vmem>>, vector<8x128xf32>
    tpu.vector_store %arg9[%c0_78, %c0_79], %199 {strides = array<i32>} : memref<8x128xf32, #tpu.memory_space<vmem>>, vector<8x128xf32>,
    %201 = vector.broadcast %195 : vector<8x1xf32> to vector<8x128xf32>
    %202 = arith.mulf %201, %192 : vector<8x128xf32>
    %203 = arith.index_cast %c3_i32 : i32 to index
    %c0_80 = arith.constant 0 : index
    %c0_81 = arith.constant 0 : index
    %204 = vector.load %arg10[%203, %c0_80, %c0_81] : memref<7x8x128xf32, #tpu.memory_space<vmem>>, vector<1x8x128xf32>
    %205 = vector.shape_cast %204 : vector<1x8x128xf32> to vector<8x128xf32>
    %206 = vector.shape_cast %202 : vector<8x128xf32> to vector<1x8x128xf32>
    tpu.vector_store %arg10[%203, %c0_80, %c0_81], %206 {strides = array<i32>} : memref<7x8x128xf32, #tpu.memory_space<vmem>>, vector<1x8x128xf32>,
    %c4_i32 = arith.constant 4 : i32
    %c0_82 = arith.constant 0 : index
    %c0_83 = arith.constant 0 : index
    %207 = vector.load %arg9[%c0_82, %c0_83] : memref<8x128xf32, #tpu.memory_space<vmem>>, vector<8x128xf32>
    %cst_84 = arith.constant dense<0.000000e+00> : vector<8x384xf32>
    %208 = tpu.matmul %207, %16, %cst_84 {dimension_numbers = #tpu.dot_dimension_numbers<[1], [0], [0], [1], [0, 0, 1, 1], [], []>} : vector<8x128xf32>, vector<128x384xf32>, vector<8x384xf32> -> vector<8x384xf32>
    %209 = vector.broadcast %18 : vector<1x384xf32> to vector<8x384xf32>
    %210 = arith.addf %208, %209 : vector<8x384xf32>
    %211 = arith.index_cast %c4_i32 : i32 to index
    %c0_85 = arith.constant 0 : index
    %c0_86 = arith.constant 0 : index
    %212 = vector.load %arg11[%211, %c0_85, %c0_86] : memref<7x8x384xf32, #tpu.memory_space<vmem>>, vector<1x8x384xf32>
    %213 = vector.shape_cast %212 : vector<1x8x384xf32> to vector<8x384xf32>
    %214 = vector.extract_strided_slice %213 {offsets = [0, 0], sizes = [8, 128], strides = [1, 1]} : vector<8x384xf32> to vector<8x128xf32>
    %215 = vector.extract_strided_slice %210 {offsets = [0, 0], sizes = [8, 128], strides = [1, 1]} : vector<8x384xf32> to vector<8x128xf32>
    %216 = arith.addf %214, %215 : vector<8x128xf32>
    %217 = arith.negf %216 : vector<8x128xf32>
    %218 = math.exp %217 : vector<8x128xf32>
    %cst_87 = arith.constant 1.000000e+00 : f32
    %219 = vector.broadcast %cst_87 : f32 to vector<8x128xf32>
    %220 = arith.addf %219, %218 : vector<8x128xf32>
    %221 = arith.divf %219, %220 : vector<8x128xf32>
    %222 = vector.extract_strided_slice %213 {offsets = [0, 128], sizes = [8, 128], strides = [1, 1]} : vector<8x384xf32> to vector<8x128xf32>
    %223 = vector.extract_strided_slice %210 {offsets = [0, 128], sizes = [8, 128], strides = [1, 1]} : vector<8x384xf32> to vector<8x128xf32>
    %224 = arith.addf %222, %223 : vector<8x128xf32>
    %225 = arith.negf %224 : vector<8x128xf32>
    %226 = math.exp %225 : vector<8x128xf32>
    %cst_88 = arith.constant 1.000000e+00 : f32
    %227 = vector.broadcast %cst_88 : f32 to vector<8x128xf32>
    %228 = arith.addf %227, %226 : vector<8x128xf32>
    %229 = arith.divf %227, %228 : vector<8x128xf32>
    %230 = vector.extract_strided_slice %213 {offsets = [0, 256], sizes = [8, 128], strides = [1, 1]} : vector<8x384xf32> to vector<8x128xf32>
    %231 = vector.extract_strided_slice %210 {offsets = [0, 256], sizes = [8, 128], strides = [1, 1]} : vector<8x384xf32> to vector<8x128xf32>
    %232 = arith.mulf %221, %231 : vector<8x128xf32>
    %233 = arith.addf %230, %232 : vector<8x128xf32>
    %234 = math.tanh %233 : vector<8x128xf32>
    %cst_89 = arith.constant 1.000000e+00 : f32
    %235 = vector.broadcast %cst_89 : f32 to vector<8x128xf32>
    %236 = arith.subf %235, %229 : vector<8x128xf32>
    %237 = arith.mulf %236, %234 : vector<8x128xf32>
    %238 = arith.mulf %229, %207 : vector<8x128xf32>
    %239 = arith.addf %237, %238 : vector<8x128xf32>
    %240 = arith.index_cast %c4_i32 : i32 to index
    %c0_90 = arith.constant 0 : index
    %c0_91 = arith.constant 0 : index
    %241 = vector.load %arg2[%240, %c0_90, %c0_91] : memref<7x8x1xf32, #tpu.memory_space<vmem>>, vector<1x8x1xf32>
    %242 = vector.shape_cast %241 : vector<1x8x1xf32> to vector<8x1xf32>
    %243 = arith.subf %239, %207 : vector<8x128xf32>
    %244 = vector.broadcast %242 : vector<8x1xf32> to vector<8x128xf32>
    %245 = arith.mulf %244, %243 : vector<8x128xf32>
    %246 = arith.addf %207, %245 : vector<8x128xf32>
    %c0_92 = arith.constant 0 : index
    %c0_93 = arith.constant 0 : index
    %247 = vector.load %arg9[%c0_92, %c0_93] : memref<8x128xf32, #tpu.memory_space<vmem>>, vector<8x128xf32>
    tpu.vector_store %arg9[%c0_92, %c0_93], %246 {strides = array<i32>} : memref<8x128xf32, #tpu.memory_space<vmem>>, vector<8x128xf32>,
    %248 = vector.broadcast %242 : vector<8x1xf32> to vector<8x128xf32>
    %249 = arith.mulf %248, %239 : vector<8x128xf32>
    %250 = arith.index_cast %c4_i32 : i32 to index
    %c0_94 = arith.constant 0 : index
    %c0_95 = arith.constant 0 : index
    %251 = vector.load %arg10[%250, %c0_94, %c0_95] : memref<7x8x128xf32, #tpu.memory_space<vmem>>, vector<1x8x128xf32>
    %252 = vector.shape_cast %251 : vector<1x8x128xf32> to vector<8x128xf32>
    %253 = vector.shape_cast %249 : vector<8x128xf32> to vector<1x8x128xf32>
    tpu.vector_store %arg10[%250, %c0_94, %c0_95], %253 {strides = array<i32>} : memref<7x8x128xf32, #tpu.memory_space<vmem>>, vector<1x8x128xf32>,
    %c5_i32 = arith.constant 5 : i32
    %c0_96 = arith.constant 0 : index
    %c0_97 = arith.constant 0 : index
    %254 = vector.load %arg9[%c0_96, %c0_97] : memref<8x128xf32, #tpu.memory_space<vmem>>, vector<8x128xf32>
    %cst_98 = arith.constant dense<0.000000e+00> : vector<8x384xf32>
    %255 = tpu.matmul %254, %16, %cst_98 {dimension_numbers = #tpu.dot_dimension_numbers<[1], [0], [0], [1], [0, 0, 1, 1], [], []>} : vector<8x128xf32>, vector<128x384xf32>, vector<8x384xf32> -> vector<8x384xf32>
    %256 = vector.broadcast %18 : vector<1x384xf32> to vector<8x384xf32>
    %257 = arith.addf %255, %256 : vector<8x384xf32>
    %258 = arith.index_cast %c5_i32 : i32 to index
    %c0_99 = arith.constant 0 : index
    %c0_100 = arith.constant 0 : index
    %259 = vector.load %arg11[%258, %c0_99, %c0_100] : memref<7x8x384xf32, #tpu.memory_space<vmem>>, vector<1x8x384xf32>
    %260 = vector.shape_cast %259 : vector<1x8x384xf32> to vector<8x384xf32>
    %261 = vector.extract_strided_slice %260 {offsets = [0, 0], sizes = [8, 128], strides = [1, 1]} : vector<8x384xf32> to vector<8x128xf32>
    %262 = vector.extract_strided_slice %257 {offsets = [0, 0], sizes = [8, 128], strides = [1, 1]} : vector<8x384xf32> to vector<8x128xf32>
    %263 = arith.addf %261, %262 : vector<8x128xf32>
    %264 = arith.negf %263 : vector<8x128xf32>
    %265 = math.exp %264 : vector<8x128xf32>
    %cst_101 = arith.constant 1.000000e+00 : f32
    %266 = vector.broadcast %cst_101 : f32 to vector<8x128xf32>
    %267 = arith.addf %266, %265 : vector<8x128xf32>
    %268 = arith.divf %266, %267 : vector<8x128xf32>
    %269 = vector.extract_strided_slice %260 {offsets = [0, 128], sizes = [8, 128], strides = [1, 1]} : vector<8x384xf32> to vector<8x128xf32>
    %270 = vector.extract_strided_slice %257 {offsets = [0, 128], sizes = [8, 128], strides = [1, 1]} : vector<8x384xf32> to vector<8x128xf32>
    %271 = arith.addf %269, %270 : vector<8x128xf32>
    %272 = arith.negf %271 : vector<8x128xf32>
    %273 = math.exp %272 : vector<8x128xf32>
    %cst_102 = arith.constant 1.000000e+00 : f32
    %274 = vector.broadcast %cst_102 : f32 to vector<8x128xf32>
    %275 = arith.addf %274, %273 : vector<8x128xf32>
    %276 = arith.divf %274, %275 : vector<8x128xf32>
    %277 = vector.extract_strided_slice %260 {offsets = [0, 256], sizes = [8, 128], strides = [1, 1]} : vector<8x384xf32> to vector<8x128xf32>
    %278 = vector.extract_strided_slice %257 {offsets = [0, 256], sizes = [8, 128], strides = [1, 1]} : vector<8x384xf32> to vector<8x128xf32>
    %279 = arith.mulf %268, %278 : vector<8x128xf32>
    %280 = arith.addf %277, %279 : vector<8x128xf32>
    %281 = math.tanh %280 : vector<8x128xf32>
    %cst_103 = arith.constant 1.000000e+00 : f32
    %282 = vector.broadcast %cst_103 : f32 to vector<8x128xf32>
    %283 = arith.subf %282, %276 : vector<8x128xf32>
    %284 = arith.mulf %283, %281 : vector<8x128xf32>
    %285 = arith.mulf %276, %254 : vector<8x128xf32>
    %286 = arith.addf %284, %285 : vector<8x128xf32>
    %287 = arith.index_cast %c5_i32 : i32 to index
    %c0_104 = arith.constant 0 : index
    %c0_105 = arith.constant 0 : index
    %288 = vector.load %arg2[%287, %c0_104, %c0_105] : memref<7x8x1xf32, #tpu.memory_space<vmem>>, vector<1x8x1xf32>
    %289 = vector.shape_cast %288 : vector<1x8x1xf32> to vector<8x1xf32>
    %290 = arith.subf %286, %254 : vector<8x128xf32>
    %291 = vector.broadcast %289 : vector<8x1xf32> to vector<8x128xf32>
    %292 = arith.mulf %291, %290 : vector<8x128xf32>
    %293 = arith.addf %254, %292 : vector<8x128xf32>
    %c0_106 = arith.constant 0 : index
    %c0_107 = arith.constant 0 : index
    %294 = vector.load %arg9[%c0_106, %c0_107] : memref<8x128xf32, #tpu.memory_space<vmem>>, vector<8x128xf32>
    tpu.vector_store %arg9[%c0_106, %c0_107], %293 {strides = array<i32>} : memref<8x128xf32, #tpu.memory_space<vmem>>, vector<8x128xf32>,
    %295 = vector.broadcast %289 : vector<8x1xf32> to vector<8x128xf32>
    %296 = arith.mulf %295, %286 : vector<8x128xf32>
    %297 = arith.index_cast %c5_i32 : i32 to index
    %c0_108 = arith.constant 0 : index
    %c0_109 = arith.constant 0 : index
    %298 = vector.load %arg10[%297, %c0_108, %c0_109] : memref<7x8x128xf32, #tpu.memory_space<vmem>>, vector<1x8x128xf32>
    %299 = vector.shape_cast %298 : vector<1x8x128xf32> to vector<8x128xf32>
    %300 = vector.shape_cast %296 : vector<8x128xf32> to vector<1x8x128xf32>
    tpu.vector_store %arg10[%297, %c0_108, %c0_109], %300 {strides = array<i32>} : memref<7x8x128xf32, #tpu.memory_space<vmem>>, vector<1x8x128xf32>,
    %c6_i32 = arith.constant 6 : i32
    %c0_110 = arith.constant 0 : index
    %c0_111 = arith.constant 0 : index
    %301 = vector.load %arg9[%c0_110, %c0_111] : memref<8x128xf32, #tpu.memory_space<vmem>>, vector<8x128xf32>
    %cst_112 = arith.constant dense<0.000000e+00> : vector<8x384xf32>
    %302 = tpu.matmul %301, %16, %cst_112 {dimension_numbers = #tpu.dot_dimension_numbers<[1], [0], [0], [1], [0, 0, 1, 1], [], []>} : vector<8x128xf32>, vector<128x384xf32>, vector<8x384xf32> -> vector<8x384xf32>
    %303 = vector.broadcast %18 : vector<1x384xf32> to vector<8x384xf32>
    %304 = arith.addf %302, %303 : vector<8x384xf32>
    %305 = arith.index_cast %c6_i32 : i32 to index
    %c0_113 = arith.constant 0 : index
    %c0_114 = arith.constant 0 : index
    %306 = vector.load %arg11[%305, %c0_113, %c0_114] : memref<7x8x384xf32, #tpu.memory_space<vmem>>, vector<1x8x384xf32>
    %307 = vector.shape_cast %306 : vector<1x8x384xf32> to vector<8x384xf32>
    %308 = vector.extract_strided_slice %307 {offsets = [0, 0], sizes = [8, 128], strides = [1, 1]} : vector<8x384xf32> to vector<8x128xf32>
    %309 = vector.extract_strided_slice %304 {offsets = [0, 0], sizes = [8, 128], strides = [1, 1]} : vector<8x384xf32> to vector<8x128xf32>
    %310 = arith.addf %308, %309 : vector<8x128xf32>
    %311 = arith.negf %310 : vector<8x128xf32>
    %312 = math.exp %311 : vector<8x128xf32>
    %cst_115 = arith.constant 1.000000e+00 : f32
    %313 = vector.broadcast %cst_115 : f32 to vector<8x128xf32>
    %314 = arith.addf %313, %312 : vector<8x128xf32>
    %315 = arith.divf %313, %314 : vector<8x128xf32>
    %316 = vector.extract_strided_slice %307 {offsets = [0, 128], sizes = [8, 128], strides = [1, 1]} : vector<8x384xf32> to vector<8x128xf32>
    %317 = vector.extract_strided_slice %304 {offsets = [0, 128], sizes = [8, 128], strides = [1, 1]} : vector<8x384xf32> to vector<8x128xf32>
    %318 = arith.addf %316, %317 : vector<8x128xf32>
    %319 = arith.negf %318 : vector<8x128xf32>
    %320 = math.exp %319 : vector<8x128xf32>
    %cst_116 = arith.constant 1.000000e+00 : f32
    %321 = vector.broadcast %cst_116 : f32 to vector<8x128xf32>
    %322 = arith.addf %321, %320 : vector<8x128xf32>
    %323 = arith.divf %321, %322 : vector<8x128xf32>
    %324 = vector.extract_strided_slice %307 {offsets = [0, 256], sizes = [8, 128], strides = [1, 1]} : vector<8x384xf32> to vector<8x128xf32>
    %325 = vector.extract_strided_slice %304 {offsets = [0, 256], sizes = [8, 128], strides = [1, 1]} : vector<8x384xf32> to vector<8x128xf32>
    %326 = arith.mulf %315, %325 : vector<8x128xf32>
    %327 = arith.addf %324, %326 : vector<8x128xf32>
    %328 = math.tanh %327 : vector<8x128xf32>
    %cst_117 = arith.constant 1.000000e+00 : f32
    %329 = vector.broadcast %cst_117 : f32 to vector<8x128xf32>
    %330 = arith.subf %329, %323 : vector<8x128xf32>
    %331 = arith.mulf %330, %328 : vector<8x128xf32>
    %332 = arith.mulf %323, %301 : vector<8x128xf32>
    %333 = arith.addf %331, %332 : vector<8x128xf32>
    %334 = arith.index_cast %c6_i32 : i32 to index
    %c0_118 = arith.constant 0 : index
    %c0_119 = arith.constant 0 : index
    %335 = vector.load %arg2[%334, %c0_118, %c0_119] : memref<7x8x1xf32, #tpu.memory_space<vmem>>, vector<1x8x1xf32>
    %336 = vector.shape_cast %335 : vector<1x8x1xf32> to vector<8x1xf32>
    %337 = arith.subf %333, %301 : vector<8x128xf32>
    %338 = vector.broadcast %336 : vector<8x1xf32> to vector<8x128xf32>
    %339 = arith.mulf %338, %337 : vector<8x128xf32>
    %340 = arith.addf %301, %339 : vector<8x128xf32>
    %c0_120 = arith.constant 0 : index
    %c0_121 = arith.constant 0 : index
    %341 = vector.load %arg9[%c0_120, %c0_121] : memref<8x128xf32, #tpu.memory_space<vmem>>, vector<8x128xf32>
    tpu.vector_store %arg9[%c0_120, %c0_121], %340 {strides = array<i32>} : memref<8x128xf32, #tpu.memory_space<vmem>>, vector<8x128xf32>,
    %342 = vector.broadcast %336 : vector<8x1xf32> to vector<8x128xf32>
    %343 = arith.mulf %342, %333 : vector<8x128xf32>
    %344 = arith.index_cast %c6_i32 : i32 to index
    %c0_122 = arith.constant 0 : index
    %c0_123 = arith.constant 0 : index
    %345 = vector.load %arg10[%344, %c0_122, %c0_123] : memref<7x8x128xf32, #tpu.memory_space<vmem>>, vector<1x8x128xf32>
    %346 = vector.shape_cast %345 : vector<1x8x128xf32> to vector<8x128xf32>
    %347 = vector.shape_cast %343 : vector<8x128xf32> to vector<1x8x128xf32>
    tpu.vector_store %arg10[%344, %c0_122, %c0_123], %347 {strides = array<i32>} : memref<7x8x128xf32, #tpu.memory_space<vmem>>, vector<1x8x128xf32>,
    %c7_i32 = arith.constant 7 : i32
    %c0_124 = arith.constant 0 : index
    %c0_125 = arith.constant 0 : index
    %348 = vector.load %arg9[%c0_124, %c0_125] : memref<8x128xf32, #tpu.memory_space<vmem>>, vector<8x128xf32>
    %c0_126 = arith.constant 0 : index
    %c0_127 = arith.constant 0 : index
    %c0_128 = arith.constant 0 : index
    %349 = vector.load %arg8[%c0_126, %c0_127, %c0_128] : memref<2x8x128xf32, #tpu.memory_space<vmem>>, vector<1x8x128xf32>
    %350 = vector.shape_cast %349 : vector<1x8x128xf32> to vector<8x128xf32>
    %351 = vector.shape_cast %348 : vector<8x128xf32> to vector<1x8x128xf32>
    tpu.vector_store %arg8[%c0_126, %c0_127, %c0_128], %351 {strides = array<i32>} : memref<2x8x128xf32, #tpu.memory_space<vmem>>, vector<1x8x128xf32>,
    %c0_129 = arith.constant 0 : index
    %c0_130 = arith.constant 0 : index
    %c0_131 = arith.constant 0 : index
    %352 = vector.load %arg10[%c0_129, %c0_130, %c0_131] : memref<7x8x128xf32, #tpu.memory_space<vmem>>, vector<7x8x128xf32>
    %353 = vector.shape_cast %352 : vector<7x8x128xf32> to vector<56x128xf32>
    %c1 = arith.constant 1 : index
    %c0_132 = arith.constant 0 : index
    %c0_133 = arith.constant 0 : index
    %354 = vector.load %arg3[%c1, %c0_132, %c0_133] : memref<2x128x384xf32, #tpu.memory_space<vmem>>, vector<1x128x384xf32>
    %355 = vector.shape_cast %354 : vector<1x128x384xf32> to vector<128x384xf32>
    %cst_134 = arith.constant dense<0.000000e+00> : vector<56x384xf32>
    %356 = tpu.matmul %353, %355, %cst_134 {dimension_numbers = #tpu.dot_dimension_numbers<[1], [0], [0], [1], [0, 0, 1, 1], [], []>} : vector<56x128xf32>, vector<128x384xf32>, vector<56x384xf32> -> vector<56x384xf32>
    %c1_135 = arith.constant 1 : index
    %c0_136 = arith.constant 0 : index
    %c0_137 = arith.constant 0 : index
    %357 = vector.load %arg5[%c1_135, %c0_136, %c0_137] : memref<2x1x384xf32, #tpu.memory_space<vmem>>, vector<1x1x384xf32>
    %358 = vector.shape_cast %357 : vector<1x1x384xf32> to vector<1x384xf32>
    %359 = vector.broadcast %358 : vector<1x384xf32> to vector<56x384xf32>
    %360 = arith.addf %356, %359 : vector<56x384xf32>
    %361 = vector.shape_cast %360 : vector<56x384xf32> to vector<7x8x384xf32>
    %c0_138 = arith.constant 0 : index
    %c0_139 = arith.constant 0 : index
    %c0_140 = arith.constant 0 : index
    %362 = vector.load %arg11[%c0_138, %c0_139, %c0_140] : memref<7x8x384xf32, #tpu.memory_space<vmem>>, vector<7x8x384xf32>
    tpu.vector_store %arg11[%c0_138, %c0_139, %c0_140], %361 {strides = array<i32>} : memref<7x8x384xf32, #tpu.memory_space<vmem>>, vector<7x8x384xf32>,
    %cst_141 = arith.constant 0.000000e+00 : f32
    %363 = vector.broadcast %cst_141 : f32 to vector<8x128xf32>
    %c0_142 = arith.constant 0 : index
    %c0_143 = arith.constant 0 : index
    %364 = vector.load %arg9[%c0_142, %c0_143] : memref<8x128xf32, #tpu.memory_space<vmem>>, vector<8x128xf32>
    tpu.vector_store %arg9[%c0_142, %c0_143], %363 {strides = array<i32>} : memref<8x128xf32, #tpu.memory_space<vmem>>, vector<8x128xf32>,
    %c1_144 = arith.constant 1 : index
    %c0_145 = arith.constant 0 : index
    %c0_146 = arith.constant 0 : index
    %365 = vector.load %arg4[%c1_144, %c0_145, %c0_146] : memref<2x128x384xf32, #tpu.memory_space<vmem>>, vector<1x128x384xf32>
    %366 = vector.shape_cast %365 : vector<1x128x384xf32> to vector<128x384xf32>
    %c1_147 = arith.constant 1 : index
    %c0_148 = arith.constant 0 : index
    %c0_149 = arith.constant 0 : index
    %367 = vector.load %arg6[%c1_147, %c0_148, %c0_149] : memref<2x1x384xf32, #tpu.memory_space<vmem>>, vector<1x1x384xf32>
    %368 = vector.shape_cast %367 : vector<1x1x384xf32> to vector<1x384xf32>
    %c0_i32_150 = arith.constant 0 : i32
    %c0_151 = arith.constant 0 : index
    %c0_152 = arith.constant 0 : index
    %369 = vector.load %arg9[%c0_151, %c0_152] : memref<8x128xf32, #tpu.memory_space<vmem>>, vector<8x128xf32>
    %cst_153 = arith.constant dense<0.000000e+00> : vector<8x384xf32>
    %370 = tpu.matmul %369, %366, %cst_153 {dimension_numbers = #tpu.dot_dimension_numbers<[1], [0], [0], [1], [0, 0, 1, 1], [], []>} : vector<8x128xf32>, vector<128x384xf32>, vector<8x384xf32> -> vector<8x384xf32>
    %371 = vector.broadcast %368 : vector<1x384xf32> to vector<8x384xf32>
    %372 = arith.addf %370, %371 : vector<8x384xf32>
    %373 = arith.index_cast %c0_i32_150 : i32 to index
    %c0_154 = arith.constant 0 : index
    %c0_155 = arith.constant 0 : index
    %374 = vector.load %arg11[%373, %c0_154, %c0_155] : memref<7x8x384xf32, #tpu.memory_space<vmem>>, vector<1x8x384xf32>
    %375 = vector.shape_cast %374 : vector<1x8x384xf32> to vector<8x384xf32>
    %376 = vector.extract_strided_slice %375 {offsets = [0, 0], sizes = [8, 128], strides = [1, 1]} : vector<8x384xf32> to vector<8x128xf32>
    %377 = vector.extract_strided_slice %372 {offsets = [0, 0], sizes = [8, 128], strides = [1, 1]} : vector<8x384xf32> to vector<8x128xf32>
    %378 = arith.addf %376, %377 : vector<8x128xf32>
    %379 = arith.negf %378 : vector<8x128xf32>
    %380 = math.exp %379 : vector<8x128xf32>
    %cst_156 = arith.constant 1.000000e+00 : f32
    %381 = vector.broadcast %cst_156 : f32 to vector<8x128xf32>
    %382 = arith.addf %381, %380 : vector<8x128xf32>
    %383 = arith.divf %381, %382 : vector<8x128xf32>
    %384 = vector.extract_strided_slice %375 {offsets = [0, 128], sizes = [8, 128], strides = [1, 1]} : vector<8x384xf32> to vector<8x128xf32>
    %385 = vector.extract_strided_slice %372 {offsets = [0, 128], sizes = [8, 128], strides = [1, 1]} : vector<8x384xf32> to vector<8x128xf32>
    %386 = arith.addf %384, %385 : vector<8x128xf32>
    %387 = arith.negf %386 : vector<8x128xf32>
    %388 = math.exp %387 : vector<8x128xf32>
    %cst_157 = arith.constant 1.000000e+00 : f32
    %389 = vector.broadcast %cst_157 : f32 to vector<8x128xf32>
    %390 = arith.addf %389, %388 : vector<8x128xf32>
    %391 = arith.divf %389, %390 : vector<8x128xf32>
    %392 = vector.extract_strided_slice %375 {offsets = [0, 256], sizes = [8, 128], strides = [1, 1]} : vector<8x384xf32> to vector<8x128xf32>
    %393 = vector.extract_strided_slice %372 {offsets = [0, 256], sizes = [8, 128], strides = [1, 1]} : vector<8x384xf32> to vector<8x128xf32>
    %394 = arith.mulf %383, %393 : vector<8x128xf32>
    %395 = arith.addf %392, %394 : vector<8x128xf32>
    %396 = math.tanh %395 : vector<8x128xf32>
    %cst_158 = arith.constant 1.000000e+00 : f32
    %397 = vector.broadcast %cst_158 : f32 to vector<8x128xf32>
    %398 = arith.subf %397, %391 : vector<8x128xf32>
    %399 = arith.mulf %398, %396 : vector<8x128xf32>
    %400 = arith.mulf %391, %369 : vector<8x128xf32>
    %401 = arith.addf %399, %400 : vector<8x128xf32>
    %402 = arith.index_cast %c0_i32_150 : i32 to index
    %c0_159 = arith.constant 0 : index
    %c0_160 = arith.constant 0 : index
    %403 = vector.load %arg2[%402, %c0_159, %c0_160] : memref<7x8x1xf32, #tpu.memory_space<vmem>>, vector<1x8x1xf32>
    %404 = vector.shape_cast %403 : vector<1x8x1xf32> to vector<8x1xf32>
    %405 = arith.subf %401, %369 : vector<8x128xf32>
    %406 = vector.broadcast %404 : vector<8x1xf32> to vector<8x128xf32>
    %407 = arith.mulf %406, %405 : vector<8x128xf32>
    %408 = arith.addf %369, %407 : vector<8x128xf32>
    %c0_161 = arith.constant 0 : index
    %c0_162 = arith.constant 0 : index
    %409 = vector.load %arg9[%c0_161, %c0_162] : memref<8x128xf32, #tpu.memory_space<vmem>>, vector<8x128xf32>
    tpu.vector_store %arg9[%c0_161, %c0_162], %408 {strides = array<i32>} : memref<8x128xf32, #tpu.memory_space<vmem>>, vector<8x128xf32>,
    %410 = vector.broadcast %404 : vector<8x1xf32> to vector<8x128xf32>
    %411 = arith.mulf %410, %401 : vector<8x128xf32>
    %412 = arith.index_cast %c0_i32_150 : i32 to index
    %c0_163 = arith.constant 0 : index
    %c0_164 = arith.constant 0 : index
    %413 = vector.load %arg10[%412, %c0_163, %c0_164] : memref<7x8x128xf32, #tpu.memory_space<vmem>>, vector<1x8x128xf32>
    %414 = vector.shape_cast %413 : vector<1x8x128xf32> to vector<8x128xf32>
    %415 = vector.shape_cast %411 : vector<8x128xf32> to vector<1x8x128xf32>
    tpu.vector_store %arg10[%412, %c0_163, %c0_164], %415 {strides = array<i32>} : memref<7x8x128xf32, #tpu.memory_space<vmem>>, vector<1x8x128xf32>,
    %c1_i32_165 = arith.constant 1 : i32
    %c0_166 = arith.constant 0 : index
    %c0_167 = arith.constant 0 : index
    %416 = vector.load %arg9[%c0_166, %c0_167] : memref<8x128xf32, #tpu.memory_space<vmem>>, vector<8x128xf32>
    %cst_168 = arith.constant dense<0.000000e+00> : vector<8x384xf32>
    %417 = tpu.matmul %416, %366, %cst_168 {dimension_numbers = #tpu.dot_dimension_numbers<[1], [0], [0], [1], [0, 0, 1, 1], [], []>} : vector<8x128xf32>, vector<128x384xf32>, vector<8x384xf32> -> vector<8x384xf32>
    %418 = vector.broadcast %368 : vector<1x384xf32> to vector<8x384xf32>
    %419 = arith.addf %417, %418 : vector<8x384xf32>
    %420 = arith.index_cast %c1_i32_165 : i32 to index
    %c0_169 = arith.constant 0 : index
    %c0_170 = arith.constant 0 : index
    %421 = vector.load %arg11[%420, %c0_169, %c0_170] : memref<7x8x384xf32, #tpu.memory_space<vmem>>, vector<1x8x384xf32>
    %422 = vector.shape_cast %421 : vector<1x8x384xf32> to vector<8x384xf32>
    %423 = vector.extract_strided_slice %422 {offsets = [0, 0], sizes = [8, 128], strides = [1, 1]} : vector<8x384xf32> to vector<8x128xf32>
    %424 = vector.extract_strided_slice %419 {offsets = [0, 0], sizes = [8, 128], strides = [1, 1]} : vector<8x384xf32> to vector<8x128xf32>
    %425 = arith.addf %423, %424 : vector<8x128xf32>
    %426 = arith.negf %425 : vector<8x128xf32>
    %427 = math.exp %426 : vector<8x128xf32>
    %cst_171 = arith.constant 1.000000e+00 : f32
    %428 = vector.broadcast %cst_171 : f32 to vector<8x128xf32>
    %429 = arith.addf %428, %427 : vector<8x128xf32>
    %430 = arith.divf %428, %429 : vector<8x128xf32>
    %431 = vector.extract_strided_slice %422 {offsets = [0, 128], sizes = [8, 128], strides = [1, 1]} : vector<8x384xf32> to vector<8x128xf32>
    %432 = vector.extract_strided_slice %419 {offsets = [0, 128], sizes = [8, 128], strides = [1, 1]} : vector<8x384xf32> to vector<8x128xf32>
    %433 = arith.addf %431, %432 : vector<8x128xf32>
    %434 = arith.negf %433 : vector<8x128xf32>
    %435 = math.exp %434 : vector<8x128xf32>
    %cst_172 = arith.constant 1.000000e+00 : f32
    %436 = vector.broadcast %cst_172 : f32 to vector<8x128xf32>
    %437 = arith.addf %436, %435 : vector<8x128xf32>
    %438 = arith.divf %436, %437 : vector<8x128xf32>
    %439 = vector.extract_strided_slice %422 {offsets = [0, 256], sizes = [8, 128], strides = [1, 1]} : vector<8x384xf32> to vector<8x128xf32>
    %440 = vector.extract_strided_slice %419 {offsets = [0, 256], sizes = [8, 128], strides = [1, 1]} : vector<8x384xf32> to vector<8x128xf32>
    %441 = arith.mulf %430, %440 : vector<8x128xf32>
    %442 = arith.addf %439, %441 : vector<8x128xf32>
    %443 = math.tanh %442 : vector<8x128xf32>
    %cst_173 = arith.constant 1.000000e+00 : f32
    %444 = vector.broadcast %cst_173 : f32 to vector<8x128xf32>
    %445 = arith.subf %444, %438 : vector<8x128xf32>
    %446 = arith.mulf %445, %443 : vector<8x128xf32>
    %447 = arith.mulf %438, %416 : vector<8x128xf32>
    %448 = arith.addf %446, %447 : vector<8x128xf32>
    %449 = arith.index_cast %c1_i32_165 : i32 to index
    %c0_174 = arith.constant 0 : index
    %c0_175 = arith.constant 0 : index
    %450 = vector.load %arg2[%449, %c0_174, %c0_175] : memref<7x8x1xf32, #tpu.memory_space<vmem>>, vector<1x8x1xf32>
    %451 = vector.shape_cast %450 : vector<1x8x1xf32> to vector<8x1xf32>
    %452 = arith.subf %448, %416 : vector<8x128xf32>
    %453 = vector.broadcast %451 : vector<8x1xf32> to vector<8x128xf32>
    %454 = arith.mulf %453, %452 : vector<8x128xf32>
    %455 = arith.addf %416, %454 : vector<8x128xf32>
    %c0_176 = arith.constant 0 : index
    %c0_177 = arith.constant 0 : index
    %456 = vector.load %arg9[%c0_176, %c0_177] : memref<8x128xf32, #tpu.memory_space<vmem>>, vector<8x128xf32>
    tpu.vector_store %arg9[%c0_176, %c0_177], %455 {strides = array<i32>} : memref<8x128xf32, #tpu.memory_space<vmem>>, vector<8x128xf32>,
    %457 = vector.broadcast %451 : vector<8x1xf32> to vector<8x128xf32>
    %458 = arith.mulf %457, %448 : vector<8x128xf32>
    %459 = arith.index_cast %c1_i32_165 : i32 to index
    %c0_178 = arith.constant 0 : index
    %c0_179 = arith.constant 0 : index
    %460 = vector.load %arg10[%459, %c0_178, %c0_179] : memref<7x8x128xf32, #tpu.memory_space<vmem>>, vector<1x8x128xf32>
    %461 = vector.shape_cast %460 : vector<1x8x128xf32> to vector<8x128xf32>
    %462 = vector.shape_cast %458 : vector<8x128xf32> to vector<1x8x128xf32>
    tpu.vector_store %arg10[%459, %c0_178, %c0_179], %462 {strides = array<i32>} : memref<7x8x128xf32, #tpu.memory_space<vmem>>, vector<1x8x128xf32>,
    %c2_i32_180 = arith.constant 2 : i32
    %c0_181 = arith.constant 0 : index
    %c0_182 = arith.constant 0 : index
    %463 = vector.load %arg9[%c0_181, %c0_182] : memref<8x128xf32, #tpu.memory_space<vmem>>, vector<8x128xf32>
    %cst_183 = arith.constant dense<0.000000e+00> : vector<8x384xf32>
    %464 = tpu.matmul %463, %366, %cst_183 {dimension_numbers = #tpu.dot_dimension_numbers<[1], [0], [0], [1], [0, 0, 1, 1], [], []>} : vector<8x128xf32>, vector<128x384xf32>, vector<8x384xf32> -> vector<8x384xf32>
    %465 = vector.broadcast %368 : vector<1x384xf32> to vector<8x384xf32>
    %466 = arith.addf %464, %465 : vector<8x384xf32>
    %467 = arith.index_cast %c2_i32_180 : i32 to index
    %c0_184 = arith.constant 0 : index
    %c0_185 = arith.constant 0 : index
    %468 = vector.load %arg11[%467, %c0_184, %c0_185] : memref<7x8x384xf32, #tpu.memory_space<vmem>>, vector<1x8x384xf32>
    %469 = vector.shape_cast %468 : vector<1x8x384xf32> to vector<8x384xf32>
    %470 = vector.extract_strided_slice %469 {offsets = [0, 0], sizes = [8, 128], strides = [1, 1]} : vector<8x384xf32> to vector<8x128xf32>
    %471 = vector.extract_strided_slice %466 {offsets = [0, 0], sizes = [8, 128], strides = [1, 1]} : vector<8x384xf32> to vector<8x128xf32>
    %472 = arith.addf %470, %471 : vector<8x128xf32>
    %473 = arith.negf %472 : vector<8x128xf32>
    %474 = math.exp %473 : vector<8x128xf32>
    %cst_186 = arith.constant 1.000000e+00 : f32
    %475 = vector.broadcast %cst_186 : f32 to vector<8x128xf32>
    %476 = arith.addf %475, %474 : vector<8x128xf32>
    %477 = arith.divf %475, %476 : vector<8x128xf32>
    %478 = vector.extract_strided_slice %469 {offsets = [0, 128], sizes = [8, 128], strides = [1, 1]} : vector<8x384xf32> to vector<8x128xf32>
    %479 = vector.extract_strided_slice %466 {offsets = [0, 128], sizes = [8, 128], strides = [1, 1]} : vector<8x384xf32> to vector<8x128xf32>
    %480 = arith.addf %478, %479 : vector<8x128xf32>
    %481 = arith.negf %480 : vector<8x128xf32>
    %482 = math.exp %481 : vector<8x128xf32>
    %cst_187 = arith.constant 1.000000e+00 : f32
    %483 = vector.broadcast %cst_187 : f32 to vector<8x128xf32>
    %484 = arith.addf %483, %482 : vector<8x128xf32>
    %485 = arith.divf %483, %484 : vector<8x128xf32>
    %486 = vector.extract_strided_slice %469 {offsets = [0, 256], sizes = [8, 128], strides = [1, 1]} : vector<8x384xf32> to vector<8x128xf32>
    %487 = vector.extract_strided_slice %466 {offsets = [0, 256], sizes = [8, 128], strides = [1, 1]} : vector<8x384xf32> to vector<8x128xf32>
    %488 = arith.mulf %477, %487 : vector<8x128xf32>
    %489 = arith.addf %486, %488 : vector<8x128xf32>
    %490 = math.tanh %489 : vector<8x128xf32>
    %cst_188 = arith.constant 1.000000e+00 : f32
    %491 = vector.broadcast %cst_188 : f32 to vector<8x128xf32>
    %492 = arith.subf %491, %485 : vector<8x128xf32>
    %493 = arith.mulf %492, %490 : vector<8x128xf32>
    %494 = arith.mulf %485, %463 : vector<8x128xf32>
    %495 = arith.addf %493, %494 : vector<8x128xf32>
    %496 = arith.index_cast %c2_i32_180 : i32 to index
    %c0_189 = arith.constant 0 : index
    %c0_190 = arith.constant 0 : index
    %497 = vector.load %arg2[%496, %c0_189, %c0_190] : memref<7x8x1xf32, #tpu.memory_space<vmem>>, vector<1x8x1xf32>
    %498 = vector.shape_cast %497 : vector<1x8x1xf32> to vector<8x1xf32>
    %499 = arith.subf %495, %463 : vector<8x128xf32>
    %500 = vector.broadcast %498 : vector<8x1xf32> to vector<8x128xf32>
    %501 = arith.mulf %500, %499 : vector<8x128xf32>
    %502 = arith.addf %463, %501 : vector<8x128xf32>
    %c0_191 = arith.constant 0 : index
    %c0_192 = arith.constant 0 : index
    %503 = vector.load %arg9[%c0_191, %c0_192] : memref<8x128xf32, #tpu.memory_space<vmem>>, vector<8x128xf32>
    tpu.vector_store %arg9[%c0_191, %c0_192], %502 {strides = array<i32>} : memref<8x128xf32, #tpu.memory_space<vmem>>, vector<8x128xf32>,
    %504 = vector.broadcast %498 : vector<8x1xf32> to vector<8x128xf32>
    %505 = arith.mulf %504, %495 : vector<8x128xf32>
    %506 = arith.index_cast %c2_i32_180 : i32 to index
    %c0_193 = arith.constant 0 : index
    %c0_194 = arith.constant 0 : index
    %507 = vector.load %arg10[%506, %c0_193, %c0_194] : memref<7x8x128xf32, #tpu.memory_space<vmem>>, vector<1x8x128xf32>
    %508 = vector.shape_cast %507 : vector<1x8x128xf32> to vector<8x128xf32>
    %509 = vector.shape_cast %505 : vector<8x128xf32> to vector<1x8x128xf32>
    tpu.vector_store %arg10[%506, %c0_193, %c0_194], %509 {strides = array<i32>} : memref<7x8x128xf32, #tpu.memory_space<vmem>>, vector<1x8x128xf32>,
    %c3_i32_195 = arith.constant 3 : i32
    %c0_196 = arith.constant 0 : index
    %c0_197 = arith.constant 0 : index
    %510 = vector.load %arg9[%c0_196, %c0_197] : memref<8x128xf32, #tpu.memory_space<vmem>>, vector<8x128xf32>
    %cst_198 = arith.constant dense<0.000000e+00> : vector<8x384xf32>
    %511 = tpu.matmul %510, %366, %cst_198 {dimension_numbers = #tpu.dot_dimension_numbers<[1], [0], [0], [1], [0, 0, 1, 1], [], []>} : vector<8x128xf32>, vector<128x384xf32>, vector<8x384xf32> -> vector<8x384xf32>
    %512 = vector.broadcast %368 : vector<1x384xf32> to vector<8x384xf32>
    %513 = arith.addf %511, %512 : vector<8x384xf32>
    %514 = arith.index_cast %c3_i32_195 : i32 to index
    %c0_199 = arith.constant 0 : index
    %c0_200 = arith.constant 0 : index
    %515 = vector.load %arg11[%514, %c0_199, %c0_200] : memref<7x8x384xf32, #tpu.memory_space<vmem>>, vector<1x8x384xf32>
    %516 = vector.shape_cast %515 : vector<1x8x384xf32> to vector<8x384xf32>
    %517 = vector.extract_strided_slice %516 {offsets = [0, 0], sizes = [8, 128], strides = [1, 1]} : vector<8x384xf32> to vector<8x128xf32>
    %518 = vector.extract_strided_slice %513 {offsets = [0, 0], sizes = [8, 128], strides = [1, 1]} : vector<8x384xf32> to vector<8x128xf32>
    %519 = arith.addf %517, %518 : vector<8x128xf32>
    %520 = arith.negf %519 : vector<8x128xf32>
    %521 = math.exp %520 : vector<8x128xf32>
    %cst_201 = arith.constant 1.000000e+00 : f32
    %522 = vector.broadcast %cst_201 : f32 to vector<8x128xf32>
    %523 = arith.addf %522, %521 : vector<8x128xf32>
    %524 = arith.divf %522, %523 : vector<8x128xf32>
    %525 = vector.extract_strided_slice %516 {offsets = [0, 128], sizes = [8, 128], strides = [1, 1]} : vector<8x384xf32> to vector<8x128xf32>
    %526 = vector.extract_strided_slice %513 {offsets = [0, 128], sizes = [8, 128], strides = [1, 1]} : vector<8x384xf32> to vector<8x128xf32>
    %527 = arith.addf %525, %526 : vector<8x128xf32>
    %528 = arith.negf %527 : vector<8x128xf32>
    %529 = math.exp %528 : vector<8x128xf32>
    %cst_202 = arith.constant 1.000000e+00 : f32
    %530 = vector.broadcast %cst_202 : f32 to vector<8x128xf32>
    %531 = arith.addf %530, %529 : vector<8x128xf32>
    %532 = arith.divf %530, %531 : vector<8x128xf32>
    %533 = vector.extract_strided_slice %516 {offsets = [0, 256], sizes = [8, 128], strides = [1, 1]} : vector<8x384xf32> to vector<8x128xf32>
    %534 = vector.extract_strided_slice %513 {offsets = [0, 256], sizes = [8, 128], strides = [1, 1]} : vector<8x384xf32> to vector<8x128xf32>
    %535 = arith.mulf %524, %534 : vector<8x128xf32>
    %536 = arith.addf %533, %535 : vector<8x128xf32>
    %537 = math.tanh %536 : vector<8x128xf32>
    %cst_203 = arith.constant 1.000000e+00 : f32
    %538 = vector.broadcast %cst_203 : f32 to vector<8x128xf32>
    %539 = arith.subf %538, %532 : vector<8x128xf32>
    %540 = arith.mulf %539, %537 : vector<8x128xf32>
    %541 = arith.mulf %532, %510 : vector<8x128xf32>
    %542 = arith.addf %540, %541 : vector<8x128xf32>
    %543 = arith.index_cast %c3_i32_195 : i32 to index
    %c0_204 = arith.constant 0 : index
    %c0_205 = arith.constant 0 : index
    %544 = vector.load %arg2[%543, %c0_204, %c0_205] : memref<7x8x1xf32, #tpu.memory_space<vmem>>, vector<1x8x1xf32>
    %545 = vector.shape_cast %544 : vector<1x8x1xf32> to vector<8x1xf32>
    %546 = arith.subf %542, %510 : vector<8x128xf32>
    %547 = vector.broadcast %545 : vector<8x1xf32> to vector<8x128xf32>
    %548 = arith.mulf %547, %546 : vector<8x128xf32>
    %549 = arith.addf %510, %548 : vector<8x128xf32>
    %c0_206 = arith.constant 0 : index
    %c0_207 = arith.constant 0 : index
    %550 = vector.load %arg9[%c0_206, %c0_207] : memref<8x128xf32, #tpu.memory_space<vmem>>, vector<8x128xf32>
    tpu.vector_store %arg9[%c0_206, %c0_207], %549 {strides = array<i32>} : memref<8x128xf32, #tpu.memory_space<vmem>>, vector<8x128xf32>,
    %551 = vector.broadcast %545 : vector<8x1xf32> to vector<8x128xf32>
    %552 = arith.mulf %551, %542 : vector<8x128xf32>
    %553 = arith.index_cast %c3_i32_195 : i32 to index
    %c0_208 = arith.constant 0 : index
    %c0_209 = arith.constant 0 : index
    %554 = vector.load %arg10[%553, %c0_208, %c0_209] : memref<7x8x128xf32, #tpu.memory_space<vmem>>, vector<1x8x128xf32>
    %555 = vector.shape_cast %554 : vector<1x8x128xf32> to vector<8x128xf32>
    %556 = vector.shape_cast %552 : vector<8x128xf32> to vector<1x8x128xf32>
    tpu.vector_store %arg10[%553, %c0_208, %c0_209], %556 {strides = array<i32>} : memref<7x8x128xf32, #tpu.memory_space<vmem>>, vector<1x8x128xf32>,
    %c4_i32_210 = arith.constant 4 : i32
    %c0_211 = arith.constant 0 : index
    %c0_212 = arith.constant 0 : index
    %557 = vector.load %arg9[%c0_211, %c0_212] : memref<8x128xf32, #tpu.memory_space<vmem>>, vector<8x128xf32>
    %cst_213 = arith.constant dense<0.000000e+00> : vector<8x384xf32>
    %558 = tpu.matmul %557, %366, %cst_213 {dimension_numbers = #tpu.dot_dimension_numbers<[1], [0], [0], [1], [0, 0, 1, 1], [], []>} : vector<8x128xf32>, vector<128x384xf32>, vector<8x384xf32> -> vector<8x384xf32>
    %559 = vector.broadcast %368 : vector<1x384xf32> to vector<8x384xf32>
    %560 = arith.addf %558, %559 : vector<8x384xf32>
    %561 = arith.index_cast %c4_i32_210 : i32 to index
    %c0_214 = arith.constant 0 : index
    %c0_215 = arith.constant 0 : index
    %562 = vector.load %arg11[%561, %c0_214, %c0_215] : memref<7x8x384xf32, #tpu.memory_space<vmem>>, vector<1x8x384xf32>
    %563 = vector.shape_cast %562 : vector<1x8x384xf32> to vector<8x384xf32>
    %564 = vector.extract_strided_slice %563 {offsets = [0, 0], sizes = [8, 128], strides = [1, 1]} : vector<8x384xf32> to vector<8x128xf32>
    %565 = vector.extract_strided_slice %560 {offsets = [0, 0], sizes = [8, 128], strides = [1, 1]} : vector<8x384xf32> to vector<8x128xf32>
    %566 = arith.addf %564, %565 : vector<8x128xf32>
    %567 = arith.negf %566 : vector<8x128xf32>
    %568 = math.exp %567 : vector<8x128xf32>
    %cst_216 = arith.constant 1.000000e+00 : f32
    %569 = vector.broadcast %cst_216 : f32 to vector<8x128xf32>
    %570 = arith.addf %569, %568 : vector<8x128xf32>
    %571 = arith.divf %569, %570 : vector<8x128xf32>
    %572 = vector.extract_strided_slice %563 {offsets = [0, 128], sizes = [8, 128], strides = [1, 1]} : vector<8x384xf32> to vector<8x128xf32>
    %573 = vector.extract_strided_slice %560 {offsets = [0, 128], sizes = [8, 128], strides = [1, 1]} : vector<8x384xf32> to vector<8x128xf32>
    %574 = arith.addf %572, %573 : vector<8x128xf32>
    %575 = arith.negf %574 : vector<8x128xf32>
    %576 = math.exp %575 : vector<8x128xf32>
    %cst_217 = arith.constant 1.000000e+00 : f32
    %577 = vector.broadcast %cst_217 : f32 to vector<8x128xf32>
    %578 = arith.addf %577, %576 : vector<8x128xf32>
    %579 = arith.divf %577, %578 : vector<8x128xf32>
    %580 = vector.extract_strided_slice %563 {offsets = [0, 256], sizes = [8, 128], strides = [1, 1]} : vector<8x384xf32> to vector<8x128xf32>
    %581 = vector.extract_strided_slice %560 {offsets = [0, 256], sizes = [8, 128], strides = [1, 1]} : vector<8x384xf32> to vector<8x128xf32>
    %582 = arith.mulf %571, %581 : vector<8x128xf32>
    %583 = arith.addf %580, %582 : vector<8x128xf32>
    %584 = math.tanh %583 : vector<8x128xf32>
    %cst_218 = arith.constant 1.000000e+00 : f32
    %585 = vector.broadcast %cst_218 : f32 to vector<8x128xf32>
    %586 = arith.subf %585, %579 : vector<8x128xf32>
    %587 = arith.mulf %586, %584 : vector<8x128xf32>
    %588 = arith.mulf %579, %557 : vector<8x128xf32>
    %589 = arith.addf %587, %588 : vector<8x128xf32>
    %590 = arith.index_cast %c4_i32_210 : i32 to index
    %c0_219 = arith.constant 0 : index
    %c0_220 = arith.constant 0 : index
    %591 = vector.load %arg2[%590, %c0_219, %c0_220] : memref<7x8x1xf32, #tpu.memory_space<vmem>>, vector<1x8x1xf32>
    %592 = vector.shape_cast %591 : vector<1x8x1xf32> to vector<8x1xf32>
    %593 = arith.subf %589, %557 : vector<8x128xf32>
    %594 = vector.broadcast %592 : vector<8x1xf32> to vector<8x128xf32>
    %595 = arith.mulf %594, %593 : vector<8x128xf32>
    %596 = arith.addf %557, %595 : vector<8x128xf32>
    %c0_221 = arith.constant 0 : index
    %c0_222 = arith.constant 0 : index
    %597 = vector.load %arg9[%c0_221, %c0_222] : memref<8x128xf32, #tpu.memory_space<vmem>>, vector<8x128xf32>
    tpu.vector_store %arg9[%c0_221, %c0_222], %596 {strides = array<i32>} : memref<8x128xf32, #tpu.memory_space<vmem>>, vector<8x128xf32>,
    %598 = vector.broadcast %592 : vector<8x1xf32> to vector<8x128xf32>
    %599 = arith.mulf %598, %589 : vector<8x128xf32>
    %600 = arith.index_cast %c4_i32_210 : i32 to index
    %c0_223 = arith.constant 0 : index
    %c0_224 = arith.constant 0 : index
    %601 = vector.load %arg10[%600, %c0_223, %c0_224] : memref<7x8x128xf32, #tpu.memory_space<vmem>>, vector<1x8x128xf32>
    %602 = vector.shape_cast %601 : vector<1x8x128xf32> to vector<8x128xf32>
    %603 = vector.shape_cast %599 : vector<8x128xf32> to vector<1x8x128xf32>
    tpu.vector_store %arg10[%600, %c0_223, %c0_224], %603 {strides = array<i32>} : memref<7x8x128xf32, #tpu.memory_space<vmem>>, vector<1x8x128xf32>,
    %c5_i32_225 = arith.constant 5 : i32
    %c0_226 = arith.constant 0 : index
    %c0_227 = arith.constant 0 : index
    %604 = vector.load %arg9[%c0_226, %c0_227] : memref<8x128xf32, #tpu.memory_space<vmem>>, vector<8x128xf32>
    %cst_228 = arith.constant dense<0.000000e+00> : vector<8x384xf32>
    %605 = tpu.matmul %604, %366, %cst_228 {dimension_numbers = #tpu.dot_dimension_numbers<[1], [0], [0], [1], [0, 0, 1, 1], [], []>} : vector<8x128xf32>, vector<128x384xf32>, vector<8x384xf32> -> vector<8x384xf32>
    %606 = vector.broadcast %368 : vector<1x384xf32> to vector<8x384xf32>
    %607 = arith.addf %605, %606 : vector<8x384xf32>
    %608 = arith.index_cast %c5_i32_225 : i32 to index
    %c0_229 = arith.constant 0 : index
    %c0_230 = arith.constant 0 : index
    %609 = vector.load %arg11[%608, %c0_229, %c0_230] : memref<7x8x384xf32, #tpu.memory_space<vmem>>, vector<1x8x384xf32>
    %610 = vector.shape_cast %609 : vector<1x8x384xf32> to vector<8x384xf32>
    %611 = vector.extract_strided_slice %610 {offsets = [0, 0], sizes = [8, 128], strides = [1, 1]} : vector<8x384xf32> to vector<8x128xf32>
    %612 = vector.extract_strided_slice %607 {offsets = [0, 0], sizes = [8, 128], strides = [1, 1]} : vector<8x384xf32> to vector<8x128xf32>
    %613 = arith.addf %611, %612 : vector<8x128xf32>
    %614 = arith.negf %613 : vector<8x128xf32>
    %615 = math.exp %614 : vector<8x128xf32>
    %cst_231 = arith.constant 1.000000e+00 : f32
    %616 = vector.broadcast %cst_231 : f32 to vector<8x128xf32>
    %617 = arith.addf %616, %615 : vector<8x128xf32>
    %618 = arith.divf %616, %617 : vector<8x128xf32>
    %619 = vector.extract_strided_slice %610 {offsets = [0, 128], sizes = [8, 128], strides = [1, 1]} : vector<8x384xf32> to vector<8x128xf32>
    %620 = vector.extract_strided_slice %607 {offsets = [0, 128], sizes = [8, 128], strides = [1, 1]} : vector<8x384xf32> to vector<8x128xf32>
    %621 = arith.addf %619, %620 : vector<8x128xf32>
    %622 = arith.negf %621 : vector<8x128xf32>
    %623 = math.exp %622 : vector<8x128xf32>
    %cst_232 = arith.constant 1.000000e+00 : f32
    %624 = vector.broadcast %cst_232 : f32 to vector<8x128xf32>
    %625 = arith.addf %624, %623 : vector<8x128xf32>
    %626 = arith.divf %624, %625 : vector<8x128xf32>
    %627 = vector.extract_strided_slice %610 {offsets = [0, 256], sizes = [8, 128], strides = [1, 1]} : vector<8x384xf32> to vector<8x128xf32>
    %628 = vector.extract_strided_slice %607 {offsets = [0, 256], sizes = [8, 128], strides = [1, 1]} : vector<8x384xf32> to vector<8x128xf32>
    %629 = arith.mulf %618, %628 : vector<8x128xf32>
    %630 = arith.addf %627, %629 : vector<8x128xf32>
    %631 = math.tanh %630 : vector<8x128xf32>
    %cst_233 = arith.constant 1.000000e+00 : f32
    %632 = vector.broadcast %cst_233 : f32 to vector<8x128xf32>
    %633 = arith.subf %632, %626 : vector<8x128xf32>
    %634 = arith.mulf %633, %631 : vector<8x128xf32>
    %635 = arith.mulf %626, %604 : vector<8x128xf32>
    %636 = arith.addf %634, %635 : vector<8x128xf32>
    %637 = arith.index_cast %c5_i32_225 : i32 to index
    %c0_234 = arith.constant 0 : index
    %c0_235 = arith.constant 0 : index
    %638 = vector.load %arg2[%637, %c0_234, %c0_235] : memref<7x8x1xf32, #tpu.memory_space<vmem>>, vector<1x8x1xf32>
    %639 = vector.shape_cast %638 : vector<1x8x1xf32> to vector<8x1xf32>
    %640 = arith.subf %636, %604 : vector<8x128xf32>
    %641 = vector.broadcast %639 : vector<8x1xf32> to vector<8x128xf32>
    %642 = arith.mulf %641, %640 : vector<8x128xf32>
    %643 = arith.addf %604, %642 : vector<8x128xf32>
    %c0_236 = arith.constant 0 : index
    %c0_237 = arith.constant 0 : index
    %644 = vector.load %arg9[%c0_236, %c0_237] : memref<8x128xf32, #tpu.memory_space<vmem>>, vector<8x128xf32>
    tpu.vector_store %arg9[%c0_236, %c0_237], %643 {strides = array<i32>} : memref<8x128xf32, #tpu.memory_space<vmem>>, vector<8x128xf32>,
    %645 = vector.broadcast %639 : vector<8x1xf32> to vector<8x128xf32>
    %646 = arith.mulf %645, %636 : vector<8x128xf32>
    %647 = arith.index_cast %c5_i32_225 : i32 to index
    %c0_238 = arith.constant 0 : index
    %c0_239 = arith.constant 0 : index
    %648 = vector.load %arg10[%647, %c0_238, %c0_239] : memref<7x8x128xf32, #tpu.memory_space<vmem>>, vector<1x8x128xf32>
    %649 = vector.shape_cast %648 : vector<1x8x128xf32> to vector<8x128xf32>
    %650 = vector.shape_cast %646 : vector<8x128xf32> to vector<1x8x128xf32>
    tpu.vector_store %arg10[%647, %c0_238, %c0_239], %650 {strides = array<i32>} : memref<7x8x128xf32, #tpu.memory_space<vmem>>, vector<1x8x128xf32>,
    %c6_i32_240 = arith.constant 6 : i32
    %c0_241 = arith.constant 0 : index
    %c0_242 = arith.constant 0 : index
    %651 = vector.load %arg9[%c0_241, %c0_242] : memref<8x128xf32, #tpu.memory_space<vmem>>, vector<8x128xf32>
    %cst_243 = arith.constant dense<0.000000e+00> : vector<8x384xf32>
    %652 = tpu.matmul %651, %366, %cst_243 {dimension_numbers = #tpu.dot_dimension_numbers<[1], [0], [0], [1], [0, 0, 1, 1], [], []>} : vector<8x128xf32>, vector<128x384xf32>, vector<8x384xf32> -> vector<8x384xf32>
    %653 = vector.broadcast %368 : vector<1x384xf32> to vector<8x384xf32>
    %654 = arith.addf %652, %653 : vector<8x384xf32>
    %655 = arith.index_cast %c6_i32_240 : i32 to index
    %c0_244 = arith.constant 0 : index
    %c0_245 = arith.constant 0 : index
    %656 = vector.load %arg11[%655, %c0_244, %c0_245] : memref<7x8x384xf32, #tpu.memory_space<vmem>>, vector<1x8x384xf32>
    %657 = vector.shape_cast %656 : vector<1x8x384xf32> to vector<8x384xf32>
    %658 = vector.extract_strided_slice %657 {offsets = [0, 0], sizes = [8, 128], strides = [1, 1]} : vector<8x384xf32> to vector<8x128xf32>
    %659 = vector.extract_strided_slice %654 {offsets = [0, 0], sizes = [8, 128], strides = [1, 1]} : vector<8x384xf32> to vector<8x128xf32>
    %660 = arith.addf %658, %659 : vector<8x128xf32>
    %661 = arith.negf %660 : vector<8x128xf32>
    %662 = math.exp %661 : vector<8x128xf32>
    %cst_246 = arith.constant 1.000000e+00 : f32
    %663 = vector.broadcast %cst_246 : f32 to vector<8x128xf32>
    %664 = arith.addf %663, %662 : vector<8x128xf32>
    %665 = arith.divf %663, %664 : vector<8x128xf32>
    %666 = vector.extract_strided_slice %657 {offsets = [0, 128], sizes = [8, 128], strides = [1, 1]} : vector<8x384xf32> to vector<8x128xf32>
    %667 = vector.extract_strided_slice %654 {offsets = [0, 128], sizes = [8, 128], strides = [1, 1]} : vector<8x384xf32> to vector<8x128xf32>
    %668 = arith.addf %666, %667 : vector<8x128xf32>
    %669 = arith.negf %668 : vector<8x128xf32>
    %670 = math.exp %669 : vector<8x128xf32>
    %cst_247 = arith.constant 1.000000e+00 : f32
    %671 = vector.broadcast %cst_247 : f32 to vector<8x128xf32>
    %672 = arith.addf %671, %670 : vector<8x128xf32>
    %673 = arith.divf %671, %672 : vector<8x128xf32>
    %674 = vector.extract_strided_slice %657 {offsets = [0, 256], sizes = [8, 128], strides = [1, 1]} : vector<8x384xf32> to vector<8x128xf32>
    %675 = vector.extract_strided_slice %654 {offsets = [0, 256], sizes = [8, 128], strides = [1, 1]} : vector<8x384xf32> to vector<8x128xf32>
    %676 = arith.mulf %665, %675 : vector<8x128xf32>
    %677 = arith.addf %674, %676 : vector<8x128xf32>
    %678 = math.tanh %677 : vector<8x128xf32>
    %cst_248 = arith.constant 1.000000e+00 : f32
    %679 = vector.broadcast %cst_248 : f32 to vector<8x128xf32>
    %680 = arith.subf %679, %673 : vector<8x128xf32>
    %681 = arith.mulf %680, %678 : vector<8x128xf32>
    %682 = arith.mulf %673, %651 : vector<8x128xf32>
    %683 = arith.addf %681, %682 : vector<8x128xf32>
    %684 = arith.index_cast %c6_i32_240 : i32 to index
    %c0_249 = arith.constant 0 : index
    %c0_250 = arith.constant 0 : index
    %685 = vector.load %arg2[%684, %c0_249, %c0_250] : memref<7x8x1xf32, #tpu.memory_space<vmem>>, vector<1x8x1xf32>
    %686 = vector.shape_cast %685 : vector<1x8x1xf32> to vector<8x1xf32>
    %687 = arith.subf %683, %651 : vector<8x128xf32>
    %688 = vector.broadcast %686 : vector<8x1xf32> to vector<8x128xf32>
    %689 = arith.mulf %688, %687 : vector<8x128xf32>
    %690 = arith.addf %651, %689 : vector<8x128xf32>
    %c0_251 = arith.constant 0 : index
    %c0_252 = arith.constant 0 : index
    %691 = vector.load %arg9[%c0_251, %c0_252] : memref<8x128xf32, #tpu.memory_space<vmem>>, vector<8x128xf32>
    tpu.vector_store %arg9[%c0_251, %c0_252], %690 {strides = array<i32>} : memref<8x128xf32, #tpu.memory_space<vmem>>, vector<8x128xf32>,
    %692 = vector.broadcast %686 : vector<8x1xf32> to vector<8x128xf32>
    %693 = arith.mulf %692, %683 : vector<8x128xf32>
    %694 = arith.index_cast %c6_i32_240 : i32 to index
    %c0_253 = arith.constant 0 : index
    %c0_254 = arith.constant 0 : index
    %695 = vector.load %arg10[%694, %c0_253, %c0_254] : memref<7x8x128xf32, #tpu.memory_space<vmem>>, vector<1x8x128xf32>
    %696 = vector.shape_cast %695 : vector<1x8x128xf32> to vector<8x128xf32>
    %697 = vector.shape_cast %693 : vector<8x128xf32> to vector<1x8x128xf32>
    tpu.vector_store %arg10[%694, %c0_253, %c0_254], %697 {strides = array<i32>} : memref<7x8x128xf32, #tpu.memory_space<vmem>>, vector<1x8x128xf32>,
    %c7_i32_255 = arith.constant 7 : i32
    %c0_256 = arith.constant 0 : index
    %c0_257 = arith.constant 0 : index
    %698 = vector.load %arg9[%c0_256, %c0_257] : memref<8x128xf32, #tpu.memory_space<vmem>>, vector<8x128xf32>
    %c1_258 = arith.constant 1 : index
    %c0_259 = arith.constant 0 : index
    %c0_260 = arith.constant 0 : index
    %699 = vector.load %arg8[%c1_258, %c0_259, %c0_260] : memref<2x8x128xf32, #tpu.memory_space<vmem>>, vector<1x8x128xf32>
    %700 = vector.shape_cast %699 : vector<1x8x128xf32> to vector<8x128xf32>
    %701 = vector.shape_cast %698 : vector<8x128xf32> to vector<1x8x128xf32>
    tpu.vector_store %arg8[%c1_258, %c0_259, %c0_260], %701 {strides = array<i32>} : memref<2x8x128xf32, #tpu.memory_space<vmem>>, vector<1x8x128xf32>,
    %c0_261 = arith.constant 0 : index
    %c0_262 = arith.constant 0 : index
    %c0_263 = arith.constant 0 : index
    %702 = vector.load %arg10[%c0_261, %c0_262, %c0_263] : memref<7x8x128xf32, #tpu.memory_space<vmem>>, vector<7x8x128xf32>
    %c0_264 = arith.constant 0 : index
    %c0_265 = arith.constant 0 : index
    %c0_266 = arith.constant 0 : index
    %703 = vector.load %arg7[%c0_264, %c0_265, %c0_266] : memref<7x8x128xf32, #tpu.memory_space<vmem>>, vector<7x8x128xf32>
    tpu.vector_store %arg7[%c0_264, %c0_265, %c0_266], %702 {strides = array<i32>} : memref<7x8x128xf32, #tpu.memory_space<vmem>>, vector<7x8x128xf32>,
    return
  }
  func.func @transform_0(%arg0: i32) -> (i32, i32, i32) {
    %c0_i32 = arith.constant 0 : i32
    %c0_i32_0 = arith.constant 0 : i32
    %c0_i32_1 = arith.constant 0 : i32
    %c0_i32_2 = arith.constant 0 : i32
    return %c0_i32, %c0_i32_0, %c0_i32_1 : i32, i32, i32
  }
  func.func @transform_1(%arg0: i32) -> (i32, i32, i32) {
    %c0_i32 = arith.constant 0 : i32
    %c0_i32_0 = arith.constant 0 : i32
    %c0_i32_1 = arith.constant 0 : i32
    %c0_i32_2 = arith.constant 0 : i32
    return %c0_i32, %c0_i32_0, %c0_i32_1 : i32, i32, i32
  }
  func.func @transform_2(%arg0: i32) -> (i32, i32, i32) {
    %c0_i32 = arith.constant 0 : i32
    %c0_i32_0 = arith.constant 0 : i32
    %c0_i32_1 = arith.constant 0 : i32
    %c0_i32_2 = arith.constant 0 : i32
    return %c0_i32, %c0_i32_0, %c0_i32_1 : i32, i32, i32
  }
  func.func @transform_3(%arg0: i32) -> (i32, i32, i32) {
    %c0_i32 = arith.constant 0 : i32
    %c0_i32_0 = arith.constant 0 : i32
    %c0_i32_1 = arith.constant 0 : i32
    %c0_i32_2 = arith.constant 0 : i32
    return %c0_i32, %c0_i32_0, %c0_i32_1 : i32, i32, i32
  }
  func.func @transform_4(%arg0: i32) -> (i32, i32, i32) {
    %c0_i32 = arith.constant 0 : i32
    %c0_i32_0 = arith.constant 0 : i32
    %c0_i32_1 = arith.constant 0 : i32
    %c0_i32_2 = arith.constant 0 : i32
    return %c0_i32, %c0_i32_0, %c0_i32_1 : i32, i32, i32
  }
  func.func @transform_5(%arg0: i32) -> (i32, i32, i32) {
    %c0_i32 = arith.constant 0 : i32
    %c0_i32_0 = arith.constant 0 : i32
    %c0_i32_1 = arith.constant 0 : i32
    %c0_i32_2 = arith.constant 0 : i32
    return %c0_i32, %c0_i32_0, %c0_i32_1 : i32, i32, i32
  }
  func.func @transform_6(%arg0: i32) -> (i32, i32, i32) {
    %c0_i32 = arith.constant 0 : i32
    %c0_i32_0 = arith.constant 0 : i32
    %c0_i32_1 = arith.constant 0 : i32
    %c0_i32_2 = arith.constant 0 : i32
    return %c0_i32, %c0_i32_0, %c0_i32_1 : i32, i32, i32
  }
  func.func @transform_7(%arg0: i32) -> (i32, i32, i32) {
    %c0_i32 = arith.constant 0 : i32
    %c0_i32_0 = arith.constant 0 : i32
    %c0_i32_1 = arith.constant 0 : i32
    %c0_i32_2 = arith.constant 0 : i32
    return %c0_i32, %c0_i32_0, %c0_i32_1 : i32, i32, i32
  }
}

</mosaic_0001>

<bundles_post_ra>
// kernel: tpu_custom_call.1
= control target key start
LH: loop header
LB: loop body
LE: loop exit
PB: predicated region body
PF: predicated region fallthrough
CT: control target
= control target key end

     0   :  { %13 = vsyncpa [#allocation6], 0  ;;  %s4265_s0 = inlined_call_operand.vmem [shape: f32[7,8,128], index: 0, kind: input, shape index: {}]   ;;  %s4266_s1 = inlined_call_operand.vmem [shape: f32[7,8,1], index: 1, kind: input, shape index: {}]   ;;  %s4267_s2 = inlined_call_operand.hbm [shape: f32[2,128,384], index: 2, kind: input, shape index: {}]   ;;  %s4268_s3 = inlined_call_operand.hbm [shape: f32[2,128,384], index: 3, kind: input, shape index: {}]   ;;  %s4269_s4 = inlined_call_operand.vmem [shape: f32[2,1,384], index: 4, kind: input, shape index: {}]   ;;  %s4270_s5 = inlined_call_operand.hbm [shape: f32[2,1,384], index: 5, kind: input, shape index: {}]   ;;  %s4271_s6 = inlined_call_operand.hbm [shape: f32[7,8,128], index: 6, kind: output, shape index: {0}]   ;;  %s4272_s7 = inlined_call_operand.hbm [shape: f32[2,8,128], index: 7, kind: output, shape index: {1}]  }
   0x1   :  { %14 = vsyncpa [#allocation9], 0 }
   0x2   :  { %15 = vsyncpa [#allocation7], 0 }
   0x3   :  { %16 = vsyncpa [#allocation13], 0  ;;  %s38_s26 = sshll.u32 %s4268_s3, 4  ;;  %s2822_s27 = smov [#allocation8]   ;;  %s39_s26 = int_to_ptr.hbm [resolvable:$true] %s38_s26 }
   0x4   :  { %s40_s28 = sshll.u32 %s2822_s27, 4  ;;  %s25_s8 = sshll.u32 %s4267_s2, 4  ;;  %s41_s28 = int_to_ptr.vmem [resolvable:$true] %s40_s28  ;;  %s26_s8 = int_to_ptr.hbm [resolvable:$true] %s25_s8 }
   0x5   :  { %s2823_s9 = smov 384   ;;  %s2824_s10 = smov 24  }
   0x6   :  { %46 = dma.hbm_to_vmem [thread:$0]  %s39_s26, 12288, %s41_s28, [#allocation9], %s2823_s9, %s2823_s9, %s2824_s10  }
   0x7   :  { %s2825_s11 = smov [#allocation5]   ;;  %s53_s15 = sshll.u32 %s4270_s5, 4  ;;  %s54_s15 = int_to_ptr.hbm [resolvable:$true] %s53_s15 }
   0x8   :  { %s27_s12 = sshll.u32 %s2825_s11, 4  ;;  %s2826_s3 = smov [#allocation10]   ;;  %s28_s12 = int_to_ptr.vmem [resolvable:$true] %s27_s12 }
   0x9   :  { %33 = dma.hbm_to_vmem [thread:$0]  %s26_s8, 12288, %s28_s12, [#allocation6], %s2823_s9, %s2823_s9, %s2824_s10  }
   0xa   :  { %s55_s16 = sshll.u32 %s2826_s3, 4  ;;  %s2827_s17 = smov 48   ;;  %s56_s16 = int_to_ptr.vmem [resolvable:$true] %s55_s16 }
   0xb   :  { %s2828_s18 = smov 3  }
   0xc   :  { %61 = dma.hbm_to_vmem [thread:$0]  %s54_s15, 96, %s56_s16, [#allocation9], %s2827_s17, %s2827_s17, %s2828_s18  }
   0xd   :  { %2814 = dma.done.wait [#allocation6], 12288  }
   0xe   :  { %2815 = vsyncadd [#allocation6], 4294955008 }
   0xf   :  { %2816 = dma.done.wait [#allocation9], 12384  }
  0x10   :  { %2817 = vsyncadd [#allocation9], 4294954912  ;;  %v140_v0 = vld [vmem:[#allocation5 + $0x168] sm:$0xff]  ;;  %v137_v2 = vld [vmem:[#allocation5 + $0x150] sm:$0xff]  ;;  %v4273_v51 = vmov 0.0   ;;  %s2367_s28 = sshll.u32 %s4271_s6, 4  ;;  %s2368_s28 = int_to_ptr.hbm [resolvable:$true] %s2367_s28 }
  0x11   :  { %v2884_v1 = vld [vmem:[#allocation8 + $0x168] sm:$0xff]  ;;  %151 = vmatpush.msra.mxu0 %v140_v0  ;;  %v2887_v3 = vld [vmem:[#allocation8 + $0x150] sm:$0xff]  ;;  %v134_v4 = vld [vmem:[#allocation5 + $0x138] sm:$0xff]  ;;  %s2832_s29 = smov [#allocation12]   ;;  %s2380_s10 = sshll.u32 %s4272_s7, 4  ;;  %s2381_s10 = int_to_ptr.hbm [resolvable:$true] %s2380_s10 }
  0x12   :  { %344 = vmatpush.msra.mxu3 %v2884_v1  ;;  %v2889_v5 = vld [vmem:[#allocation8 + $0x138] sm:$0xff]  ;;  %v131_v6 = vld [vmem:[#allocation5 + $0x120] sm:$0xff]  ;;  %v128_v8 = vld [vmem:[#allocation5 + $0x108] sm:$0xff]  ;;  %s2378_s30 = sshll.u32 %s2832_s29, 4  ;;  %s2833_s11 = smov 128   ;;  %s2379_s30 = int_to_ptr.vmem [resolvable:$true] %s2378_s30 }
  0x13   :  { %152 = vmatpush.msra.mxu0 %v137_v2  ;;  %v2892_v7 = vld [vmem:[#allocation8 + $0x120] sm:$0xff]  ;;  %v2895_v9 = vld [vmem:[#allocation8 + $0x108] sm:$0xff]  ;;  %v125_v10 = vld [vmem:[#allocation5 + $0xf0] sm:$0xff]  ;;  %s2834_s12 = smov 8  }
  0x14   :  { %345 = vmatpush.msra.mxu3 %v2887_v3  ;;  %v2898_v11 = vld [vmem:[#allocation8 + $0xf0] sm:$0xff]  ;;  %v122_v12 = vld [vmem:[#allocation5 + $0xd8] sm:$0xff]  ;;  %v119_v14 = vld [vmem:[#allocation5 + $0xc0] sm:$0xff] }
  0x15   :  { %153 = vmatpush.msra.mxu0 %v134_v4  ;;  %v2901_v13 = vld [vmem:[#allocation8 + $0xd8] sm:$0xff]  ;;  %v2904_v15 = vld [vmem:[#allocation8 + $0xc0] sm:$0xff]  ;;  %v141_v16 = vld [vmem:[#allocation5 + $0x170] sm:$0xff] }
  0x16   :  { %346 = vmatpush.msra.mxu3 %v2889_v5  ;;  %v138_v17 = vld [vmem:[#allocation5 + $0x158] sm:$0xff]  ;;  %v116_v18 = vld [vmem:[#allocation5 + $0xa8] sm:$0xff]  ;;  %189 = vmatpush.msra.mxu1 %v141_v16  ;;  %v135_v20 = vld [vmem:[#allocation5 + $0x140] sm:$0xff] }
  0x17   :  { %154 = vmatpush.msra.mxu0 %v131_v6  ;;  %v2907_v19 = vld [vmem:[#allocation8 + $0xa8] sm:$0xff]  ;;  %v113_v21 = vld [vmem:[#allocation5 + $0x90] sm:$0xff]  ;;  %v110_v24 = vld [vmem:[#allocation5 + $0x78] sm:$0xff] }
  0x18   :  { %347 = vmatpush.msra.mxu3 %v2892_v7  ;;  %v2910_v22 = vld [vmem:[#allocation8 + $0x90] sm:$0xff]  ;;  %190 = vmatpush.msra.mxu1 %v138_v17  ;;  %v132_v23 = vld [vmem:[#allocation5 + $0x128] sm:$0xff]  ;;  %v2913_v25 = vld [vmem:[#allocation8 + $0x78] sm:$0xff] }
  0x19   :  { %155 = vmatpush.msra.mxu0 %v128_v8  ;;  %v129_v26 = vld [vmem:[#allocation5 + $0x110] sm:$0xff]  ;;  %v107_v27 = vld [vmem:[#allocation5 + $0x60] sm:$0xff]  ;;  %v126_v29 = vld [vmem:[#allocation5 + $0xf8] sm:$0xff] }
  0x1a   :  { %348 = vmatpush.msra.mxu3 %v2895_v9  ;;  %191 = vmatpush.msra.mxu1 %v135_v20  ;;  %v2916_v28 = vld [vmem:[#allocation8 + $0x60] sm:$0xff]  ;;  %v142_v30 = vld [vmem:[#allocation5 + $0x178] sm:$0xff]  ;;  %v104_v31 = vld [vmem:[#allocation5 + $0x48] sm:$0xff] }
  0x1b   :  { %156 = vmatpush.msra.mxu0 %v125_v10  ;;  %v2919_v32 = vld [vmem:[#allocation8 + $0x48] sm:$0xff]  ;;  %227 = vmatpush.msra.mxu2 %v142_v30  ;;  %v123_v33 = vld [vmem:[#allocation5 + $0xe0] sm:$0xff]  ;;  %v101_v35 = vld [vmem:[#allocation5 + $0x30] sm:$0xff] }
  0x1c   :  { %349 = vmatpush.msra.mxu3 %v2898_v11  ;;  %192 = vmatpush.msra.mxu1 %v132_v23  ;;  %v139_v34 = vld [vmem:[#allocation5 + $0x160] sm:$0xff]  ;;  %v2922_v36 = vld [vmem:[#allocation8 + $0x30] sm:$0xff]  ;;  %v120_v37 = vld [vmem:[#allocation5 + $0xc8] sm:$0xff] }
  0x1d   :  { %157 = vmatpush.msra.mxu0 %v122_v12  ;;  %228 = vmatpush.msra.mxu2 %v139_v34  ;;  %v136_v38 = vld [vmem:[#allocation5 + $0x148] sm:$0xff]  ;;  %v98_v39 = vld [vmem:[#allocation5 + $0x18] sm:$0xff]  ;;  %v117_v41 = vld [vmem:[#allocation5 + $0xb0] sm:$0xff] }
  0x1e   :  { %350 = vmatpush.msra.mxu3 %v2901_v13  ;;  %193 = vmatpush.msra.mxu1 %v129_v26  ;;  %v2925_v40 = vld [vmem:[#allocation8 + $0x18] sm:$0xff]  ;;  %v133_v42 = vld [vmem:[#allocation5 + $0x130] sm:$0xff]  ;;  %v95_v43 = vld [vmem:[#allocation5] sm:$0xff] }
  0x1f   :  { %158 = vmatpush.msra.mxu0 %v119_v14  ;;  %4314 = vst [vmem:[#allocation18_spill] sm:$0xff] %v2925_v40  ;;  %229 = vmatpush.msra.mxu2 %v136_v38  ;;  %v2928_v44 = vld [vmem:[#allocation8] sm:$0xff]  ;;  %v130_v46 = vld [vmem:[#allocation5 + $0x118] sm:$0xff]  ;;  %v2936_v47 = vld [vmem:[#allocation8 + $0x170] sm:$0xff]  ;;  %v2830_v38 = vmov 0  }
  0x20   :  { %351 = vmatpush.msra.mxu3 %v2904_v15  ;;  %194 = vmatpush.msra.mxu1 %v126_v29  ;;  %4315 = vst [vmem:[#allocation19_spill] sm:$0xff] %v2928_v44  ;;  %v2934_v45 = vld [vmem:[%s4265_s0] sm:$0xff]  ;;  %v2938_v48 = vld [vmem:[#allocation8 + $0x178] sm:$0xff]  ;;  %v124_v55 = vld [vmem:[#allocation5 + $0xe8] sm:$0xff] }
  0x21   :  { %159 = vmatpush.msra.mxu0 %v116_v18  ;;  %230 = vmatpush.msra.mxu2 %v133_v42  ;;  %v114_v49 = vld [vmem:[#allocation5 + $0x98] sm:$0xff]  ;;  %v127_v50 = vld [vmem:[#allocation5 + $0x100] sm:$0xff]  ;;  %v2951_v57 = vld [vmem:[#allocation8 + $0x148] sm:$0xff] }
  0x22   :  { %352 = vmatpush.msra.mxu3 %v2907_v19  ;;  %195 = vmatpush.msra.mxu1 %v123_v33  ;;  %v2943_v52 = vld [vmem:[#allocation8 + $0x158] sm:$0xff]  ;;  %v2945_v53 = vld [vmem:[#allocation8 + $0x160] sm:$0xff]  ;;  %v108_v58 = vld [vmem:[#allocation5 + $0x68] sm:$0xff] }
  0x23   :  { %160 = vmatpush.msra.mxu0 %v113_v21  ;;  %231 = vmatpush.msra.mxu2 %v130_v46  ;;  %v111_v54 = vld [vmem:[#allocation5 + $0x80] sm:$0xff]  ;;  %v121_v59 = vld [vmem:[#allocation5 + $0xd0] sm:$0xff]  ;;  %v2955_v60 = vld [vmem:[#allocation8 + $0x128] sm:$0xff] }
  0x24   :  { %353 = vmatpush.msra.mxu3 %v2910_v22  ;;  %196 = vmatpush.msra.mxu1 %v120_v37  ;;  %v2949_v56 = vld [vmem:[#allocation8 + $0x140] sm:$0xff]  ;;  %v2957_v61 = vld [vmem:[#allocation8 + $0x130] sm:$0xff]  ;;  %v2963_v62 = vld [vmem:[%s4265_s0 + $0x8] sm:$0xff] }
  0x25   :  { %161 = vmatpush.msra.mxu0 %v110_v24  ;;  %232 = vmatpush.msra.mxu2 %v127_v50  ;;  %v105_v63 = vld [vmem:[#allocation5 + $0x50] sm:$0xff]  ;;  %v2968_v2 = vld [vmem:[#allocation8 + $0x118] sm:$0xff]  ;;  %v2975_v10 = vld [vmem:[#allocation8 + $0x100] sm:$0xff] }
  0x26   :  { %354 = vmatpush.msra.mxu3 %v2913_v25  ;;  %197 = vmatpush.msra.mxu1 %v117_v41  ;;  %v2966_v0 = vld [vmem:[#allocation8 + $0x110] sm:$0xff]  ;;  %v102_v4 = vld [vmem:[#allocation5 + $0x38] sm:$0xff]  ;;  %v99_v12 = vld [vmem:[#allocation5 + $0x20] sm:$0xff] }
  0x27   :  { %162 = vmatpush.msra.mxu0 %v107_v27  ;;  %233 = vmatpush.msra.mxu2 %v124_v55  ;;  %v118_v6 = vld [vmem:[#allocation5 + $0xb8] sm:$0xff]  ;;  %v115_v14 = vld [vmem:[#allocation5 + $0xa0] sm:$0xff]  ;;  %v2981_v17 = vld [vmem:[#allocation8 + $0xe8] sm:$0xff] }
  0x28   :  { %355 = vmatpush.msra.mxu3 %v2916_v28  ;;  %198 = vmatpush.msra.mxu1 %v114_v49  ;;  %v2973_v8 = vld [vmem:[#allocation8 + $0xf8] sm:$0xff]  ;;  %v2979_v16 = vld [vmem:[#allocation8 + $0xe0] sm:$0xff]  ;;  %v96_v18 = vld [vmem:[#allocation5 + $0x8] sm:$0xff] }
  0x29   :  { %163 = vmatpush.msra.mxu0 %v104_v31  ;;  %234 = vmatpush.msra.mxu2 %v121_v59  ;;  %v112_v20 = vld [vmem:[#allocation5 + $0x88] sm:$0xff]  ;;  %v2987_v23 = vld [vmem:[#allocation8 + $0xd0] sm:$0xff]  ;;  %v2998_v27 = vld [vmem:[#allocation8 + $0xb8] sm:$0xff] }
  0x2a   :  { %356 = vmatpush.msra.mxu3 %v2919_v32  ;;  %199 = vmatpush.msra.mxu1 %v111_v54  ;;  %v2985_v21 = vld [vmem:[#allocation8 + $0xc8] sm:$0xff]  ;;  %v2993_v24 = vld [vmem:[%s4265_s0 + $0x10] sm:$0xff]  ;;  %v3003_v30 = vld [vmem:[#allocation8 + $0x98] sm:$0xff] }
  0x2b   :  { %164 = vmatpush.msra.mxu0 %v101_v35  ;;  %235 = vmatpush.msra.mxu2 %v118_v6  ;;  %v2996_v26 = vld [vmem:[#allocation8 + $0xb0] sm:$0xff]  ;;  %v3005_v31 = vld [vmem:[#allocation8 + $0xa0] sm:$0xff]  ;;  %v106_v33 = vld [vmem:[#allocation5 + $0x58] sm:$0xff] }
  0x2c   :  { %357 = vmatpush.msra.mxu3 %v2922_v36  ;;  %200 = vmatpush.msra.mxu1 %v108_v58  ;;  %v109_v29 = vld [vmem:[#allocation5 + $0x70] sm:$0xff]  ;;  %v3013_v34 = vld [vmem:[%s4266_s1] sm:$0xff]  ;;  %v3017_v37 = vld [vmem:[#allocation8 + $0x88] sm:$0xff] }
  0x2d   :  { %165 = vmatpush.msra.mxu0 %v98_v39  ;;  %236 = vmatpush.msra.mxu2 %v115_v14  ;;  %4316 = vst [vmem:[#allocation20_spill] sm:$0xff] %v3013_v34  ;;  %v3015_v35 = vld [vmem:[#allocation8 + $0x80] sm:$0xff]  ;;  %v3022_v41 = vld [vmem:[#allocation8 + $0x68] sm:$0xff]  ;;  %v3024_v42 = vld [vmem:[#allocation8 + $0x70] sm:$0xff] }
  0x2e   :  { %358 = vmatpush.msra.mxu3 %v2925_v40  ;;  %201 = vmatpush.msra.mxu1 %v105_v63  ;;  %v103_v39 = vld [vmem:[#allocation5 + $0x40] sm:$0xff]  ;;  %v100_v46 = vld [vmem:[#allocation5 + $0x28] sm:$0xff]  ;;  %v3034_v49 = vld [vmem:[#allocation8 + $0x50] sm:$0xff] }
  0x2f   :  { %166 = vmatpush.msra.mxu0 %v95_v43  ;;  %237 = vmatpush.msra.mxu2 %v112_v20  ;;  %v3031_v43 = vld [vmem:[%s4265_s0 + $0x18] sm:$0xff]  ;;  %v97_v54 = vld [vmem:[#allocation5 + $0x10] sm:$0xff]  ;;  %v3044_v58 = vld [vmem:[#allocation8 + $0x40] sm:$0xff] }
  0x30   :  { %359 = vmatpush.msra.mxu3 %v2928_v44  ;;  %167 = vmatmul.f32.vlgmr.msra.gmra.mxu0 %v2934_v45  ;;  %v3036_v50 = vld [vmem:[#allocation8 + $0x58] sm:$0xff]  ;;  %v2403_v59 = vld [vmem:[%s4266_s1 + $0x8] sm:$0xff]  ;;  %v3051_v63 = vld [vmem:[#allocation8 + $0x20] sm:$0xff] }
  0x31   :  { %360 = vmatmul.f32.vlgmr.msra.gmra.mxu3 %v4273_v51  ;;  %384 = vmatpush.msrb.mxu0 %v2938_v48  ;;  %v3042_v55 = vld [vmem:[#allocation8 + $0x38] sm:$0xff]  ;;  %4318 = vst [vmem:[#allocation22_spill] sm:$0xff] %v3051_v63  ;;  %v3058_v6 = vld [vmem:[#allocation8 + $0x8] sm:$0xff]  ;;  %v3067_v14 = vld [vmem:[%s4265_s0 + $0x20] sm:$0xff] }
  0x32   :  { %364 = vmatpush.msrb.mxu3 %v2936_v47  ;;  %202 = vmatpush.msra.mxu1 %v102_v4  ;;  %4317 = vst [vmem:[#allocation21_spill] sm:$0xff] %v3042_v55  ;;  %v3053_v4 = vld [vmem:[#allocation8 + $0x28] sm:$0xff]  ;;  %v3118_v20 = vld [vmem:[%s4265_s0 + $0x30] sm:$0xff] }
  0x33   :  { %385 = vmatpush.msrb.mxu0 %v2945_v53  ;;  %238 = vmatpush.msra.mxu2 %v109_v29  ;;  %4319 = vst [vmem:[#allocation23_spill] sm:$0xff] %v3053_v4  ;;  %v143_v29 = vld [vmem:[%s4269_s4] sm:$0x7] }
  0x34   :  { %365 = vmatpush.msrb.mxu3 %v2943_v52  ;;  %203 = vmatpush.msra.mxu1 %v99_v12  ;;  %4320 = vst [vmem:[#allocation24_spill] sm:$0xff] %v3058_v6  ;;  %v3061_v12 = vld [vmem:[#allocation8 + $0x10] sm:$0xff] }
  0x35   :  { %386 = vmatpush.msrb.mxu0 %v2951_v57  ;;  %2453 = vset.pattern.permute.xlu0 %v2830_v38  ;;  %4321 = vst [vmem:[#allocation25_spill] sm:$0xff] %v3061_v12 }
  0x36   :  { %366 = vmatpush.msrb.mxu3 %v2949_v56  ;;  %204 = vmatpush.msra.mxu1 %v96_v18  ;;  %v3092_v18 = vld [vmem:[%s4265_s0 + $0x28] sm:$0xff] }
  0x37   :  { %387 = vmatpush.msrb.mxu0 %v2957_v61  ;;  %205 = vmatmul.f32.vlgmr.msra.gmra.mxu1 %v2934_v45 }
  0x38   :  { %367 = vmatpush.msrb.mxu3 %v2955_v60  ;;  %170 = vmatmul.f32.gmra.mxu0 %v2963_v62 }
  0x39   :  { %388 = vmatpush.msrb.mxu0 %v2968_v2  ;;  %239 = vmatpush.msra.mxu2 %v106_v33 }
  0x3a   :  { %368 = vmatpush.msrb.mxu3 %v2966_v0  ;;  %458 = vperm.xlu0 %2453, %v3013_v34  }
  0x3b   :  { %389 = vmatpush.msrb.mxu0 %v2975_v10  ;;  %240 = vmatpush.msra.mxu2 %v103_v39  ;;  %v145_v39 = vperm.slane %v143_v29, 0 }
  0x3c   :  { %369 = vmatpush.msrb.mxu3 %v2973_v8  ;;  %467 = vmatpush.msrb.mxu1 %v2884_v1 }
  0x3d   :  { %390 = vmatpush.msrb.mxu0 %v2981_v17  ;;  %241 = vmatpush.msra.mxu2 %v100_v46 }
  0x3e   :  { %370 = vmatpush.msrb.mxu3 %v2979_v16  ;;  %468 = vmatpush.msrb.mxu1 %v2887_v3 }
  0x3f   :  { %391 = vmatpush.msrb.mxu0 %v2987_v23  ;;  %242 = vmatpush.msra.mxu2 %v97_v54 }
  0x40   :  { %371 = vmatpush.msrb.mxu3 %v2985_v21  ;;  %173 = vmatmul.f32.gmra.mxu0 %v2993_v24 }
  0x41   :  { %392 = vmatpush.msrb.mxu0 %v2998_v27  ;;  %243 = vmatmul.f32.vlgmr.msra.gmra.mxu2 %v2934_v45  ;;  %v3079_v45 = vld [vmem:[%s4266_s1 + $0x30] sm:$0xff] }
  0x42   :  { %372 = vmatpush.msrb.mxu3 %v2996_v26  ;;  %583 = vperm.xlu0 %2453, %v2403_v59   ;;  %4322 = vst [vmem:[#allocation26_spill] sm:$0xff] %v3079_v45 }
  0x43   :  { %393 = vmatpush.msrb.mxu0 %v3005_v31  ;;  %487 = vmatpush.msrb.mxu2 %v2936_v47 }
  0x44   :  { %373 = vmatpush.msrb.mxu3 %v3003_v30  ;;  %469 = vmatpush.msrb.mxu1 %v2889_v5 }
  0x45   :  { %394 = vmatpush.msrb.mxu0 %v3017_v37  ;;  %488 = vmatpush.msrb.mxu2 %v2943_v52 }
  0x46   :  { %374 = vmatpush.msrb.mxu3 %v3015_v35  ;;  %208 = vmatmul.f32.gmra.mxu1 %v2963_v62 }
  0x47   :  { %395 = vmatpush.msrb.mxu0 %v3024_v42  ;;  %470 = vmatpush.msrb.mxu1 %v2892_v7 }
  0x48   :  { %375 = vmatpush.msrb.mxu3 %v3022_v41  ;;  %176 = vmatmul.f32.gmra.mxu0 %v3031_v43 }
  0x49   :  { %396 = vmatpush.msrb.mxu0 %v3036_v50  ;;  %489 = vmatpush.msrb.mxu2 %v2949_v56 }
  0x4a   :  { %376 = vmatpush.msrb.mxu3 %v3034_v49  ;;  %1213 = vperm.xlu0 %2453, %v3079_v45  }
  0x4b   :  { %397 = vmatpush.msrb.mxu0 %v3044_v58  ;;  %246 = vmatmul.f32.gmra.mxu2 %v2963_v62  ;;  %v3105_v62 = vld [vmem:[%s4266_s1 + $0x10] sm:$0xff] }
  0x4c   :  { %377 = vmatpush.msrb.mxu3 %v3042_v55  ;;  %471 = vmatpush.msrb.mxu1 %v2895_v9 }
  0x4d   :  { %398 = vmatpush.msrb.mxu0 %v3053_v4  ;;  %490 = vmatpush.msrb.mxu2 %v2955_v60 }
  0x4e   :  { %378 = vmatpush.msrb.mxu3 %v3051_v63  ;;  %472 = vmatpush.msrb.mxu1 %v2898_v11 }
  0x4f   :  { %399 = vmatpush.msrb.mxu0 %v3061_v12  ;;  %491 = vmatpush.msrb.mxu2 %v2966_v0 }
  0x50   :  { %379 = vmatpush.msrb.mxu3 %v3058_v6  ;;  %179 = vmatmul.f32.gmra.mxu0 %v3067_v14 }
  0x51   :  { %380 = vmatmul.f32.vlgmr.msrb.gmra.mxu3 %v4273_v51  ;;  %593 = vmatpush.msra.mxu0 %v2884_v1 }
  0x52   :  { %507 = vmatpush.msra.mxu3 %v2938_v48  ;;  %211 = vmatmul.f32.gmra.mxu1 %v2993_v24 }
  0x53   :  { %594 = vmatpush.msra.mxu0 %v2887_v3  ;;  %492 = vmatpush.msrb.mxu2 %v2973_v8 }
  0x54   :  { %508 = vmatpush.msra.mxu3 %v2945_v53  ;;  %473 = vmatpush.msrb.mxu1 %v2901_v13 }
  0x55   :  { %493 = vmatpush.msrb.mxu2 %v2979_v16  ;;  %595 = vmatpush.msra.mxu0 %v2889_v5 }
  0x56   :  { %509 = vmatpush.msra.mxu3 %v2951_v57  ;;  %1844 = vperm.xlu0 %2453, %v3105_v62  }
  0x57   :  { %249 = vmatmul.f32.gmra.mxu2 %v2993_v24  ;;  %474 = vmatpush.msrb.mxu1 %v2904_v15  ;;  %v2436_v24 = vld [vmem:[%s4266_s1 + $0x28] sm:$0xff] }
  0x58   :  { %182 = vmatmul.f32.gmra.mxu0 %v3092_v18  ;;  %510 = vmatpush.msra.mxu3 %v2957_v61 }
  0x59   :  { %494 = vmatpush.msrb.mxu2 %v2985_v21  ;;  %596 = vmatpush.msra.mxu0 %v2892_v7 }
  0x5a   :  { %511 = vmatpush.msra.mxu3 %v2968_v2  ;;  %475 = vmatpush.msrb.mxu1 %v2907_v19 }
  0x5b   :  { %495 = vmatpush.msrb.mxu2 %v2996_v26  ;;  %214 = vmatmul.f32.gmra.mxu1 %v3031_v43 }
  0x5c   :  { %512 = vmatpush.msra.mxu3 %v2975_v10  ;;  %476 = vmatpush.msrb.mxu1 %v2910_v22 }
  0x5d   :  { %496 = vmatpush.msrb.mxu2 %v3003_v30  ;;  %597 = vmatpush.msra.mxu0 %v2895_v9 }
  0x5e   :  { %513 = vmatpush.msra.mxu3 %v2981_v17  ;;  %2213 = vperm.xlu0 %2453, %v2436_v24  }
  0x5f   :  { %497 = vmatpush.msrb.mxu2 %v3015_v35  ;;  %477 = vmatpush.msrb.mxu1 %v2913_v25 }
  0x60   :  { %185 = vmatmul.f32.gmra.mxu0 %v3118_v20  ;;  %252 = vmatmul.f32.gmra.mxu2 %v3031_v43 }
  0x61   :  { %514 = vmatpush.msra.mxu3 %v2987_v23  ;;  %498 = vmatpush.msrb.mxu2 %v3022_v41 }
  0x62   :  { %598 = vmatpush.msra.mxu0 %v2898_v11  ;;  %478 = vmatpush.msrb.mxu1 %v2916_v28 }
  0x63   :  { %515 = vmatpush.msra.mxu3 %v2998_v27  ;;  %499 = vmatpush.msrb.mxu2 %v3034_v49 }
  0x64   :  { %217 = vmatmul.f32.gmra.mxu1 %v3067_v14  ;;  %599 = vmatpush.msra.mxu0 %v2901_v13 }
  0x65   :  { %516 = vmatpush.msra.mxu3 %v3005_v31  ;;  %479 = vmatpush.msrb.mxu1 %v2919_v32 }
  0x66   :  { %500 = vmatpush.msrb.mxu2 %v3042_v55  ;;  %600 = vmatpush.msra.mxu0 %v2904_v15 }
  0x67   :  { %517 = vmatpush.msra.mxu3 %v3017_v37  ;;  %480 = vmatpush.msrb.mxu1 %v2922_v36 }
  0x68   :  { %400 = vmatmul.f32.vlgmr.msrb.gmra.mxu0 %v4273_v51  ;;  %255 = vmatmul.f32.gmra.mxu2 %v3067_v14 }
  0x69   :  { %518 = vmatpush.msra.mxu3 %v3024_v42  ;;  %501 = vmatpush.msrb.mxu2 %v3051_v63 }
  0x6a   :  { %481 = vmatpush.msrb.mxu1 %v2925_v40  ;;  %601 = vmatpush.msra.mxu0 %v2907_v19 }
  0x6b   :  { %519 = vmatpush.msra.mxu3 %v3036_v50  ;;  %502 = vmatpush.msrb.mxu2 %v3058_v6 }
  0x6c   :  { %482 = vmatpush.msrb.mxu1 %v2928_v44  ;;  %602 = vmatpush.msra.mxu0 %v2910_v22 }
  0x6d   :  { %633 = vmatpush.msra.mxu2 %v2938_v48  ;;  %220 = vmatmul.f32.gmra.mxu1 %v3092_v18 }
  0x6e   :  { %520 = vmatpush.msra.mxu3 %v3044_v58  ;;  %613 = vmatpush.msra.mxu1 %v2936_v47 }
  0x6f   :  { %634 = vmatpush.msra.mxu2 %v2945_v53  ;;  %2454 = vset.pattern.permute.xlu1 %v2830_v38 }
  0x70   :  { %521 = vmatpush.msra.mxu3 %v3053_v4  ;;  %258 = vmatmul.f32.gmra.mxu2 %v3092_v18 }
  0x71   :  { %614 = vmatpush.msra.mxu1 %v2943_v52  ;;  %635 = vmatpush.msra.mxu2 %v2951_v57 }
  0x72   :  { %522 = vmatpush.msra.mxu3 %v3061_v12  ;;  %603 = vmatpush.msra.mxu0 %v2913_v25 }
  0x73   :  { %615 = vmatpush.msra.mxu1 %v2949_v56  ;;  %636 = vmatpush.msra.mxu2 %v2957_v61 }
  0x74   :  { %604 = vmatpush.msra.mxu0 %v2916_v28  ;;  %709 = vperm.xlu1 %2454, %v3105_v62  }
  0x75   :  { %616 = vmatpush.msra.mxu1 %v2955_v60  ;;  %637 = vmatpush.msra.mxu2 %v2968_v2 }
  0x76   :  { %223 = vmatmul.f32.gmra.mxu1 %v3118_v20  ;;  %605 = vmatpush.msra.mxu0 %v2919_v32 }
  0x77   :  { %617 = vmatpush.msra.mxu1 %v2966_v0  ;;  %638 = vmatpush.msra.mxu2 %v2975_v10 }
  0x78   :  { %261 = vmatmul.f32.gmra.mxu2 %v3118_v20  ;;  %719 = vmatpush.msrb.mxu3 %v2884_v1 }
  0x79   :  { %618 = vmatpush.msra.mxu1 %v2973_v8  ;;  %639 = vmatpush.msra.mxu2 %v2981_v17 }
  0x7a   :  { %606 = vmatpush.msra.mxu0 %v2922_v36  ;;  %720 = vmatpush.msrb.mxu3 %v2887_v3 }
  0x7b   :  { %619 = vmatpush.msra.mxu1 %v2979_v16  ;;  %640 = vmatpush.msra.mxu2 %v2987_v23 }
  0x7c   :  { %607 = vmatpush.msra.mxu0 %v2925_v40  ;;  %721 = vmatpush.msrb.mxu3 %v2889_v5 }
  0x7d   :  { %620 = vmatpush.msra.mxu1 %v2985_v21  ;;  %641 = vmatpush.msra.mxu2 %v2998_v27 }
  0x7e   :  { %608 = vmatpush.msra.mxu0 %v2928_v44  ;;  %722 = vmatpush.msrb.mxu3 %v2892_v7 }
  0x7f   :  { %621 = vmatpush.msra.mxu1 %v2996_v26  ;;  %642 = vmatpush.msra.mxu2 %v3005_v31 }
  0x80   :  { %739 = vmatpush.msrb.mxu0 %v2936_v47  ;;  %723 = vmatpush.msrb.mxu3 %v2895_v9 }
  0x81   :  { %622 = vmatpush.msra.mxu1 %v3003_v30  ;;  %643 = vmatpush.msra.mxu2 %v3017_v37 }
  0x82   :  { %740 = vmatpush.msrb.mxu0 %v2943_v52  ;;  %724 = vmatpush.msrb.mxu3 %v2898_v11 }
  0x83   :  { %623 = vmatpush.msra.mxu1 %v3015_v35  ;;  %644 = vmatpush.msra.mxu2 %v3024_v42 }
  0x84   :  { %741 = vmatpush.msrb.mxu0 %v2949_v56  ;;  %725 = vmatpush.msrb.mxu3 %v2901_v13 }
  0x85   :  { %624 = vmatpush.msra.mxu1 %v3022_v41  ;;  %645 = vmatpush.msra.mxu2 %v3036_v50 }
  0x86   :  { %742 = vmatpush.msrb.mxu0 %v2955_v60  ;;  %726 = vmatpush.msrb.mxu3 %v2904_v15 }
  0x87   :  { %625 = vmatpush.msra.mxu1 %v3034_v49  ;;  %646 = vmatpush.msra.mxu2 %v3044_v58 }
  0x88   :  { %743 = vmatpush.msrb.mxu0 %v2966_v0  ;;  %727 = vmatpush.msrb.mxu3 %v2907_v19 }
  0x89   :  { %626 = vmatpush.msra.mxu1 %v3042_v55  ;;  %647 = vmatpush.msra.mxu2 %v3053_v4 }
  0x8a   :  { %744 = vmatpush.msrb.mxu0 %v2973_v8  ;;  %728 = vmatpush.msrb.mxu3 %v2910_v22 }
  0x8b   :  { %627 = vmatpush.msra.mxu1 %v3051_v63  ;;  %648 = vmatpush.msra.mxu2 %v3061_v12 }
  0x8c   :  { %745 = vmatpush.msrb.mxu0 %v2979_v16  ;;  %2455 = vset.pattern.permute.xlu2 %v2830_v38  ;;  %v335_v38 = vld [vmem:[#allocation10] sm:$0x7] }
  0x8d   :  { %628 = vmatpush.msra.mxu1 %v3058_v6  ;;  %729 = vmatpush.msrb.mxu3 %v2913_v25  ;;  %v3246_v43 = vperm.slane %v335_v38, 0 }
  0x8e   :  { %746 = vmatpush.msrb.mxu0 %v2985_v21 }
  0x8f   :  { %730 = vmatpush.msrb.mxu3 %v2916_v28  ;;  %4323 = vst [vmem:[#allocation27_spill] sm:$0xff] %v3246_v43 }
  0x90   :  { %747 = vmatpush.msrb.mxu0 %v2996_v26 }
  0x91   :  { %731 = vmatpush.msrb.mxu3 %v2919_v32 }
  0x92   :  { %748 = vmatpush.msrb.mxu0 %v3003_v30 }
  0x93   :  { %732 = vmatpush.msrb.mxu3 %v2922_v36 }
  0x94   :  { %749 = vmatpush.msrb.mxu0 %v3015_v35 }
  0x95   :  { %733 = vmatpush.msrb.mxu3 %v2925_v40  ;;  %v3265_v40 = vperm.slane %v143_v29, 2 }
  0x96   :  { %750 = vmatpush.msrb.mxu0 %v3022_v41 }
  0x97   :  { %734 = vmatpush.msrb.mxu3 %v2928_v44  ;;  %4331 = vst [vmem:[#allocation35_spill] sm:$0xff] %v3265_v40 }
  0x98   :  { %751 = vmatpush.msrb.mxu0 %v3034_v49 }
  0x9a   :  { %752 = vmatpush.msrb.mxu0 %v3042_v55 }
  0x9c   :  { %753 = vmatpush.msrb.mxu0 %v3051_v63 }
  0x9e   :  { %754 = vmatpush.msrb.mxu0 %v3058_v6 }
  0xad   :  { %v168_v33 = vpop.f32.mrf.mxu0 }
  0xae   :  { %v169_v54 = vadd.f32 %v168_v33, %v145_v39  ;;  %v3257_v33 = vperm.slane %v143_v29, 1 }
  0xb0   :  { %4328 = vst [vmem:[#allocation32_spill] sm:$0xff] %v3257_v33 }
  0xb4   :  { %v361_v46 = vpop.f32.mrf.mxu3 }
  0xb5   :  { %v362_v59 = vadd.f32 %v361_v46, %v3246_v43  ;;  %v171_v14 = vpop.f32.mrf.mxu0  ;;  %v206_v46 = vpop.f32.mrf.mxu1 }
  0xb6   :  { %v3249_v62 = vadd.f32 %v171_v14, %v145_v39  ;;  %v207_v14 = vadd.f32 %v206_v46, %v3257_v33 }
  0xb7   :  { %v407_v18 = vadd.f32 %v362_v59, %v169_v54  ;;  %v3259_v54 = vperm.slane %v335_v38, 1 }
  0xb8   :  { %4324 = vst [vmem:[#allocation28_spill] sm:$0xff] %v3249_v62 }
  0xb9   :  { %v2399_v20 = vmul.f32 -1.442695, %v407_v18  ;;  %4329 = vst [vmem:[#allocation33_spill] sm:$0xff] %v3259_v54 }
  0xbb   :  { %2456 = vpow2.f32 %v2399_v20 }
  0xbd   :  { %v174_v24 = vpop.f32.mrf.mxu0 }
  0xbe   :  { %v3251_v51 = vadd.f32 %v174_v24, %v145_v39 }
  0xc0   :  { %4325 = vst [vmem:[#allocation29_spill] sm:$0xff] %v3251_v51 }
  0xc1   :  { %v2457_v45 = vpop.eup %2456 }
  0xc2   :  { %v411_v44 = vadd.f32 1.0, %v2457_v45 }
  0xc4   :  { %2458 = vrcp.f32 %v411_v44  ;;  %v244_v45 = vpop.f32.mrf.mxu2  ;;  %vm417_vm1 = vweird.f32 %v411_v44 }
  0xc5   :  { %v177_v34 = vpop.f32.mrf.mxu0 }
  0xc6   :  { %v3253_v6 = vadd.f32 %v177_v34, %v145_v39 }
  0xc8   :  { %4326 = vst [vmem:[#allocation30_spill] sm:$0xff] %v3253_v6 }
  0xca   :  { %v2459_v59 = vpop.eup %2458 }
  0xcb   :  { %v413_v24 = vmul.f32 %v2459_v59, %v411_v44  ;;  %vm418_vm0 = vweird.f32 %v2459_v59 }
  0xcc   :  { %vm419_vm2 = vmor %vm417_vm1, %vm418_vm0 }
  0xcd   :  { %v180_v12 = vpop.f32.mrf.mxu0 }
  0xce   :  { %v3255_v63 = vadd.f32 %v180_v12, %v145_v39  ;;  %v414_v12 = vsub.f32 1.0, %v413_v24  ;;  %v247_v55 = vpop.f32.mrf.mxu2  ;;  %v421_v24 = vand.u32 2147483647, %v411_v44 }
  0xcf   :  { %v3270_v46 = vadd.f32 %v247_v55, %v3265_v40 }
  0xd0   :  { %4327 = vst [vmem:[#allocation31_spill] sm:$0xff] %v3255_v63  ;;  %v415_v63 = vmul.f32 %v2459_v59, %v414_v12  ;;  %vm422_vm3 = vcmp.eq.f32.partialorder %v421_v24, 8.507059e+37  ;;  %v245_v12 = vadd.f32 %v244_v45, %v3265_v40 }
  0xd1   :  { %4333 = vst [vmem:[#allocation37_spill] sm:$0xff] %v3270_v46 }
  0xd4   :  { %v381_v18 = vpop.f32.mrf.mxu3 }
  0xd5   :  { %v382_v20 = vadd.f32 %v381_v18, %v3259_v54  ;;  %v183_v51 = vpop.f32.mrf.mxu0  ;;  %v416_v54 = vadd.f32 %v2459_v59, %v415_v63 }
  0xd6   :  { %v3263_v6 = vadd.f32 %v183_v51, %v145_v39  ;;  %v423_v51 = vand.u32 2147483648, %v411_v44 }
  0xd7   :  { %v427_v34 = vadd.f32 %v382_v20, %v207_v14  ;;  %v3272_v20 = vperm.slane %v335_v38, 2 }
  0xd8   :  { %4330 = vst [vmem:[#allocation34_spill] sm:$0xff] %v3263_v6 }
  0xd9   :  { %v2400_v62 = vmul.f32 -1.442695, %v427_v34  ;;  %v424_v34 = vor.u32 1.1754944e-38, %v423_v51 }
  0xdb   :  { %2460 = vpow2.f32 %v2400_v62  ;;  %v420_v62 = vsel %vm419_vm2, %v2459_v59, %v416_v54 }
  0xdc   :  { %v425_v55 = vsel %vm422_vm3, %v424_v34, %v420_v62 }
  0xdd   :  { %v186_v43 = vpop.f32.mrf.mxu0 }
  0xde   :  { %v3267_v4 = vadd.f32 %v186_v43, %v145_v39  ;;  %v250_v43 = vpop.f32.mrf.mxu2 }
  0xdf   :  { %v3277_v63 = vadd.f32 %v250_v43, %v3265_v40 }
  0xe0   :  { %4332 = vst [vmem:[#allocation36_spill] sm:$0xff] %v3267_v4 }
  0xe1   :  { %v2461_v18 = vpop.eup %2460 }
  0xe2   :  { %v431_v14 = vadd.f32 1.0, %v2461_v18 }
  0xe4   :  { %2462 = vrcp.f32 %v431_v14  ;;  %v443_v46 = vand.u32 2147483648, %v431_v14  ;;  %v441_v54 = vand.u32 2147483647, %v431_v14  ;;  %vm437_vm5 = vweird.f32 %v431_v14 }
  0xe5   :  { %v401_v29 = vpop.f32.mrf.mxu0 }
  0xe6   :  { %v402_v39 = vadd.f32 %v401_v29, %v3272_v20  ;;  %v253_v59 = vpop.f32.mrf.mxu2  ;;  %v444_v45 = vor.u32 1.1754944e-38, %v443_v46  ;;  %vm442_vm7 = vcmp.eq.f32.partialorder %v441_v54, 8.507059e+37 }
  0xe7   :  { %v3280_v51 = vadd.f32 %v253_v59, %v3265_v40  ;;  %v4348_v59 = vld [vmem:[#allocation28_spill] sm:$0xff] }
  0xe8   :  { %v447_v18 = vmul.f32 %v425_v55, %v402_v39 }
  0xea   :  { %v2463_v38 = vpop.eup %2462  ;;  %v448_v6 = vadd.f32 %v447_v18, %v245_v12 }
  0xeb   :  { %v433_v4 = vmul.f32 %v2463_v38, %v431_v14  ;;  %vm438_vm4 = vweird.f32 %v2463_v38 }
  0xec   :  { %2464 = vtanh.f32 %v448_v6  ;;  %vm439_vm6 = vmor %vm437_vm5, %vm438_vm4  ;;  %v459_v6 = vpop.permute.xlu0 %458 }
  0xed   :  { %v434_v44 = vsub.f32 1.0, %v433_v4 }
  0xee   :  { %v256_v55 = vpop.f32.mrf.mxu2 }
  0xef   :  { %v435_v33 = vmul.f32 %v2463_v38, %v434_v44  ;;  %v3283_v12 = vadd.f32 %v256_v55, %v3265_v40 }
  0xf1   :  { %v436_v24 = vadd.f32 %v2463_v38, %v435_v33  ;;  %4334 = vst [vmem:[#allocation38_spill] sm:$0xff] %v3283_v12 }
  0xf2   :  { %v2465_v39 = vpop.eup %2464 }
  0xf3   :  { %v440_v62 = vsel %vm439_vm6, %v2463_v38, %v436_v24  ;;  %v4347_v38 = vld [vmem:[#allocation27_spill] sm:$0xff] }
  0xf4   :  { %v445_v29 = vsel %vm442_vm7, %v444_v45, %v440_v62 }
  0xf5   :  { %v450_v34 = vsub.f32 1.0, %v445_v29  ;;  %v452_v4 = vmul.f32 0.0, %v445_v29  ;;  %v4349_v29 = vld [vmem:[#allocation32_spill] sm:$0xff] }
  0xf6   :  { %v259_v33 = vpop.f32.mrf.mxu2 }
  0xf7   :  { %v451_v43 = vmul.f32 %v2465_v39, %v450_v34  ;;  %v3294_v46 = vadd.f32 %v259_v33, %v3265_v40  ;;  %v4350_v39 = vld [vmem:[#allocation33_spill] sm:$0xff] }
  0xf9   :  { %v453_v18 = vadd.f32 %v452_v4, %v451_v43  ;;  %4335 = vst [vmem:[#allocation39_spill] sm:$0xff] %v3294_v46 }
  0xfb   :  { %v3285_v44 = vmul.f32 %v459_v6, %v453_v18 }
  0xfd   :  { %483 = vmatmul.f32.vlgmr.msrb.gmra.mxu1 %v3285_v44  ;;  %503 = vmatmul.f32.vlgmr.msrb.gmra.mxu2 %v3285_v44 }
  0xfe   :  { %523 = vmatmul.f32.vlgmr.msra.gmra.mxu3 %v3285_v44  ;;  %759 = vmatpush.msrb.mxu1 %v2938_v48 }
  0xff   :  { %845 = vmatpush.msrb.mxu2 %v2884_v1  ;;  %865 = vmatpush.msra.mxu3 %v2936_v47  ;;  %v4336_v1 = vld [vmem:[#allocation21_spill] sm:$0xff] }
 0x100   :  { %760 = vmatpush.msrb.mxu1 %v2945_v53 }
 0x101   :  { %846 = vmatpush.msrb.mxu2 %v2887_v3  ;;  %866 = vmatpush.msra.mxu3 %v2943_v52  ;;  %v4337_v3 = vld [vmem:[#allocation23_spill] sm:$0xff] }
 0x102   :  { %761 = vmatpush.msrb.mxu1 %v2951_v57 }
 0x103   :  { %847 = vmatpush.msrb.mxu2 %v2889_v5  ;;  %867 = vmatpush.msra.mxu3 %v2949_v56  ;;  %v4338_v5 = vld [vmem:[#allocation18_spill] sm:$0xff] }
 0x104   :  { %762 = vmatpush.msrb.mxu1 %v2957_v61 }
 0x105   :  { %848 = vmatpush.msrb.mxu2 %v2892_v7  ;;  %868 = vmatpush.msra.mxu3 %v2955_v60  ;;  %v4339_v7 = vld [vmem:[#allocation22_spill] sm:$0xff] }
 0x106   :  { %763 = vmatpush.msrb.mxu1 %v2968_v2 }
 0x107   :  { %849 = vmatpush.msrb.mxu2 %v2895_v9  ;;  %869 = vmatpush.msra.mxu3 %v2966_v0  ;;  %v4340_v9 = vld [vmem:[#allocation25_spill] sm:$0xff] }
 0x108   :  { %764 = vmatpush.msrb.mxu1 %v2975_v10 }
 0x109   :  { %850 = vmatpush.msrb.mxu2 %v2898_v11  ;;  %870 = vmatpush.msra.mxu3 %v2973_v8  ;;  %v4341_v11 = vld [vmem:[#allocation19_spill] sm:$0xff] }
 0x10a   :  { %765 = vmatpush.msrb.mxu1 %v2981_v17 }
 0x10b   :  { %851 = vmatpush.msrb.mxu2 %v2901_v13  ;;  %871 = vmatpush.msra.mxu3 %v2979_v16  ;;  %v4342_v13 = vld [vmem:[#allocation24_spill] sm:$0xff] }
 0x10c   :  { %766 = vmatpush.msrb.mxu1 %v2987_v23 }
 0x10d   :  { %852 = vmatpush.msrb.mxu2 %v2904_v15  ;;  %872 = vmatpush.msra.mxu3 %v2985_v21  ;;  %v209_v15 = vpop.f32.mrf.mxu1 }
 0x10e   :  { %767 = vmatpush.msrb.mxu1 %v2998_v27  ;;  %v210_v34 = vadd.f32 %v209_v15, %v4349_v29 }
 0x10f   :  { %853 = vmatpush.msrb.mxu2 %v2907_v19  ;;  %873 = vmatpush.msra.mxu3 %v2996_v26 }
 0x110   :  { %768 = vmatpush.msrb.mxu1 %v3005_v31 }
 0x111   :  { %854 = vmatpush.msrb.mxu2 %v2910_v22  ;;  %874 = vmatpush.msra.mxu3 %v3003_v30 }
 0x112   :  { %769 = vmatpush.msrb.mxu1 %v3017_v37 }
 0x113   :  { %855 = vmatpush.msrb.mxu2 %v2913_v25  ;;  %875 = vmatpush.msra.mxu3 %v3015_v35 }
 0x114   :  { %770 = vmatpush.msrb.mxu1 %v3024_v42 }
 0x115   :  { %856 = vmatpush.msrb.mxu2 %v2916_v28  ;;  %876 = vmatpush.msra.mxu3 %v3022_v41  ;;  %v3341_v19 = vpop.f32.mrf.mxu1 }
 0x116   :  { %771 = vmatpush.msrb.mxu1 %v3036_v50 }
 0x117   :  { %857 = vmatpush.msrb.mxu2 %v2919_v32  ;;  %877 = vmatpush.msra.mxu3 %v3034_v49 }
 0x118   :  { %772 = vmatpush.msrb.mxu1 %v3044_v58 }
 0x119   :  { %858 = vmatpush.msrb.mxu2 %v2922_v36  ;;  %878 = vmatpush.msra.mxu3 %v4336_v1  ;;  %v3351_v36 = vpop.f32.mrf.mxu2 }
 0x11a   :  { %773 = vmatpush.msrb.mxu1 %v4337_v3  ;;  %4346 = vst [vmem:[#allocation22_spill] sm:$0xff] %v3351_v36 }
 0x11b   :  { %859 = vmatpush.msrb.mxu2 %v4338_v5  ;;  %879 = vmatpush.msra.mxu3 %v4339_v7 }
 0x11c   :  { %774 = vmatpush.msrb.mxu1 %v4340_v9 }
 0x11d   :  { %860 = vmatpush.msrb.mxu2 %v4341_v11  ;;  %880 = vmatpush.msra.mxu3 %v4342_v13  ;;  %v3343_v22 = vpop.f32.mrf.mxu1 }
 0x125   :  { %v3345_v25 = vpop.f32.mrf.mxu1 }
 0x126   :  { %4343 = vst [vmem:[#allocation21_spill] sm:$0xff] %v3345_v25  ;;  %v4352_v25 = vld [vmem:[#allocation37_spill] sm:$0xff] }
 0x12d   :  { %v3347_v28 = vpop.f32.mrf.mxu1 }
 0x12e   :  { %4344 = vst [vmem:[#allocation23_spill] sm:$0xff] %v3347_v28 }
 0x135   :  { %v3349_v32 = vpop.f32.mrf.mxu1 }
 0x136   :  { %4345 = vst [vmem:[#allocation18_spill] sm:$0xff] %v3349_v32  ;;  %v4351_v32 = vld [vmem:[#allocation20_spill] sm:$0xff] }
 0x17a   :  { %v484_v14 = vpop.f32.mrf.mxu1 }
 0x17b   :  { %v485_v54 = vadd.f32 %v484_v14, %v4347_v38 }
 0x17d   :  { %v531_v24 = vadd.f32 %v485_v54, %v4348_v59  ;;  %v2409_v54 = vld [vmem:[%s4266_s1 + $0x18] sm:$0xff] }
 0x17e   :  { %835 = vperm.xlu1 %2454, %v2409_v54  }
 0x17f   :  { %v2401_v45 = vmul.f32 -1.442695, %v531_v24 }
 0x180   :  { %v504_v62 = vpop.f32.mrf.mxu2 }
 0x181   :  { %2466 = vpow2.f32 %v2401_v45  ;;  %v505_v43 = vadd.f32 %v504_v62, %v4350_v39 }
 0x183   :  { %v551_v4 = vadd.f32 %v505_v43, %v210_v34  ;;  %v524_v34 = vpop.f32.mrf.mxu3 }
 0x185   :  { %v2402_v55 = vmul.f32 -1.442695, %v551_v4 }
 0x186   :  { %1598 = vperm.xlu1 %2454, %v4351_v32  }
 0x187   :  { %v2467_v18 = vpop.eup %2466  ;;  %2468 = vpow2.f32 %v2402_v55 }
 0x188   :  { %v535_v6 = vadd.f32 1.0, %v2467_v18 }
 0x18a   :  { %2470 = vrcp.f32 %v535_v6  ;;  %v547_v59 = vand.u32 2147483648, %v535_v6  ;;  %v545_v45 = vand.u32 2147483647, %v535_v6  ;;  %vm541_vm9 = vweird.f32 %v535_v6 }
 0x18c   :  { %v548_v55 = vor.u32 1.1754944e-38, %v547_v59  ;;  %vm546_vm11 = vcmp.eq.f32.partialorder %v545_v45, 8.507059e+37 }
 0x18d   :  { %v2469_v33 = vpop.eup %2468 }
 0x18e   :  { %v555_v5 = vadd.f32 1.0, %v2469_v33  ;;  %v525_v33 = vadd.f32 %v524_v34, %v3272_v20  ;;  %1967 = vperm.xlu1 %2454, %v2409_v54   ;;  %v3384_v54 = vld [vmem:[#allocation8 + $0x150] sm:$0xff] }
 0x190   :  { %v2471_v11 = vpop.eup %2470  ;;  %2472 = vrcp.f32 %v555_v5  ;;  %v565_v28 = vand.u32 2147483647, %v555_v5  ;;  %vm561_vm13 = vweird.f32 %v555_v5 }
 0x191   :  { %v537_v14 = vmul.f32 %v2471_v11, %v535_v6  ;;  %vm542_vm8 = vweird.f32 %v2471_v11 }
 0x192   :  { %vm543_vm10 = vmor %vm541_vm9, %vm542_vm8  ;;  %vm566_vm15 = vcmp.eq.f32.partialorder %v565_v28, 8.507059e+37  ;;  %v3379_v28 = vld [vmem:[#allocation8 + $0x168] sm:$0xff] }
 0x193   :  { %v538_v15 = vsub.f32 1.0, %v537_v14 }
 0x195   :  { %v539_v24 = vmul.f32 %v2471_v11, %v538_v15  ;;  %v567_v15 = vand.u32 2147483648, %v555_v5 }
 0x196   :  { %v2473_v62 = vpop.eup %2472 }
 0x197   :  { %v557_v43 = vmul.f32 %v2473_v62, %v555_v5  ;;  %v540_v4 = vadd.f32 %v2471_v11, %v539_v24  ;;  %vm562_vm12 = vweird.f32 %v2473_v62  ;;  %v568_v6 = vor.u32 1.1754944e-38, %v567_v15  ;;  %v4353_v5 = vld [vmem:[#allocation26_spill] sm:$0xff] }
 0x198   :  { %vm563_vm14 = vmor %vm561_vm13, %vm562_vm12  ;;  %2336 = vperm.xlu1 %2454, %v4353_v5  }
 0x199   :  { %v558_v18 = vsub.f32 1.0, %v557_v43  ;;  %v544_v36 = vsel %vm543_vm10, %v2471_v11, %v540_v4 }
 0x19a   :  { %v549_v40 = vsel %vm546_vm11, %v548_v55, %v544_v36 }
 0x19b   :  { %v559_v14 = vmul.f32 %v2473_v62, %v558_v18  ;;  %v571_v46 = vmul.f32 %v549_v40, %v525_v33 }
 0x19d   :  { %v560_v12 = vadd.f32 %v2473_v62, %v559_v14  ;;  %v572_v24 = vadd.f32 %v571_v46, %v4352_v25  ;;  %v3369_v46 = vpop.permute.xlu0 %583 }
 0x19f   :  { %v564_v59 = vsel %vm563_vm14, %v2473_v62, %v560_v12  ;;  %2474 = vtanh.f32 %v572_v24  ;;  %v3389_v62 = vld [vmem:[#allocation8 + $0x138] sm:$0xff] }
 0x1a0   :  { %v569_v34 = vsel %vm566_vm15, %v568_v6, %v564_v59 }
 0x1a1   :  { %v574_v11 = vsub.f32 1.0, %v569_v34  ;;  %v576_v32 = vmul.f32 %v569_v34, %v3285_v44 }
 0x1a5   :  { %v2475_v36 = vpop.eup %2474 }
 0x1a6   :  { %v575_v45 = vmul.f32 %v2475_v36, %v574_v11 }
 0x1a8   :  { %v3364_v43 = vadd.f32 %v576_v32, %v575_v45 }
 0x1aa   :  { %v580_v40 = vsub.f32 %v3364_v43, %v3285_v44 }
 0x1ac   :  { %v586_v12 = vmul.f32 %v3369_v46, %v580_v40 }
 0x1ae   :  { %v3373_v25 = vadd.f32 %v586_v12, %v3285_v44 }
 0x1b0   :  { %609 = vmatmul.f32.vlgmr.msra.gmra.mxu0 %v3373_v25  ;;  %629 = vmatmul.f32.vlgmr.msra.gmra.mxu1 %v3373_v25 }
 0x1b1   :  { %649 = vmatmul.f32.vlgmr.msra.gmra.mxu2 %v3373_v25  ;;  %885 = vmatpush.msra.mxu0 %v2938_v48  ;;  %v3394_v48 = vld [vmem:[#allocation8 + $0x120] sm:$0xff] }
 0x1b2   :  { %971 = vmatpush.msra.mxu1 %v3379_v28  ;;  %991 = vmatpush.msra.mxu2 %v2936_v47  ;;  %v3399_v47 = vld [vmem:[#allocation8 + $0x108] sm:$0xff] }
 0x1b3   :  { %886 = vmatpush.msra.mxu0 %v2945_v53  ;;  %v3409_v53 = vld [vmem:[#allocation8 + $0xd8] sm:$0xff] }
 0x1b4   :  { %972 = vmatpush.msra.mxu1 %v3384_v54  ;;  %992 = vmatpush.msra.mxu2 %v2943_v52  ;;  %v3404_v52 = vld [vmem:[#allocation8 + $0xf0] sm:$0xff] }
 0x1b5   :  { %887 = vmatpush.msra.mxu0 %v2951_v57  ;;  %v3419_v57 = vld [vmem:[#allocation8 + $0xa8] sm:$0xff] }
 0x1b6   :  { %973 = vmatpush.msra.mxu1 %v3389_v62  ;;  %993 = vmatpush.msra.mxu2 %v2949_v56  ;;  %v3414_v56 = vld [vmem:[#allocation8 + $0xc0] sm:$0xff] }
 0x1b7   :  { %888 = vmatpush.msra.mxu0 %v2957_v61  ;;  %v3429_v61 = vld [vmem:[#allocation8 + $0x78] sm:$0xff] }
 0x1b8   :  { %974 = vmatpush.msra.mxu1 %v3394_v48  ;;  %994 = vmatpush.msra.mxu2 %v2955_v60  ;;  %v3424_v60 = vld [vmem:[#allocation8 + $0x90] sm:$0xff] }
 0x1b9   :  { %889 = vmatpush.msra.mxu0 %v2968_v2  ;;  %v3439_v2 = vld [vmem:[#allocation8 + $0x48] sm:$0xff] }
 0x1ba   :  { %975 = vmatpush.msra.mxu1 %v3399_v47  ;;  %995 = vmatpush.msra.mxu2 %v2966_v0  ;;  %v3434_v0 = vld [vmem:[#allocation8 + $0x60] sm:$0xff] }
 0x1bb   :  { %890 = vmatpush.msra.mxu0 %v2975_v10  ;;  %v3449_v10 = vld [vmem:[#allocation8 + $0x18] sm:$0xff] }
 0x1bc   :  { %976 = vmatpush.msra.mxu1 %v3404_v52  ;;  %996 = vmatpush.msra.mxu2 %v2973_v8  ;;  %v3444_v8 = vld [vmem:[#allocation8 + $0x30] sm:$0xff] }
 0x1bd   :  { %891 = vmatpush.msra.mxu0 %v2981_v17 }
 0x1be   :  { %977 = vmatpush.msra.mxu1 %v3409_v53  ;;  %997 = vmatpush.msra.mxu2 %v2979_v16  ;;  %v3454_v16 = vld [vmem:[#allocation8] sm:$0xff] }
 0x1bf   :  { %892 = vmatpush.msra.mxu0 %v2987_v23  ;;  %v213_v23 = vadd.f32 %v3341_v19, %v4349_v29 }
 0x1c0   :  { %978 = vmatpush.msra.mxu1 %v3414_v56  ;;  %998 = vmatpush.msra.mxu2 %v2985_v21 }
 0x1c1   :  { %893 = vmatpush.msra.mxu0 %v2998_v27 }
 0x1c2   :  { %979 = vmatpush.msra.mxu1 %v3419_v57  ;;  %999 = vmatpush.msra.mxu2 %v2996_v26 }
 0x1c3   :  { %894 = vmatpush.msra.mxu0 %v3005_v31 }
 0x1c4   :  { %980 = vmatpush.msra.mxu1 %v3424_v60  ;;  %1000 = vmatpush.msra.mxu2 %v3003_v30  ;;  %v4354_v30 = vld [vmem:[#allocation29_spill] sm:$0xff] }
 0x1c5   :  { %895 = vmatpush.msra.mxu0 %v3017_v37 }
 0x1c6   :  { %981 = vmatpush.msra.mxu1 %v3429_v61  ;;  %1001 = vmatpush.msra.mxu2 %v3015_v35 }
 0x1c7   :  { %896 = vmatpush.msra.mxu0 %v3024_v42 }
 0x1c8   :  { %982 = vmatpush.msra.mxu1 %v3434_v0  ;;  %1002 = vmatpush.msra.mxu2 %v3022_v41 }
 0x1c9   :  { %897 = vmatpush.msra.mxu0 %v3036_v50 }
 0x1ca   :  { %983 = vmatpush.msra.mxu1 %v3439_v2  ;;  %1003 = vmatpush.msra.mxu2 %v3034_v49 }
 0x1cb   :  { %898 = vmatpush.msra.mxu0 %v3044_v58 }
 0x1cc   :  { %984 = vmatpush.msra.mxu1 %v3444_v8  ;;  %1004 = vmatpush.msra.mxu2 %v4336_v1 }
 0x1cd   :  { %899 = vmatpush.msra.mxu0 %v4337_v3 }
 0x1ce   :  { %985 = vmatpush.msra.mxu1 %v3449_v10  ;;  %1005 = vmatpush.msra.mxu2 %v4339_v7 }
 0x1cf   :  { %900 = vmatpush.msra.mxu0 %v4340_v9 }
 0x1d0   :  { %986 = vmatpush.msra.mxu1 %v3454_v16  ;;  %1006 = vmatpush.msra.mxu2 %v4342_v13 }
 0x22d   :  { %v610_v17 = vpop.f32.mrf.mxu0  ;;  %v630_v21 = vpop.f32.mrf.mxu1 }
 0x22e   :  { %v611_v26 = vadd.f32 %v610_v17, %v4347_v38  ;;  %v631_v27 = vadd.f32 %v630_v21, %v4350_v39 }
 0x230   :  { %v657_v31 = vadd.f32 %v611_v26, %v4354_v30  ;;  %v677_v35 = vadd.f32 %v631_v27, %v213_v23 }
 0x232   :  { %v2404_v37 = vmul.f32 -1.442695, %v657_v31  ;;  %v2405_v41 = vmul.f32 -1.442695, %v677_v35  ;;  %v710_v31 = vpop.permute.xlu1 %709 }
 0x234   :  { %2476 = vpow2.f32 %v2404_v37  ;;  %v650_v33 = vpop.f32.mrf.mxu2 }
 0x235   :  { %2478 = vpow2.f32 %v2405_v41  ;;  %v651_v6 = vadd.f32 %v650_v33, %v3272_v20  ;;  %v3519_v33 = vld [vmem:[#allocation8 + $0x70] sm:$0xff] }
 0x23a   :  { %v2477_v42 = vpop.eup %2476 }
 0x23b   :  { %v2479_v49 = vpop.eup %2478  ;;  %v661_v50 = vadd.f32 1.0, %v2477_v42  ;;  %v3475_v42 = vld [vmem:[#allocation8 + $0x178] sm:$0xff] }
 0x23c   :  { %v681_v58 = vadd.f32 1.0, %v2479_v49  ;;  %v2613_v49 = vld [vmem:[#allocation8 + $0x170] sm:$0xff] }
 0x23d   :  { %2480 = vrcp.f32 %v661_v50  ;;  %v673_v19 = vand.u32 2147483648, %v661_v50  ;;  %v671_v18 = vand.u32 2147483647, %v661_v50  ;;  %vm667_vm1 = vweird.f32 %v661_v50 }
 0x23e   :  { %2482 = vrcp.f32 %v681_v58  ;;  %v693_v45 = vand.u32 2147483648, %v681_v58  ;;  %vm687_vm5 = vweird.f32 %v681_v58  ;;  %v691_v32 = vand.u32 2147483647, %v681_v58 }
 0x23f   :  { %v674_v24 = vor.u32 1.1754944e-38, %v673_v19  ;;  %vm672_vm3 = vcmp.eq.f32.partialorder %v671_v18, 8.507059e+37  ;;  %v3503_v19 = vld [vmem:[#allocation8 + $0xd0] sm:$0xff]  ;;  %v3515_v18 = vld [vmem:[#allocation8 + $0x88] sm:$0xff] }
 0x240   :  { %v694_v12 = vor.u32 1.1754944e-38, %v693_v45  ;;  %vm692_vm7 = vcmp.eq.f32.partialorder %v691_v32, 8.507059e+37  ;;  %v4355_v32 = vld [vmem:[#allocation30_spill] sm:$0xff] }
 0x243   :  { %v2481_v1 = vpop.eup %2480 }
 0x244   :  { %v2483_v3 = vpop.eup %2482  ;;  %v663_v7 = vmul.f32 %v2481_v1, %v661_v50  ;;  %vm668_vm0 = vweird.f32 %v2481_v1  ;;  %v3479_v50 = vld [vmem:[#allocation8 + $0x160] sm:$0xff] }
 0x245   :  { %v683_v9 = vmul.f32 %v2483_v3, %v681_v58  ;;  %vm669_vm2 = vmor %vm667_vm1, %vm668_vm0  ;;  %vm688_vm4 = vweird.f32 %v2483_v3  ;;  %v3483_v58 = vld [vmem:[#allocation8 + $0x148] sm:$0xff] }
 0x246   :  { %v664_v13 = vsub.f32 1.0, %v663_v7  ;;  %vm689_vm6 = vmor %vm687_vm5, %vm688_vm4  ;;  %v3491_v7 = vld [vmem:[#allocation8 + $0x118] sm:$0xff] }
 0x247   :  { %v684_v4 = vsub.f32 1.0, %v683_v9  ;;  %v3495_v9 = vld [vmem:[#allocation8 + $0x100] sm:$0xff] }
 0x248   :  { %v665_v55 = vmul.f32 %v2481_v1, %v664_v13  ;;  %v3499_v13 = vld [vmem:[#allocation8 + $0xe8] sm:$0xff] }
 0x249   :  { %v685_v14 = vmul.f32 %v2483_v3, %v684_v4  ;;  %v3507_v4 = vld [vmem:[#allocation8 + $0xb8] sm:$0xff] }
 0x24a   :  { %v666_v15 = vadd.f32 %v2481_v1, %v665_v55  ;;  %v3511_v55 = vld [vmem:[#allocation8 + $0xa0] sm:$0xff] }
 0x24b   :  { %v686_v11 = vadd.f32 %v2483_v3, %v685_v14  ;;  %v3523_v14 = vld [vmem:[#allocation8 + $0x58] sm:$0xff] }
 0x24c   :  { %v670_v59 = vsel %vm669_vm2, %v2481_v1, %v666_v15  ;;  %v2617_v1 = vld [vmem:[#allocation8 + $0x140] sm:$0xff] }
 0x24d   :  { %v675_v34 = vsel %vm672_vm3, %v674_v24, %v670_v59  ;;  %v690_v5 = vsel %vm689_vm6, %v2483_v3, %v686_v11  ;;  %v3487_v3 = vld [vmem:[#allocation8 + $0x130] sm:$0xff]  ;;  %v3527_v15 = vld [vmem:[#allocation8 + $0x40] sm:$0xff]  ;;  %v3531_v24 = vld [vmem:[#allocation8 + $0x28] sm:$0xff] }
 0x24e   :  { %v697_v36 = vmul.f32 %v675_v34, %v651_v6  ;;  %v695_v17 = vsel %vm692_vm7, %v694_v12, %v690_v5  ;;  %v3535_v6 = vld [vmem:[#allocation8 + $0x10] sm:$0xff] }
 0x24f   :  { %v700_v21 = vsub.f32 1.0, %v695_v17  ;;  %v702_v27 = vmul.f32 %v695_v17, %v3373_v25 }
 0x250   :  { %v698_v40 = vadd.f32 %v697_v36, %v3277_v63 }
 0x252   :  { %2484 = vtanh.f32 %v698_v40 }
 0x258   :  { %v2485_v23 = vpop.eup %2484 }
 0x259   :  { %v701_v26 = vmul.f32 %v2485_v23, %v700_v21 }
 0x25b   :  { %v703_v30 = vadd.f32 %v702_v27, %v701_v26 }
 0x25d   :  { %v706_v35 = vsub.f32 %v703_v30, %v3373_v25  ;;  %v3467_v37 = vmul.f32 %v710_v31, %v703_v30  ;;  %v2412_v30 = vld [vmem:[%s4266_s1 + $0x20] sm:$0xff] }
 0x25e   :  { %961 = vperm.xlu2 %2455, %v2412_v30  }
 0x25f   :  { %v712_v41 = vmul.f32 %v710_v31, %v706_v35 }
 0x261   :  { %v3470_v63 = vadd.f32 %v712_v41, %v3373_v25  ;;  %v2615_v25 = vld [vmem:[#allocation8 + $0x158] sm:$0xff] }
 0x263   :  { %735 = vmatmul.f32.vlgmr.msrb.gmra.mxu3 %v3470_v63  ;;  %755 = vmatmul.f32.vlgmr.msrb.gmra.mxu0 %v3470_v63 }
 0x264   :  { %775 = vmatmul.f32.vlgmr.msrb.gmra.mxu1 %v3470_v63  ;;  %1011 = vmatpush.msrb.mxu3 %v3475_v42 }
 0x265   :  { %1097 = vmatpush.msrb.mxu0 %v3379_v28  ;;  %1117 = vmatpush.msrb.mxu1 %v2613_v49  ;;  %v2619_v28 = vld [vmem:[#allocation8 + $0x128] sm:$0xff] }
 0x266   :  { %1012 = vmatpush.msrb.mxu3 %v3479_v50 }
 0x267   :  { %1098 = vmatpush.msrb.mxu0 %v3384_v54  ;;  %1118 = vmatpush.msrb.mxu1 %v2615_v25  ;;  %v2621_v54 = vld [vmem:[#allocation8 + $0x110] sm:$0xff] }
 0x268   :  { %1013 = vmatpush.msrb.mxu3 %v3483_v58 }
 0x269   :  { %1099 = vmatpush.msrb.mxu0 %v3389_v62  ;;  %1119 = vmatpush.msrb.mxu1 %v2617_v1  ;;  %v2623_v62 = vld [vmem:[#allocation8 + $0xf8] sm:$0xff] }
 0x26a   :  { %1014 = vmatpush.msrb.mxu3 %v3487_v3 }
 0x26b   :  { %1100 = vmatpush.msrb.mxu0 %v3394_v48  ;;  %1120 = vmatpush.msrb.mxu1 %v2619_v28  ;;  %v2625_v48 = vld [vmem:[#allocation8 + $0xe0] sm:$0xff] }
 0x26c   :  { %1015 = vmatpush.msrb.mxu3 %v3491_v7 }
 0x26d   :  { %1101 = vmatpush.msrb.mxu0 %v3399_v47  ;;  %1121 = vmatpush.msrb.mxu1 %v2621_v54  ;;  %v2627_v47 = vld [vmem:[#allocation8 + $0xc8] sm:$0xff] }
 0x26e   :  { %1016 = vmatpush.msrb.mxu3 %v3495_v9 }
 0x26f   :  { %1102 = vmatpush.msrb.mxu0 %v3404_v52  ;;  %1122 = vmatpush.msrb.mxu1 %v2623_v62  ;;  %v2629_v52 = vld [vmem:[#allocation8 + $0xb0] sm:$0xff] }
 0x270   :  { %1017 = vmatpush.msrb.mxu3 %v3499_v13 }
 0x271   :  { %1103 = vmatpush.msrb.mxu0 %v3409_v53  ;;  %1123 = vmatpush.msrb.mxu1 %v2625_v48  ;;  %v2631_v53 = vld [vmem:[#allocation8 + $0x98] sm:$0xff] }
 0x272   :  { %1018 = vmatpush.msrb.mxu3 %v3503_v19 }
 0x273   :  { %1104 = vmatpush.msrb.mxu0 %v3414_v56  ;;  %1124 = vmatpush.msrb.mxu1 %v2627_v47  ;;  %v2633_v56 = vld [vmem:[#allocation8 + $0x80] sm:$0xff] }
 0x274   :  { %1019 = vmatpush.msrb.mxu3 %v3507_v4 }
 0x275   :  { %1105 = vmatpush.msrb.mxu0 %v3419_v57  ;;  %1125 = vmatpush.msrb.mxu1 %v2629_v52  ;;  %v2635_v57 = vld [vmem:[#allocation8 + $0x68] sm:$0xff] }
 0x276   :  { %1020 = vmatpush.msrb.mxu3 %v3511_v55 }
 0x277   :  { %1106 = vmatpush.msrb.mxu0 %v3424_v60  ;;  %1126 = vmatpush.msrb.mxu1 %v2631_v53  ;;  %v2637_v60 = vld [vmem:[#allocation8 + $0x50] sm:$0xff] }
 0x278   :  { %1021 = vmatpush.msrb.mxu3 %v3515_v18 }
 0x279   :  { %1107 = vmatpush.msrb.mxu0 %v3429_v61  ;;  %1127 = vmatpush.msrb.mxu1 %v2633_v56  ;;  %v2639_v61 = vld [vmem:[#allocation8 + $0x38] sm:$0xff]  ;;  %v2644_v56 = vld [vmem:[%s4266_s1 + $0x28] sm:$0xff] }
 0x27a   :  { %1022 = vmatpush.msrb.mxu3 %v3519_v33  ;;  %1087 = vperm.xlu2 %2455, %v2644_v56  }
 0x27b   :  { %1108 = vmatpush.msrb.mxu0 %v3434_v0  ;;  %1128 = vmatpush.msrb.mxu1 %v2635_v57  ;;  %v2641_v0 = vld [vmem:[#allocation8 + $0x20] sm:$0xff] }
 0x27c   :  { %1023 = vmatpush.msrb.mxu3 %v3523_v14 }
 0x27d   :  { %1109 = vmatpush.msrb.mxu0 %v3439_v2  ;;  %1129 = vmatpush.msrb.mxu1 %v2637_v60  ;;  %v2643_v2 = vld [vmem:[#allocation8 + $0x8] sm:$0xff] }
 0x27e   :  { %1024 = vmatpush.msrb.mxu3 %v3527_v15 }
 0x27f   :  { %1110 = vmatpush.msrb.mxu0 %v3444_v8  ;;  %1130 = vmatpush.msrb.mxu1 %v2639_v61  ;;  %v216_v8 = vadd.f32 %v3343_v22, %v4349_v29 }
 0x280   :  { %1025 = vmatpush.msrb.mxu3 %v3531_v24 }
 0x281   :  { %1111 = vmatpush.msrb.mxu0 %v3449_v10  ;;  %1131 = vmatpush.msrb.mxu1 %v2641_v0 }
 0x282   :  { %1026 = vmatpush.msrb.mxu3 %v3535_v6 }
 0x283   :  { %1112 = vmatpush.msrb.mxu0 %v3454_v16  ;;  %1132 = vmatpush.msrb.mxu1 %v2643_v2 }
 0x2e0   :  { %v756_v59 = vpop.f32.mrf.mxu0 }
 0x2e1   :  { %v757_v34 = vadd.f32 %v756_v59, %v4350_v39  ;;  %v776_v28 = vpop.f32.mrf.mxu1 }
 0x2e2   :  { %v777_v48 = vadd.f32 %v776_v28, %v3272_v20  ;;  %v1238_v28 = vld [vmem:[#allocation5 + $0x1b0] sm:$0xff] }
 0x2e3   :  { %v803_v11 = vadd.f32 %v757_v34, %v216_v8  ;;  %v2645_v34 = vld [vmem:[%s4266_s1 + $0x8] sm:$0xff] }
 0x2e4   :  { %1721 = vperm.xlu2 %2455, %v2645_v34  }
 0x2e5   :  { %v2408_v36 = vmul.f32 -1.442695, %v803_v11 }
 0x2e6   :  { %v736_v45 = vpop.f32.mrf.mxu3 }
 0x2e7   :  { %2486 = vpow2.f32 %v2408_v36  ;;  %v737_v10 = vadd.f32 %v736_v45, %v4347_v38 }
 0x2e9   :  { %v783_v40 = vadd.f32 %v737_v10, %v4355_v32 }
 0x2eb   :  { %v2407_v5 = vmul.f32 -1.442695, %v783_v40  ;;  %v3560_v40 = vpop.permute.xlu1 %835 }
 0x2ec   :  { %2090 = vperm.xlu2 %2455, %v2412_v30   ;;  %v1250_v30 = vld [vmem:[#allocation5 + $0x210] sm:$0xff] }
 0x2ed   :  { %v2487_v12 = vpop.eup %2486  ;;  %2488 = vpow2.f32 %v2407_v5 }
 0x2ee   :  { %v807_v16 = vadd.f32 1.0, %v2487_v12 }
 0x2f0   :  { %2490 = vrcp.f32 %v807_v16  ;;  %v819_v57 = vand.u32 2147483648, %v807_v16  ;;  %vm813_vm13 = vweird.f32 %v807_v16  ;;  %v817_v61 = vand.u32 2147483647, %v807_v16 }
 0x2f2   :  { %v820_v59 = vor.u32 1.1754944e-38, %v819_v57  ;;  %vm818_vm15 = vcmp.eq.f32.partialorder %v817_v61, 8.507059e+37  ;;  %v1232_v57 = vld [vmem:[#allocation5 + $0x180] sm:$0xff] }
 0x2f3   :  { %v2489_v17 = vpop.eup %2488 }
 0x2f4   :  { %v787_v21 = vadd.f32 1.0, %v2489_v17 }
 0x2f6   :  { %2492 = vrcp.f32 %v787_v21  ;;  %v2491_v23 = vpop.eup %2490  ;;  %v799_v41 = vand.u32 2147483648, %v787_v21  ;;  %v797_v25 = vand.u32 2147483647, %v787_v21  ;;  %vm793_vm9 = vweird.f32 %v787_v21 }
 0x2f7   :  { %v809_v22 = vmul.f32 %v2491_v23, %v807_v16  ;;  %vm814_vm12 = vweird.f32 %v2491_v23  ;;  %v1259_v16 = vld [vmem:[#allocation5 + $0x258] sm:$0xff] }
 0x2f8   :  { %v800_v62 = vor.u32 1.1754944e-38, %v799_v41  ;;  %vm798_vm11 = vcmp.eq.f32.partialorder %v797_v25, 8.507059e+37  ;;  %vm815_vm14 = vmor %vm813_vm13, %vm814_vm12 }
 0x2f9   :  { %v810_v31 = vsub.f32 1.0, %v809_v22 }
 0x2fb   :  { %v811_v1 = vmul.f32 %v2491_v23, %v810_v31  ;;  %v1247_v31 = vld [vmem:[#allocation5 + $0x1f8] sm:$0xff] }
 0x2fc   :  { %v2493_v26 = vpop.eup %2492 }
 0x2fd   :  { %v789_v27 = vmul.f32 %v2493_v26, %v787_v21  ;;  %vm794_vm8 = vweird.f32 %v2493_v26  ;;  %v812_v52 = vadd.f32 %v2491_v23, %v811_v1  ;;  %v1256_v21 = vld [vmem:[#allocation5 + $0x240] sm:$0xff]  ;;  %v1241_v1 = vld [vmem:[#allocation5 + $0x1c8] sm:$0xff] }
 0x2fe   :  { %vm795_vm10 = vmor %vm793_vm9, %vm794_vm8 }
 0x2ff   :  { %v790_v35 = vsub.f32 1.0, %v789_v27  ;;  %v816_v2 = vsel %vm815_vm14, %v2491_v23, %v812_v52  ;;  %v1253_v27 = vld [vmem:[#allocation5 + $0x228] sm:$0xff] }
 0x300   :  { %v821_v8 = vsel %vm818_vm15, %v820_v59, %v816_v2 }
 0x301   :  { %v791_v49 = vmul.f32 %v2493_v26, %v790_v35  ;;  %v826_v11 = vsub.f32 1.0, %v821_v8  ;;  %v828_v45 = vmul.f32 %v821_v8, %v3470_v63  ;;  %v1244_v35 = vld [vmem:[#allocation5 + $0x1e0] sm:$0xff] }
 0x303   :  { %v792_v54 = vadd.f32 %v2493_v26, %v791_v49 }
 0x305   :  { %v796_v47 = vsel %vm795_vm10, %v2493_v26, %v792_v54 }
 0x306   :  { %v801_v53 = vsel %vm798_vm11, %v800_v62, %v796_v47 }
 0x307   :  { %v823_v60 = vmul.f32 %v801_v53, %v777_v48  ;;  %v1235_v48 = vld [vmem:[#allocation5 + $0x198] sm:$0xff] }
 0x309   :  { %v824_v0 = vadd.f32 %v823_v60, %v3280_v51 }
 0x30b   :  { %2494 = vtanh.f32 %v824_v0 }
 0x311   :  { %v2495_v36 = vpop.eup %2494 }
 0x312   :  { %v827_v10 = vmul.f32 %v2495_v36, %v826_v11 }
 0x314   :  { %v3556_v32 = vadd.f32 %v828_v45, %v827_v10 }
 0x316   :  { %v832_v51 = vsub.f32 %v3556_v32, %v3470_v63 }
 0x318   :  { %v838_v5 = vmul.f32 %v3560_v40, %v832_v51  ;;  %v4358_v51 = vld [vmem:[#allocation38_spill] sm:$0xff] }
 0x31a   :  { %v3564_v12 = vadd.f32 %v838_v5, %v3470_v63  ;;  %v1277_v63 = vld [vmem:[#allocation5 + $0x2e8] sm:$0xff] }
 0x31c   :  { %861 = vmatmul.f32.vlgmr.msrb.gmra.mxu2 %v3564_v12  ;;  %881 = vmatmul.f32.vlgmr.msra.gmra.mxu3 %v3564_v12 }
 0x31d   :  { %901 = vmatmul.f32.vlgmr.msra.gmra.mxu0 %v3564_v12  ;;  %1137 = vmatpush.msrb.mxu2 %v3475_v42 }
 0x31e   :  { %1289 = vmatpush.msra.mxu3 %v1277_v63 }
 0x31f   :  { %1138 = vmatpush.msrb.mxu2 %v3479_v50 }
 0x321   :  { %1139 = vmatpush.msrb.mxu2 %v3483_v58  ;;  %v4356_v58 = vld [vmem:[#allocation21_spill] sm:$0xff] }
 0x323   :  { %1140 = vmatpush.msrb.mxu2 %v3487_v3  ;;  %v219_v3 = vadd.f32 %v4356_v58, %v4349_v29 }
 0x325   :  { %1141 = vmatpush.msrb.mxu2 %v3491_v7 }
 0x327   :  { %1142 = vmatpush.msrb.mxu2 %v3495_v9 }
 0x329   :  { %1143 = vmatpush.msrb.mxu2 %v3499_v13  ;;  %v1274_v13 = vld [vmem:[#allocation5 + $0x2d0] sm:$0xff] }
 0x32a   :  { %1290 = vmatpush.msra.mxu3 %v1274_v13 }
 0x32b   :  { %1144 = vmatpush.msrb.mxu2 %v3503_v19  ;;  %v4357_v19 = vld [vmem:[#allocation31_spill] sm:$0xff] }
 0x32d   :  { %1145 = vmatpush.msrb.mxu2 %v3507_v4 }
 0x32f   :  { %1146 = vmatpush.msrb.mxu2 %v3511_v55 }
 0x331   :  { %1147 = vmatpush.msrb.mxu2 %v3515_v18  ;;  %v1271_v18 = vld [vmem:[#allocation5 + $0x2b8] sm:$0xff] }
 0x332   :  { %1291 = vmatpush.msra.mxu3 %v1271_v18 }
 0x333   :  { %1148 = vmatpush.msrb.mxu2 %v3519_v33 }
 0x335   :  { %1149 = vmatpush.msrb.mxu2 %v3523_v14 }
 0x337   :  { %1150 = vmatpush.msrb.mxu2 %v3527_v15  ;;  %v1268_v15 = vld [vmem:[#allocation5 + $0x2a0] sm:$0xff] }
 0x338   :  { %1292 = vmatpush.msra.mxu3 %v1268_v15  ;;  %v3615_v15 = vld [vmem:[#allocation8 + $0x2e8] sm:$0xff] }
 0x339   :  { %1151 = vmatpush.msrb.mxu2 %v3531_v24  ;;  %v1265_v24 = vld [vmem:[#allocation5 + $0x288] sm:$0xff] }
 0x33a   :  { %1293 = vmatpush.msra.mxu3 %v1265_v24  ;;  %v1278_v24 = vld [vmem:[#allocation5 + $0x2f0] sm:$0xff] }
 0x33b   :  { %1152 = vmatpush.msrb.mxu2 %v3535_v6  ;;  %v1262_v6 = vld [vmem:[#allocation5 + $0x270] sm:$0xff]  ;;  %1327 = vmatpush.msra.mxu0 %v1278_v24 }
 0x33c   :  { %1294 = vmatpush.msra.mxu3 %v1262_v6  ;;  %v1279_v6 = vld [vmem:[#allocation5 + $0x2f8] sm:$0xff] }
 0x33e   :  { %1295 = vmatpush.msra.mxu3 %v1259_v16  ;;  %v3627_v16 = vld [vmem:[#allocation8 + $0x288] sm:$0xff] }
 0x340   :  { %1296 = vmatpush.msra.mxu3 %v1256_v21  ;;  %v1275_v21 = vld [vmem:[#allocation5 + $0x2d8] sm:$0xff] }
 0x341   :  { %1328 = vmatpush.msra.mxu0 %v1275_v21  ;;  %v1243_v21 = vld [vmem:[#allocation5 + $0x1d8] sm:$0xff] }
 0x342   :  { %1297 = vmatpush.msra.mxu3 %v1253_v27 }
 0x344   :  { %1298 = vmatpush.msra.mxu3 %v1250_v30  ;;  %v1272_v30 = vld [vmem:[#allocation5 + $0x2c0] sm:$0xff] }
 0x345   :  { %1329 = vmatpush.msra.mxu0 %v1272_v30  ;;  %v1240_v30 = vld [vmem:[#allocation5 + $0x1c0] sm:$0xff] }
 0x346   :  { %1299 = vmatpush.msra.mxu3 %v1247_v31  ;;  %v1273_v31 = vld [vmem:[#allocation5 + $0x2c8] sm:$0xff] }
 0x348   :  { %1300 = vmatpush.msra.mxu3 %v1244_v35  ;;  %v3635_v35 = vld [vmem:[#allocation8 + $0x258] sm:$0xff] }
 0x34a   :  { %1301 = vmatpush.msra.mxu3 %v1241_v1  ;;  %v3637_v1 = vld [vmem:[#allocation8 + $0x240] sm:$0xff] }
 0x34c   :  { %1302 = vmatpush.msra.mxu3 %v1238_v28 }
 0x34e   :  { %1303 = vmatpush.msra.mxu3 %v1235_v48 }
 0x350   :  { %1304 = vmatpush.msra.mxu3 %v1232_v57  ;;  %v1263_v57 = vld [vmem:[#allocation5 + $0x278] sm:$0xff] }
 0x39a   :  { %v902_v60 = vpop.f32.mrf.mxu0 }
 0x39b   :  { %v903_v59 = vadd.f32 %v902_v60, %v3272_v20  ;;  %v1264_v60 = vld [vmem:[#allocation5 + $0x280] sm:$0xff] }
 0x39f   :  { %v862_v42 = vpop.f32.mrf.mxu2  ;;  %v882_v50 = vpop.f32.mrf.mxu3 }
 0x3a0   :  { %v863_v7 = vadd.f32 %v862_v42, %v4347_v38  ;;  %v883_v9 = vadd.f32 %v882_v50, %v4350_v39 }
 0x3a2   :  { %v909_v4 = vadd.f32 %v863_v7, %v4357_v19  ;;  %v929_v55 = vadd.f32 %v883_v9, %v219_v3 }
 0x3a4   :  { %v2410_v33 = vmul.f32 -1.442695, %v909_v4  ;;  %v2411_v14 = vmul.f32 -1.442695, %v929_v55  ;;  %v962_v4 = vpop.permute.xlu2 %961 }
 0x3a6   :  { %2496 = vpow2.f32 %v2410_v33  ;;  %v3603_v33 = vmul.f32 %v3369_v46, %v3364_v43  ;;  %v3618_v43 = vld [vmem:[#allocation8 + $0x2d0] sm:$0xff]  ;;  %v3621_v46 = vld [vmem:[#allocation8 + $0x2b8] sm:$0xff] }
 0x3a7   :  { %2498 = vpow2.f32 %v2411_v14 }
 0x3ac   :  { %v2497_v17 = vpop.eup %2496 }
 0x3ad   :  { %v2499_v23 = vpop.eup %2498  ;;  %v913_v22 = vadd.f32 1.0, %v2497_v17 }
 0x3ae   :  { %v933_v26 = vadd.f32 1.0, %v2499_v23  ;;  %v1276_v23 = vld [vmem:[#allocation5 + $0x2e0] sm:$0xff] }
 0x3af   :  { %2500 = vrcp.f32 %v913_v22  ;;  %v925_v47 = vand.u32 2147483648, %v913_v22  ;;  %v923_v56 = vand.u32 2147483647, %v913_v22  ;;  %vm919_vm1 = vweird.f32 %v913_v22 }
 0x3b0   :  { %2502 = vrcp.f32 %v933_v26  ;;  %v945_v36 = vand.u32 2147483648, %v933_v26  ;;  %vm939_vm5 = vweird.f32 %v933_v26  ;;  %v943_v10 = vand.u32 2147483647, %v933_v26 }
 0x3b1   :  { %v926_v2 = vor.u32 1.1754944e-38, %v925_v47  ;;  %vm924_vm3 = vcmp.eq.f32.partialorder %v923_v56, 8.507059e+37  ;;  %v1266_v47 = vld [vmem:[#allocation5 + $0x290] sm:$0xff] }
 0x3b2   :  { %v946_v42 = vor.u32 1.1754944e-38, %v945_v36  ;;  %vm944_vm7 = vcmp.eq.f32.partialorder %v943_v10, 8.507059e+37 }
 0x3b5   :  { %v2501_v41 = vpop.eup %2500 }
 0x3b6   :  { %v2503_v49 = vpop.eup %2502  ;;  %v915_v25 = vmul.f32 %v2501_v41, %v913_v22  ;;  %vm920_vm0 = vweird.f32 %v2501_v41  ;;  %v3631_v22 = vld [vmem:[#allocation8 + $0x270] sm:$0xff] }
 0x3b7   :  { %v935_v54 = vmul.f32 %v2503_v49, %v933_v26  ;;  %vm921_vm2 = vmor %vm919_vm1, %vm920_vm0  ;;  %vm940_vm4 = vweird.f32 %v2503_v49  ;;  %v4359_v26 = vld [vmem:[#allocation34_spill] sm:$0xff] }
 0x3b8   :  { %v916_v62 = vsub.f32 1.0, %v915_v25  ;;  %vm941_vm6 = vmor %vm939_vm5, %vm940_vm4  ;;  %v1270_v25 = vld [vmem:[#allocation5 + $0x2b0] sm:$0xff] }
 0x3b9   :  { %v936_v52 = vsub.f32 1.0, %v935_v54  ;;  %v4360_v54 = vld [vmem:[#allocation23_spill] sm:$0xff] }
 0x3ba   :  { %v917_v53 = vmul.f32 %v2501_v41, %v916_v62  ;;  %v222_v62 = vadd.f32 %v4360_v54, %v4349_v29  ;;  %v1237_v54 = vld [vmem:[#allocation5 + $0x1a8] sm:$0xff] }
 0x3bb   :  { %v937_v61 = vmul.f32 %v2503_v49, %v936_v52  ;;  %v1267_v52 = vld [vmem:[#allocation5 + $0x298] sm:$0xff] }
 0x3bc   :  { %v918_v0 = vadd.f32 %v2501_v41, %v917_v53  ;;  %v3644_v53 = vld [vmem:[#allocation8 + $0x228] sm:$0xff] }
 0x3bd   :  { %v938_v11 = vadd.f32 %v2503_v49, %v937_v61  ;;  %v3646_v61 = vld [vmem:[#allocation8 + $0x210] sm:$0xff] }
 0x3be   :  { %v922_v8 = vsel %vm921_vm2, %v2501_v41, %v918_v0  ;;  %v1260_v0 = vld [vmem:[#allocation5 + $0x260] sm:$0xff] }
 0x3bf   :  { %v927_v34 = vsel %vm924_vm3, %v926_v2, %v922_v8  ;;  %v942_v63 = vsel %vm941_vm6, %v2503_v49, %v938_v11  ;;  %v1269_v49 = vld [vmem:[#allocation5 + $0x2a8] sm:$0xff]  ;;  %v3649_v8 = vld [vmem:[#allocation8 + $0x1f8] sm:$0xff]  ;;  %v1258_v11 = vld [vmem:[#allocation5 + $0x250] sm:$0xff] }
 0x3c0   :  { %v949_v45 = vmul.f32 %v927_v34, %v903_v59  ;;  %v947_v50 = vsel %vm944_vm7, %v946_v42, %v942_v63  ;;  %1330 = vmatpush.msra.mxu0 %v1269_v49  ;;  %v1261_v2 = vld [vmem:[#allocation5 + $0x268] sm:$0xff]  ;;  %v1251_v42 = vld [vmem:[#allocation5 + $0x218] sm:$0xff] }
 0x3c1   :  { %v952_v58 = vsub.f32 1.0, %v947_v50  ;;  %v954_v9 = vmul.f32 %v947_v50, %v3564_v12  ;;  %v1257_v34 = vld [vmem:[#allocation5 + $0x248] sm:$0xff]  ;;  %v1252_v50 = vld [vmem:[#allocation5 + $0x220] sm:$0xff] }
 0x3c2   :  { %v950_v5 = vadd.f32 %v949_v45, %v4358_v51  ;;  %1331 = vmatpush.msra.mxu0 %v1266_v47  ;;  %v3652_v45 = vld [vmem:[#allocation8 + $0x1e0] sm:$0xff]  ;;  %v1254_v51 = vld [vmem:[#allocation5 + $0x230] sm:$0xff]  ;;  %v3659_v63 = vld [vmem:[#allocation8 + $0x1c8] sm:$0xff] }
 0x3c4   :  { %2504 = vtanh.f32 %v950_v5  ;;  %1332 = vmatpush.msra.mxu0 %v1263_v57  ;;  %v1255_v5 = vld [vmem:[#allocation5 + $0x238] sm:$0xff] }
 0x3c6   :  { %1333 = vmatpush.msra.mxu0 %v1260_v0 }
 0x3c8   :  { %1334 = vmatpush.msra.mxu0 %v1257_v34 }
 0x3ca   :  { %v2505_v3 = vpop.eup %2504  ;;  %1335 = vmatpush.msra.mxu0 %v1254_v51 }
 0x3cb   :  { %v953_v7 = vmul.f32 %v2505_v3, %v952_v58  ;;  %v3661_v58 = vld [vmem:[#allocation8 + $0x1b0] sm:$0xff] }
 0x3cc   :  { %1336 = vmatpush.msra.mxu0 %v1251_v42 }
 0x3cd   :  { %v955_v13 = vadd.f32 %v954_v9, %v953_v7  ;;  %v1248_v9 = vld [vmem:[#allocation5 + $0x200] sm:$0xff] }
 0x3ce   :  { %1337 = vmatpush.msra.mxu0 %v1248_v9 }
 0x3cf   :  { %v958_v19 = vsub.f32 %v955_v13, %v3564_v12  ;;  %v3612_v14 = vmul.f32 %v962_v4, %v955_v13  ;;  %v1249_v13 = vld [vmem:[#allocation5 + $0x208] sm:$0xff] }
 0x3d1   :  { %v964_v55 = vmul.f32 %v962_v4, %v958_v19  ;;  %v3665_v19 = vld [vmem:[#allocation8 + $0x198] sm:$0xff]  ;;  %v1245_v4 = vld [vmem:[#allocation5 + $0x1e8] sm:$0xff] }
 0x3d2   :  { %1338 = vmatpush.msra.mxu0 %v1245_v4 }
 0x3d3   :  { %v3595_v18 = vadd.f32 %v964_v55, %v3564_v12  ;;  %v3609_v12 = vmul.f32 %v3560_v40, %v3556_v32  ;;  %v3624_v32 = vld [vmem:[#allocation8 + $0x2a0] sm:$0xff]  ;;  %v1246_v55 = vld [vmem:[#allocation5 + $0x1f0] sm:$0xff] }
 0x3d5   :  { %987 = vmatmul.f32.vlgmr.msra.gmra.mxu1 %v3595_v18  ;;  %1007 = vmatmul.f32.vlgmr.msra.gmra.mxu2 %v3595_v18 }
 0x3d6   :  { %1027 = vmatmul.f32.vlgmr.msrb.gmra.mxu3 %v3595_v18  ;;  %1484 = vmatpush.msra.mxu2 %v3615_v15 }
 0x3d7   :  { %1365 = vmatpush.msra.mxu1 %v1279_v6 }
 0x3d8   :  { %1485 = vmatpush.msra.mxu2 %v3618_v43 }
 0x3d9   :  { %1366 = vmatpush.msra.mxu1 %v1276_v23 }
 0x3da   :  { %1486 = vmatpush.msra.mxu2 %v3621_v46 }
 0x3db   :  { %1367 = vmatpush.msra.mxu1 %v1273_v31 }
 0x3dc   :  { %1487 = vmatpush.msra.mxu2 %v3624_v32 }
 0x3dd   :  { %1368 = vmatpush.msra.mxu1 %v1270_v25 }
 0x3de   :  { %1305 = vmatmul.f32.vlgmr.msra.gmra.mxu3 %v3285_v44  ;;  %1488 = vmatpush.msra.mxu2 %v3627_v16 }
 0x3df   :  { %1369 = vmatpush.msra.mxu1 %v1267_v52  ;;  %v1233_v52 = vld [vmem:[#allocation5 + $0x188] sm:$0xff] }
 0x3e0   :  { %1489 = vmatpush.msra.mxu2 %v3631_v22 }
 0x3e1   :  { %1370 = vmatpush.msra.mxu1 %v1264_v60 }
 0x3e2   :  { %1490 = vmatpush.msra.mxu2 %v3635_v35 }
 0x3e3   :  { %1371 = vmatpush.msra.mxu1 %v1261_v2 }
 0x3e4   :  { %1491 = vmatpush.msra.mxu2 %v3637_v1 }
 0x3e5   :  { %1372 = vmatpush.msra.mxu1 %v1258_v11 }
 0x3e6   :  { %1308 = vmatmul.f32.gmra.mxu3 %v3603_v33  ;;  %1492 = vmatpush.msra.mxu2 %v3644_v53 }
 0x3e7   :  { %1373 = vmatpush.msra.mxu1 %v1255_v5 }
 0x3e8   :  { %1493 = vmatpush.msra.mxu2 %v3646_v61 }
 0x3e9   :  { %1374 = vmatpush.msra.mxu1 %v1252_v50 }
 0x3ea   :  { %1494 = vmatpush.msra.mxu2 %v3649_v8 }
 0x3eb   :  { %1375 = vmatpush.msra.mxu1 %v1249_v13 }
 0x3ec   :  { %1495 = vmatpush.msra.mxu2 %v3652_v45 }
 0x3ed   :  { %1376 = vmatpush.msra.mxu1 %v1246_v55 }
 0x3ee   :  { %1311 = vmatmul.f32.gmra.mxu3 %v3467_v37  ;;  %1496 = vmatpush.msra.mxu2 %v3659_v63 }
 0x3ef   :  { %1377 = vmatpush.msra.mxu1 %v1243_v21 }
 0x3f0   :  { %1497 = vmatpush.msra.mxu2 %v3661_v58 }
 0x3f1   :  { %1378 = vmatpush.msra.mxu1 %v1240_v30  ;;  %v3695_v30 = vld [vmem:[#allocation8 + $0x2c0] sm:$0xff] }
 0x3f2   :  { %1498 = vmatpush.msra.mxu2 %v3665_v19 }
 0x3f3   :  { %1379 = vmatpush.msra.mxu1 %v1237_v54  ;;  %v3732_v54 = vld [vmem:[#allocation8 + $0x218] sm:$0xff] }
 0x3f6   :  { %1314 = vmatmul.f32.gmra.mxu3 %v3609_v12 }
 0x3fe   :  { %1317 = vmatmul.f32.gmra.mxu3 %v3612_v14 }
 0x452   :  { %v988_v40 = vpop.f32.mrf.mxu1 }
 0x453   :  { %v989_v17 = vadd.f32 %v988_v40, %v4347_v38  ;;  %v3667_v40 = vld [vmem:[#allocation8 + $0x180] sm:$0xff] }
 0x454   :  { %1499 = vmatpush.msra.mxu2 %v3667_v40 }
 0x455   :  { %v1035_v27 = vadd.f32 %v989_v17, %v4359_v26  ;;  %v1242_v17 = vld [vmem:[#allocation5 + $0x1d0] sm:$0xff] }
 0x456   :  { %1339 = vmatpush.msra.mxu0 %v1242_v17 }
 0x457   :  { %v2413_v41 = vmul.f32 -1.442695, %v1035_v27  ;;  %v1239_v27 = vld [vmem:[#allocation5 + $0x1b8] sm:$0xff] }
 0x458   :  { %v1008_v28 = vpop.f32.mrf.mxu2  ;;  %1340 = vmatpush.msra.mxu0 %v1239_v27  ;;  %v3690_v27 = vld [vmem:[#allocation8 + $0x2d8] sm:$0xff] }
 0x459   :  { %2506 = vpow2.f32 %v2413_v41  ;;  %v1009_v48 = vadd.f32 %v1008_v28, %v4350_v39  ;;  %v1028_v25 = vpop.f32.mrf.mxu3  ;;  %v1236_v28 = vld [vmem:[#allocation5 + $0x1a0] sm:$0xff] }
 0x45a   :  { %1341 = vmatpush.msra.mxu0 %v1236_v28  ;;  %v1029_v60 = vadd.f32 %v1028_v25, %v3272_v20  ;;  %v3716_v25 = vld [vmem:[#allocation8 + $0x260] sm:$0xff]  ;;  %v3721_v28 = vld [vmem:[#allocation8 + $0x248] sm:$0xff] }
 0x45b   :  { %v1055_v56 = vadd.f32 %v1009_v48, %v222_v62 }
 0x45c   :  { %1342 = vmatpush.msra.mxu0 %v1233_v52  ;;  %v3758_v52 = vld [vmem:[#allocation8 + $0x1a0] sm:$0xff] }
 0x45d   :  { %v2414_v59 = vmul.f32 -1.442695, %v1055_v56  ;;  %v1234_v56 = vld [vmem:[#allocation5 + $0x190] sm:$0xff] }
 0x45e   :  { %1380 = vmatpush.msra.mxu1 %v1234_v56  ;;  %v3763_v56 = vld [vmem:[#allocation8 + $0x188] sm:$0xff] }
 0x45f   :  { %v2507_v36 = vpop.eup %2506  ;;  %2508 = vpow2.f32 %v2414_v59 }
 0x460   :  { %v3654_v10 = vadd.f32 1.0, %v2507_v36 }
 0x462   :  { %2510 = vrcp.f32 %v3654_v10  ;;  %v1051_v26 = vand.u32 2147483648, %v3654_v10  ;;  %v1049_v41 = vand.u32 2147483647, %v3654_v10  ;;  %vm1045_vm9 = vweird.f32 %v3654_v10 }
 0x464   :  { %v1052_v47 = vor.u32 1.1754944e-38, %v1051_v26  ;;  %vm1050_vm11 = vcmp.eq.f32.partialorder %v1049_v41, 8.507059e+37  ;;  %v3685_v26 = vld [vmem:[#allocation8 + $0x2f0] sm:$0xff]  ;;  %v4362_v41 = vmov 0.0  }
 0x465   :  { %v2509_v3 = vpop.eup %2508 }
 0x466   :  { %v1059_v7 = vadd.f32 1.0, %v2509_v3 }
 0x468   :  { %v2511_v24 = vpop.eup %2510  ;;  %2512 = vrcp.f32 %v1059_v7  ;;  %v1071_v11 = vand.u32 2147483648, %v1059_v7  ;;  %v1069_v36 = vand.u32 2147483647, %v1059_v7  ;;  %vm1065_vm13 = vweird.f32 %v1059_v7 }
 0x469   :  { %v1041_v6 = vmul.f32 %v2511_v24, %v3654_v10  ;;  %vm1046_vm8 = vweird.f32 %v2511_v24  ;;  %v4361_v10 = vld [vmem:[#allocation39_spill] sm:$0xff] }
 0x46a   :  { %vm1047_vm10 = vmor %vm1045_vm9, %vm1046_vm8  ;;  %v1072_v50 = vor.u32 1.1754944e-38, %v1071_v11  ;;  %vm1070_vm15 = vcmp.eq.f32.partialorder %v1069_v36, 8.507059e+37  ;;  %v3816_v11 = vld [vmem:[#allocation8 + $0x2b0] sm:$0xff]  ;;  %v4364_v36 = vld [vmem:[#allocation36_spill] sm:$0xff] }
 0x46b   :  { %v1042_v23 = vsub.f32 1.0, %v1041_v6  ;;  %v1088_v6 = vpop.permute.xlu2 %1087 }
 0x46d   :  { %v1043_v31 = vmul.f32 %v2511_v24, %v1042_v23 }
 0x46e   :  { %v2513_v49 = vpop.eup %2512 }
 0x46f   :  { %v1061_v62 = vmul.f32 %v2513_v49, %v1059_v7  ;;  %v1044_v48 = vadd.f32 %v2511_v24, %v1043_v31  ;;  %vm1066_vm12 = vweird.f32 %v2513_v49  ;;  %v3705_v31 = vld [vmem:[#allocation8 + $0x290] sm:$0xff] }
 0x470   :  { %vm1067_vm14 = vmor %vm1065_vm13, %vm1066_vm12 }
 0x471   :  { %v1062_v57 = vsub.f32 1.0, %v1061_v62  ;;  %v1048_v0 = vsel %vm1047_vm10, %v2511_v24, %v1044_v48  ;;  %v3737_v62 = vld [vmem:[#allocation8 + $0x200] sm:$0xff]  ;;  %v3742_v48 = vld [vmem:[#allocation8 + $0x1e8] sm:$0xff] }
 0x472   :  { %v1053_v2 = vsel %vm1050_vm11, %v1052_v47, %v1048_v0  ;;  %v3753_v47 = vld [vmem:[#allocation8 + $0x1b8] sm:$0xff]  ;;  %v4363_v0 = vld [vmem:[#allocation18_spill] sm:$0xff] }
 0x473   :  { %v1075_v59 = vmul.f32 %v1053_v2, %v1029_v60  ;;  %v1063_v34 = vmul.f32 %v2513_v49, %v1062_v57  ;;  %v3807_v60 = vld [vmem:[#allocation8 + $0x2c8] sm:$0xff]  ;;  %v225_v2 = vadd.f32 %v4363_v0, %v4349_v29  ;;  %v3822_v29 = vld [vmem:[#allocation8 + $0x298] sm:$0xff] }
 0x475   :  { %v1076_v51 = vadd.f32 %v1075_v59, %v4361_v10  ;;  %v1064_v5 = vadd.f32 %v2513_v49, %v1063_v34 }
 0x477   :  { %2514 = vtanh.f32 %v1076_v51  ;;  %v1068_v42 = vsel %vm1067_vm14, %v2513_v49, %v1064_v5  ;;  %v3712_v49 = vld [vmem:[#allocation8 + $0x278] sm:$0xff]  ;;  %v3826_v5 = vld [vmem:[#allocation8 + $0x280] sm:$0xff] }
 0x478   :  { %v1073_v3 = vsel %vm1070_vm15, %v1072_v50, %v1068_v42  ;;  %v3829_v42 = vld [vmem:[#allocation8 + $0x268] sm:$0xff]  ;;  %v3834_v50 = vld [vmem:[#allocation8 + $0x250] sm:$0xff] }
 0x479   :  { %v1078_v9 = vsub.f32 1.0, %v1073_v3  ;;  %v1080_v55 = vmul.f32 %v1073_v3, %v3595_v18  ;;  %v3839_v3 = vld [vmem:[#allocation8 + $0x238] sm:$0xff] }
 0x47d   :  { %v2515_v13 = vpop.eup %2514 }
 0x47e   :  { %v1079_v4 = vmul.f32 %v2515_v13, %v1078_v9  ;;  %v3844_v9 = vld [vmem:[#allocation8 + $0x220] sm:$0xff] }
 0x480   :  { %v1081_v24 = vadd.f32 %v1080_v55, %v1079_v4 }
 0x482   :  { %v1084_v17 = vsub.f32 %v1081_v24, %v3595_v18  ;;  %v3679_v21 = vmul.f32 %v1088_v6, %v1081_v24 }
 0x484   :  { %v1090_v23 = vmul.f32 %v1088_v6, %v1084_v17  ;;  %1320 = vmatmul.f32.gmra.mxu3 %v3679_v21  ;;  %v3854_v6 = vld [vmem:[#allocation8 + $0x208] sm:$0xff]  ;;  %v3860_v17 = vld [vmem:[#allocation8 + $0x1f0] sm:$0xff] }
 0x485   :  { %4365 = vst [vmem:[#allocation25_spill] sm:$0xff] %v3860_v17 }
 0x486   :  { %v3683_v7 = vadd.f32 %v1090_v23, %v3595_v18  ;;  %v3700_v18 = vld [vmem:[#allocation8 + $0x2a8] sm:$0xff] }
 0x488   :  { %1113 = vmatmul.f32.vlgmr.msrb.gmra.mxu0 %v3683_v7  ;;  %1133 = vmatmul.f32.vlgmr.msrb.gmra.mxu1 %v3683_v7 }
 0x489   :  { %1153 = vmatmul.f32.vlgmr.msrb.gmra.mxu2 %v3683_v7  ;;  %1607 = vmatpush.msrb.mxu0 %v3615_v15 }
 0x48a   :  { %1504 = vmatpush.msrb.mxu2 %v3685_v26  ;;  %1627 = vmatpush.msrb.mxu1 %v3685_v26 }
 0x48b   :  { %1608 = vmatpush.msrb.mxu0 %v3618_v43 }
 0x48c   :  { %1505 = vmatpush.msrb.mxu2 %v3690_v27  ;;  %1628 = vmatpush.msrb.mxu1 %v3690_v27 }
 0x48d   :  { %1609 = vmatpush.msrb.mxu0 %v3621_v46 }
 0x48e   :  { %1506 = vmatpush.msrb.mxu2 %v3695_v30  ;;  %1629 = vmatpush.msrb.mxu1 %v3695_v30 }
 0x48f   :  { %1610 = vmatpush.msrb.mxu0 %v3624_v32 }
 0x490   :  { %1507 = vmatpush.msrb.mxu2 %v3700_v18  ;;  %1343 = vmatmul.f32.vlgmr.msra.gmra.mxu0 %v3285_v44 }
 0x491   :  { %1381 = vmatmul.f32.vlgmr.msra.gmra.mxu1 %v3285_v44  ;;  %1500 = vmatmul.f32.vlgmr.msra.gmra.mxu2 %v4362_v41  ;;  %v3726_v44 = vld [vmem:[#allocation8 + $0x230] sm:$0xff] }
 0x492   :  { %1508 = vmatpush.msrb.mxu2 %v3705_v31  ;;  %1611 = vmatpush.msrb.mxu0 %v3627_v16 }
 0x493   :  { %1630 = vmatpush.msrb.mxu1 %v3700_v18 }
 0x494   :  { %1509 = vmatpush.msrb.mxu2 %v3712_v49  ;;  %1612 = vmatpush.msrb.mxu0 %v3631_v22 }
 0x495   :  { %1631 = vmatpush.msrb.mxu1 %v3705_v31 }
 0x496   :  { %1510 = vmatpush.msrb.mxu2 %v3716_v25  ;;  %1613 = vmatpush.msrb.mxu0 %v3635_v35 }
 0x497   :  { %1632 = vmatpush.msrb.mxu1 %v3712_v49 }
 0x498   :  { %1511 = vmatpush.msrb.mxu2 %v3721_v28  ;;  %1346 = vmatmul.f32.gmra.mxu0 %v3603_v33 }
 0x499   :  { %1384 = vmatmul.f32.gmra.mxu1 %v3603_v33  ;;  %1614 = vmatpush.msrb.mxu0 %v3637_v1  ;;  %v3747_v33 = vld [vmem:[#allocation8 + $0x1d0] sm:$0xff] }
 0x49a   :  { %1512 = vmatpush.msrb.mxu2 %v3726_v44  ;;  %1633 = vmatpush.msrb.mxu1 %v3716_v25 }
 0x49b   :  { %1615 = vmatpush.msrb.mxu0 %v3644_v53 }
 0x49c   :  { %1513 = vmatpush.msrb.mxu2 %v3732_v54  ;;  %1634 = vmatpush.msrb.mxu1 %v3721_v28 }
 0x49d   :  { %1616 = vmatpush.msrb.mxu0 %v3646_v61 }
 0x49e   :  { %1514 = vmatpush.msrb.mxu2 %v3737_v62  ;;  %1635 = vmatpush.msrb.mxu1 %v3726_v44 }
 0x49f   :  { %1617 = vmatpush.msrb.mxu0 %v3649_v8 }
 0x4a0   :  { %1515 = vmatpush.msrb.mxu2 %v3742_v48  ;;  %1349 = vmatmul.f32.gmra.mxu0 %v3467_v37 }
 0x4a1   :  { %1387 = vmatmul.f32.gmra.mxu1 %v3467_v37  ;;  %1618 = vmatpush.msrb.mxu0 %v3652_v45  ;;  %v3798_v37 = vld [vmem:[#allocation8 + $0x2f8] sm:$0xff] }
 0x4a2   :  { %1516 = vmatpush.msrb.mxu2 %v3747_v33  ;;  %1636 = vmatpush.msrb.mxu1 %v3732_v54 }
 0x4a3   :  { %1619 = vmatpush.msrb.mxu0 %v3659_v63  ;;  %1524 = vmatpush.msrb.mxu3 %v3798_v37 }
 0x4a4   :  { %1517 = vmatpush.msrb.mxu2 %v3753_v47  ;;  %1637 = vmatpush.msrb.mxu1 %v3737_v62 }
 0x4a5   :  { %1620 = vmatpush.msrb.mxu0 %v3661_v58 }
 0x4a6   :  { %1518 = vmatpush.msrb.mxu2 %v3758_v52  ;;  %1638 = vmatpush.msrb.mxu1 %v3742_v48 }
 0x4a7   :  { %1621 = vmatpush.msrb.mxu0 %v3665_v19 }
 0x4a8   :  { %1519 = vmatpush.msrb.mxu2 %v3763_v56  ;;  %1352 = vmatmul.f32.gmra.mxu0 %v3609_v12 }
 0x4a9   :  { %1520 = vmatmul.f32.vlgmr.msrb.gmra.mxu2 %v4362_v41  ;;  %1390 = vmatmul.f32.gmra.mxu1 %v3609_v12  ;;  %v3803_v12 = vld [vmem:[#allocation8 + $0x2e0] sm:$0xff] }
 0x4aa   :  { %1639 = vmatpush.msrb.mxu1 %v3747_v33  ;;  %1622 = vmatpush.msrb.mxu0 %v3667_v40 }
 0x4ab   :  { %1647 = vmatpush.msra.mxu2 %v3798_v37  ;;  %1525 = vmatpush.msrb.mxu3 %v3803_v12 }
 0x4ac   :  { %1750 = vmatpush.msra.mxu0 %v3685_v26  ;;  %1640 = vmatpush.msrb.mxu1 %v3753_v47 }
 0x4ad   :  { %1648 = vmatpush.msra.mxu2 %v3803_v12  ;;  %1526 = vmatpush.msrb.mxu3 %v3807_v60 }
 0x4ae   :  { %1751 = vmatpush.msra.mxu0 %v3690_v27  ;;  %1641 = vmatpush.msrb.mxu1 %v3758_v52 }
 0x4af   :  { %1649 = vmatpush.msra.mxu2 %v3807_v60  ;;  %1527 = vmatpush.msrb.mxu3 %v3816_v11 }
 0x4b0   :  { %1752 = vmatpush.msra.mxu0 %v3695_v30  ;;  %1642 = vmatpush.msrb.mxu1 %v3763_v56 }
 0x4b1   :  { %1355 = vmatmul.f32.gmra.mxu0 %v3612_v14  ;;  %1393 = vmatmul.f32.gmra.mxu1 %v3612_v14 }
 0x4b2   :  { %1753 = vmatpush.msra.mxu0 %v3700_v18  ;;  %1770 = vmatpush.msra.mxu1 %v3798_v37 }
 0x4b3   :  { %1650 = vmatpush.msra.mxu2 %v3816_v11  ;;  %1528 = vmatpush.msrb.mxu3 %v3822_v29 }
 0x4b4   :  { %1754 = vmatpush.msra.mxu0 %v3705_v31  ;;  %1771 = vmatpush.msra.mxu1 %v3803_v12 }
 0x4b5   :  { %1651 = vmatpush.msra.mxu2 %v3822_v29  ;;  %1529 = vmatpush.msrb.mxu3 %v3826_v5 }
 0x4b6   :  { %1755 = vmatpush.msra.mxu0 %v3712_v49  ;;  %1772 = vmatpush.msra.mxu1 %v3807_v60 }
 0x4b7   :  { %1652 = vmatpush.msra.mxu2 %v3826_v5  ;;  %1530 = vmatpush.msrb.mxu3 %v3829_v42 }
 0x4b8   :  { %1756 = vmatpush.msra.mxu0 %v3716_v25  ;;  %1773 = vmatpush.msra.mxu1 %v3816_v11 }
 0x4b9   :  { %1358 = vmatmul.f32.gmra.mxu0 %v3679_v21  ;;  %1396 = vmatmul.f32.gmra.mxu1 %v3679_v21  ;;  %v3865_v21 = vld [vmem:[#allocation8 + $0x1d8] sm:$0xff] }
 0x4ba   :  { %1757 = vmatpush.msra.mxu0 %v3721_v28  ;;  %1774 = vmatpush.msra.mxu1 %v3822_v29  ;;  %4366 = vst [vmem:[#allocation19_spill] sm:$0xff] %v3865_v21 }
 0x4bb   :  { %1653 = vmatpush.msra.mxu2 %v3829_v42  ;;  %1531 = vmatpush.msrb.mxu3 %v3834_v50 }
 0x4bc   :  { %1758 = vmatpush.msra.mxu0 %v3726_v44  ;;  %1775 = vmatpush.msra.mxu1 %v3826_v5 }
 0x4bd   :  { %1654 = vmatpush.msra.mxu2 %v3834_v50  ;;  %1532 = vmatpush.msrb.mxu3 %v3839_v3 }
 0x4be   :  { %1759 = vmatpush.msra.mxu0 %v3732_v54  ;;  %1776 = vmatpush.msra.mxu1 %v3829_v42 }
 0x4bf   :  { %1655 = vmatpush.msra.mxu2 %v3839_v3  ;;  %1533 = vmatpush.msrb.mxu3 %v3844_v9 }
 0x4c0   :  { %1760 = vmatpush.msra.mxu0 %v3737_v62  ;;  %1777 = vmatpush.msra.mxu1 %v3834_v50 }
 0x4c1   :  { %1656 = vmatpush.msra.mxu2 %v3844_v9  ;;  %1534 = vmatpush.msrb.mxu3 %v3854_v6 }
 0x4c2   :  { %1761 = vmatpush.msra.mxu0 %v3742_v48  ;;  %1778 = vmatpush.msra.mxu1 %v3839_v3 }
 0x4c3   :  { %1657 = vmatpush.msra.mxu2 %v3854_v6  ;;  %1535 = vmatpush.msrb.mxu3 %v3860_v17 }
 0x4c4   :  { %1762 = vmatpush.msra.mxu0 %v3747_v33  ;;  %1779 = vmatpush.msra.mxu1 %v3844_v9 }
 0x4c5   :  { %1658 = vmatpush.msra.mxu2 %v3860_v17  ;;  %1536 = vmatpush.msrb.mxu3 %v3865_v21 }
 0x4c6   :  { %1763 = vmatpush.msra.mxu0 %v3753_v47  ;;  %1780 = vmatpush.msra.mxu1 %v3854_v6 }
 0x4c7   :  { %1659 = vmatpush.msra.mxu2 %v3865_v21 }
 0x4c8   :  { %1764 = vmatpush.msra.mxu0 %v3758_v52  ;;  %1781 = vmatpush.msra.mxu1 %v3860_v17 }
 0x4ca   :  { %1765 = vmatpush.msra.mxu0 %v3763_v56  ;;  %1782 = vmatpush.msra.mxu1 %v3865_v21 }
 0x505   :  { %v1114_v14 = vpop.f32.mrf.mxu0  ;;  %v1134_v57 = vpop.f32.mrf.mxu1 }
 0x506   :  { %v1115_v59 = vadd.f32 %v1114_v14, %v4347_v38  ;;  %v1135_v34 = vadd.f32 %v1134_v57, %v4350_v39  ;;  %v3870_v14 = vld [vmem:[#allocation8 + $0x1c0] sm:$0xff] }
 0x507   :  { %4367 = vst [vmem:[#allocation24_spill] sm:$0xff] %v3870_v14  ;;  %1537 = vmatpush.msrb.mxu3 %v3870_v14  ;;  %1660 = vmatpush.msra.mxu2 %v3870_v14 }
 0x508   :  { %v1161_v10 = vadd.f32 %v1115_v59, %v4364_v36  ;;  %v1181_v51 = vadd.f32 %v1135_v34, %v225_v2  ;;  %1783 = vmatpush.msra.mxu1 %v3870_v14  ;;  %v3877_v34 = vld [vmem:[#allocation8 + $0x1a8] sm:$0xff] }
 0x509   :  { %4368 = vst [vmem:[#allocation27_spill] sm:$0xff] %v3877_v34  ;;  %1538 = vmatpush.msrb.mxu3 %v3877_v34  ;;  %1661 = vmatpush.msra.mxu2 %v3877_v34 }
 0x50a   :  { %v2416_v38 = vmul.f32 -1.442695, %v1161_v10  ;;  %v2417_v39 = vmul.f32 -1.442695, %v1181_v51  ;;  %1784 = vmatpush.msra.mxu1 %v3877_v34 }
 0x50c   :  { %2516 = vpow2.f32 %v2416_v38 }
 0x50d   :  { %2518 = vpow2.f32 %v2417_v39  ;;  %v3881_v39 = vld [vmem:[#allocation8 + $0x190] sm:$0xff] }
 0x50e   :  { %4369 = vst [vmem:[#allocation28_spill] sm:$0xff] %v3881_v39  ;;  %1539 = vmatpush.msrb.mxu3 %v3881_v39  ;;  %1662 = vmatpush.msra.mxu2 %v3881_v39 }
 0x50f   :  { %1785 = vmatpush.msra.mxu1 %v3881_v39 }
 0x510   :  { %1730 = vmatpush.msra.mxu3 %v3615_v15  ;;  %1853 = vmatpush.msrb.mxu2 %v3615_v15 }
 0x512   :  { %v2517_v13 = vpop.eup %2516  ;;  %1731 = vmatpush.msra.mxu3 %v3618_v43  ;;  %1854 = vmatpush.msrb.mxu2 %v3618_v43 }
 0x513   :  { %v2519_v4 = vpop.eup %2518  ;;  %v1165_v55 = vadd.f32 1.0, %v2517_v13  ;;  %v1154_v13 = vpop.f32.mrf.mxu2 }
 0x514   :  { %v3850_v24 = vadd.f32 1.0, %v2519_v4  ;;  %1732 = vmatpush.msra.mxu3 %v3621_v46  ;;  %1855 = vmatpush.msrb.mxu2 %v3621_v46 }
 0x515   :  { %2520 = vrcp.f32 %v1165_v55  ;;  %v1177_v10 = vand.u32 2147483648, %v1165_v55  ;;  %v1175_v38 = vand.u32 2147483647, %v1165_v55  ;;  %vm1171_vm1 = vweird.f32 %v1165_v55 }
 0x516   :  { %2522 = vrcp.f32 %v3850_v24  ;;  %v1197_v39 = vand.u32 2147483648, %v3850_v24  ;;  %vm1191_vm5 = vweird.f32 %v3850_v24  ;;  %1733 = vmatpush.msra.mxu3 %v3624_v32  ;;  %1856 = vmatpush.msrb.mxu2 %v3624_v32 }
 0x517   :  { %vm1176_vm3 = vcmp.eq.f32.partialorder %v1175_v38, 8.507059e+37 }
 0x518   :  { %v1198_v43 = vor.u32 1.1754944e-38, %v1197_v39  ;;  %1734 = vmatpush.msra.mxu3 %v3627_v16  ;;  %1857 = vmatpush.msrb.mxu2 %v3627_v16  ;;  %v2419_v39 = vld [vmem:[%s4269_s4 + $0x3] sm:$0x7]  ;;  %s2831_s4 = smov [#allocation11]  }
 0x519   :  { %s2365_s25 = sshll.u32 %s2831_s4, 4  ;;  %s2366_s25 = int_to_ptr.vmem [resolvable:$true] %s2365_s25 }
 0x51a   :  { %1735 = vmatpush.msra.mxu3 %v3631_v22  ;;  %1858 = vmatpush.msrb.mxu2 %v3631_v22 }
 0x51b   :  { %v2521_v23 = vpop.eup %2520 }
 0x51c   :  { %v2523_v57 = vpop.eup %2522  ;;  %v1167_v0 = vmul.f32 %v2521_v23, %v1165_v55  ;;  %vm1172_vm0 = vweird.f32 %v2521_v23  ;;  %v4370_v55 = vld [vmem:[#allocation35_spill] sm:$0xff]  ;;  %1736 = vmatpush.msra.mxu3 %v3635_v35  ;;  %1859 = vmatpush.msrb.mxu2 %v3635_v35 }
 0x51d   :  { %v1187_v2 = vmul.f32 %v2523_v57, %v3850_v24  ;;  %vm1173_vm2 = vmor %vm1171_vm1, %vm1172_vm0  ;;  %vm1192_vm4 = vweird.f32 %v2523_v57 }
 0x51e   :  { %v1168_v59 = vsub.f32 1.0, %v1167_v0  ;;  %vm1193_vm6 = vmor %vm1191_vm5, %vm1192_vm4  ;;  %1737 = vmatpush.msra.mxu3 %v3637_v1  ;;  %1860 = vmatpush.msrb.mxu2 %v3637_v1 }
 0x51f   :  { %v1188_v36 = vsub.f32 1.0, %v1187_v2  ;;  %v1178_v2 = vor.u32 1.1754944e-38, %v1177_v10 }
 0x520   :  { %v1169_v51 = vmul.f32 %v2521_v23, %v1168_v59  ;;  %v1155_v59 = vadd.f32 %v1154_v13, %v3272_v20  ;;  %v1195_v20 = vand.u32 2147483647, %v3850_v24  ;;  %1738 = vmatpush.msra.mxu3 %v3644_v53  ;;  %1861 = vmatpush.msrb.mxu2 %v3644_v53 }
 0x521   :  { %v1189_v4 = vmul.f32 %v2523_v57, %v1188_v36 }
 0x522   :  { %v1170_v0 = vadd.f32 %v2521_v23, %v1169_v51  ;;  %v4371_v51 = vld [vmem:[#allocation22_spill] sm:$0xff]  ;;  %vm1196_vm7 = vcmp.eq.f32.partialorder %v1195_v20, 8.507059e+37  ;;  %1739 = vmatpush.msra.mxu3 %v3646_v61  ;;  %1862 = vmatpush.msrb.mxu2 %v3646_v61 }
 0x523   :  { %v1190_v34 = vadd.f32 %v2523_v57, %v1189_v4  ;;  %v263_v21 = vadd.f32 %v4371_v51, %v4370_v55  ;;  %v1501_v4 = vpop.f32.mrf.mxu2 }
 0x524   :  { %v1174_v14 = vsel %vm1173_vm2, %v2521_v23, %v1170_v0  ;;  %1740 = vmatpush.msra.mxu3 %v3649_v8  ;;  %1863 = vmatpush.msrb.mxu2 %v3649_v8 }
 0x525   :  { %v1179_v36 = vsel %vm1176_vm3, %v1178_v2, %v1174_v14  ;;  %v1194_v23 = vsel %vm1193_vm6, %v2523_v57, %v1190_v34  ;;  %v3952_v2 = vperm.slane %v2419_v39, 0 }
 0x526   :  { %v1201_v17 = vmul.f32 %v1179_v36, %v1155_v59  ;;  %v1199_v14 = vsel %vm1196_vm7, %v1198_v43, %v1194_v23  ;;  %1741 = vmatpush.msra.mxu3 %v3652_v45  ;;  %1864 = vmatpush.msrb.mxu2 %v3652_v45  ;;  %v1344_v23 = vpop.f32.mrf.mxu0 }
 0x527   :  { %v1204_v46 = vsub.f32 1.0, %v1199_v14  ;;  %4373 = vst [vmem:[#allocation33_spill] sm:$0xff] %v3952_v2 }
 0x528   :  { %v1202_v15 = vadd.f32 %v1201_v17, %v263_v21  ;;  %v1206_v17 = vmul.f32 %v1199_v14, %v3683_v7  ;;  %v1214_v21 = vpop.permute.xlu0 %1213  ;;  %1742 = vmatpush.msra.mxu3 %v3659_v63  ;;  %1865 = vmatpush.msrb.mxu2 %v3659_v63 }
 0x52a   :  { %2524 = vtanh.f32 %v1202_v15  ;;  %1743 = vmatpush.msra.mxu3 %v3661_v58  ;;  %1866 = vmatpush.msrb.mxu2 %v3661_v58  ;;  %v3958_v15 = vperm.slane %v2419_v39, 1 }
 0x52c   :  { %1744 = vmatpush.msra.mxu3 %v3665_v19  ;;  %1867 = vmatpush.msrb.mxu2 %v3665_v19  ;;  %v1521_v20 = vpop.f32.mrf.mxu2 }
 0x52e   :  { %1745 = vmatpush.msra.mxu3 %v3667_v40  ;;  %1868 = vmatpush.msrb.mxu2 %v3667_v40 }
 0x530   :  { %v2525_v24 = vpop.eup %2524 }
 0x531   :  { %v1205_v32 = vmul.f32 %v2525_v24, %v1204_v46  ;;  %v1345_v24 = vadd.f32 %v1344_v23, %v3958_v15 }
 0x533   :  { %v1207_v16 = vadd.f32 %v1206_v17, %v1205_v32 }
 0x535   :  { %v1210_v57 = vsub.f32 %v1207_v16, %v3683_v7  ;;  %v1219_v34 = vmul.f32 %v1214_v21, %v1207_v16 }
 0x537   :  { %v1216_v10 = vmul.f32 %v1214_v21, %v1210_v57  ;;  %1323 = vmatmul.f32.gmra.mxu3 %v1219_v34  ;;  %1361 = vmatmul.f32.gmra.mxu0 %v1219_v34 }
 0x538   :  { %1399 = vmatmul.f32.gmra.mxu1 %v1219_v34 }
 0x539   :  { %v1217_v38 = vadd.f32 %v1216_v10, %v3683_v7  ;;  %v1306_v7 = vpop.f32.mrf.mxu3 }
 0x53a   :  { %v1307_v36 = vadd.f32 %v1306_v7, %v3952_v2 }
 0x53b   :  { %1223 = vst [vmem:[#allocation12] sm:$0xff] %v1217_v38 }
 0x53f   :  { %1540 = vmatmul.f32.vlgmr.msrb.gmra.mxu3 %v4362_v41  ;;  %v1475_v41 = vld [vmem:[#allocation10 + $0x3] sm:$0x7] }
 0x540   :  { %1873 = vmatpush.msrb.mxu3 %v3685_v26  ;;  %v3948_v13 = vperm.slane %v1475_v41, 0  ;;  %v3956_v55 = vperm.slane %v1475_v41, 1 }
 0x541   :  { %v3950_v0 = vpop.f32.mrf.mxu3 }
 0x542   :  { %1874 = vmatpush.msrb.mxu3 %v3690_v27  ;;  %4372 = vst [vmem:[#allocation32_spill] sm:$0xff] %v3948_v13  ;;  %v1502_v59 = vadd.f32 %v1501_v4, %v3948_v13  ;;  %v1522_v14 = vadd.f32 %v1521_v20, %v3956_v55 }
 0x543   :  { %4374 = vst [vmem:[#allocation20_spill] sm:$0xff] %v3956_v55 }
 0x544   :  { %1875 = vmatpush.msrb.mxu3 %v3695_v30  ;;  %v1547_v51 = vadd.f32 %v1502_v59, %v1307_v36  ;;  %v1567_v32 = vadd.f32 %v1522_v14, %v1345_v24 }
 0x546   :  { %1876 = vmatpush.msrb.mxu3 %v3700_v18  ;;  %v2420_v46 = vmul.f32 -1.442695, %v1547_v51  ;;  %v2421_v17 = vmul.f32 -1.442695, %v1567_v32 }
 0x548   :  { %1877 = vmatpush.msrb.mxu3 %v3705_v31  ;;  %2526 = vpow2.f32 %v2420_v46 }
 0x549   :  { %v3960_v43 = vpop.f32.mrf.mxu3  ;;  %2528 = vpow2.f32 %v2421_v17  ;;  %v3972_v17 = vperm.slane %v1475_v41, 2 }
 0x54a   :  { %1878 = vmatpush.msrb.mxu3 %v3712_v49  ;;  %4375 = vst [vmem:[#allocation37_spill] sm:$0xff] %v3960_v43 }
 0x54b   :  { %4380 = vst [vmem:[#allocation31_spill] sm:$0xff] %v3972_v17 }
 0x54c   :  { %1879 = vmatpush.msrb.mxu3 %v3716_v25 }
 0x54e   :  { %1880 = vmatpush.msrb.mxu3 %v3721_v28  ;;  %v2527_v21 = vpop.eup %2526 }
 0x54f   :  { %v1551_v57 = vadd.f32 1.0, %v2527_v21  ;;  %v2529_v34 = vpop.eup %2528 }
 0x550   :  { %1881 = vmatpush.msrb.mxu3 %v3726_v44  ;;  %v1571_v38 = vadd.f32 1.0, %v2529_v34 }
 0x551   :  { %v3964_v16 = vpop.f32.mrf.mxu3  ;;  %2530 = vrcp.f32 %v1551_v57  ;;  %v1563_v32 = vand.u32 2147483648, %v1551_v57  ;;  %vm1557_vm9 = vweird.f32 %v1551_v57  ;;  %v1561_v21 = vand.u32 2147483647, %v1551_v57 }
 0x552   :  { %1882 = vmatpush.msrb.mxu3 %v3732_v54  ;;  %4376 = vst [vmem:[#allocation26_spill] sm:$0xff] %v3964_v16  ;;  %2532 = vrcp.f32 %v1571_v38  ;;  %v1583_v41 = vand.u32 2147483648, %v1571_v38  ;;  %vm1577_vm13 = vweird.f32 %v1571_v38 }
 0x553   :  { %vm1562_vm11 = vcmp.eq.f32.partialorder %v1561_v21, 8.507059e+37 }
 0x554   :  { %1883 = vmatpush.msrb.mxu3 %v3737_v62  ;;  %v1584_v13 = vor.u32 1.1754944e-38, %v1583_v41 }
 0x556   :  { %1884 = vmatpush.msrb.mxu3 %v3742_v48 }
 0x557   :  { %v2531_v7 = vpop.eup %2530 }
 0x558   :  { %1885 = vmatpush.msrb.mxu3 %v3747_v33  ;;  %v1553_v4 = vmul.f32 %v2531_v7, %v1551_v57  ;;  %v2533_v36 = vpop.eup %2532  ;;  %vm1558_vm8 = vweird.f32 %v2531_v7  ;;  %v1581_v57 = vand.u32 2147483647, %v1571_v38 }
 0x559   :  { %v3966_v10 = vpop.f32.mrf.mxu3  ;;  %v1573_v20 = vmul.f32 %v2533_v36, %v1571_v38  ;;  %vm1559_vm10 = vmor %vm1557_vm9, %vm1558_vm8  ;;  %vm1578_vm12 = vweird.f32 %v2533_v36  ;;  %v3995_v38 = vld [vmem:[#allocation8 + $0x2b8] sm:$0xff] }
 0x55a   :  { %1886 = vmatpush.msrb.mxu3 %v3753_v47  ;;  %4377 = vst [vmem:[#allocation29_spill] sm:$0xff] %v3966_v10  ;;  %v1554_v51 = vsub.f32 1.0, %v1553_v4  ;;  %v3974_v10 = vperm.slane %v2419_v39, 2  ;;  %v1564_v4 = vor.u32 1.1754944e-38, %v1563_v32  ;;  %vm1579_vm14 = vmor %vm1577_vm13, %vm1578_vm12  ;;  %vm1582_vm15 = vcmp.eq.f32.partialorder %v1581_v57, 8.507059e+37 }
 0x55b   :  { %v1574_v46 = vsub.f32 1.0, %v1573_v20 }
 0x55c   :  { %1887 = vmatpush.msrb.mxu3 %v3758_v52  ;;  %v1555_v23 = vmul.f32 %v2531_v7, %v1554_v51 }
 0x55d   :  { %v1575_v34 = vmul.f32 %v2533_v36, %v1574_v46 }
 0x55e   :  { %1888 = vmatpush.msrb.mxu3 %v3763_v56  ;;  %v1556_v24 = vadd.f32 %v2531_v7, %v1555_v23 }
 0x55f   :  { %v1576_v23 = vadd.f32 %v2533_v36, %v1575_v34 }
 0x560   :  { %v1560_v16 = vsel %vm1559_vm10, %v2531_v7, %v1556_v24 }
 0x561   :  { %v3968_v59 = vpop.f32.mrf.mxu3  ;;  %v1565_v20 = vsel %vm1562_vm11, %v1564_v4, %v1560_v16  ;;  %v1580_v39 = vsel %vm1579_vm14, %v2533_v36, %v1576_v23  ;;  %v1599_v16 = vpop.permute.xlu1 %1598  ;;  %v4005_v36 = vld [vmem:[#allocation8 + $0x288] sm:$0xff] }
 0x562   :  { %4378 = vst [vmem:[#allocation30_spill] sm:$0xff] %v3968_v59  ;;  %v1382_v59 = vpop.f32.mrf.mxu1  ;;  %v1585_v7 = vsel %vm1582_vm15, %v1584_v13, %v1580_v39  ;;  %v3990_v13 = vld [vmem:[#allocation8 + $0x2d0] sm:$0xff] }
 0x563   :  { %v1590_v24 = vsub.f32 1.0, %v1585_v7  ;;  %v1592_v21 = vmul.f32 0.0, %v1585_v7  ;;  %v4395_v7 = vld [vmem:[#allocation32_spill] sm:$0xff] }
 0x5ba   :  { %v3970_v14 = vpop.f32.mrf.mxu3 }
 0x5bb   :  { %4379 = vst [vmem:[#allocation21_spill] sm:$0xff] %v3970_v14  ;;  %v1383_v14 = vadd.f32 %v1382_v59, %v3974_v10  ;;  %v4000_v59 = vld [vmem:[#allocation8 + $0x2a0] sm:$0xff] }
 0x5c2   :  { %v1541_v43 = vpop.f32.mrf.mxu3 }
 0x5c3   :  { %v1542_v51 = vadd.f32 %v1541_v43, %v3972_v17 }
 0x5c5   :  { %v1587_v55 = vmul.f32 %v1565_v20, %v1542_v51 }
 0x5c7   :  { %v1588_v46 = vadd.f32 %v1587_v55, %v1383_v14  ;;  %v3985_v55 = vld [vmem:[#allocation8 + $0x2e8] sm:$0xff] }
 0x5c9   :  { %2534 = vtanh.f32 %v1588_v46  ;;  %v1310_v46 = vadd.f32 %v3950_v0, %v3952_v2 }
 0x5cf   :  { %v2535_v32 = vpop.eup %2534 }
 0x5d0   :  { %v1591_v43 = vmul.f32 %v2535_v32, %v1590_v24  ;;  %v4396_v32 = vld [vmem:[#allocation20_spill] sm:$0xff] }
 0x5d2   :  { %v1593_v17 = vadd.f32 %v1592_v21, %v1591_v43 }
 0x5d4   :  { %v3978_v34 = vmul.f32 %v1599_v16, %v1593_v17 }
 0x5d6   :  { %2354 = vst [vmem:[#allocation11] sm:$0xff] %v3978_v34  ;;  %1623 = vmatmul.f32.vlgmr.msrb.gmra.mxu0 %v3978_v34  ;;  %1643 = vmatmul.f32.vlgmr.msrb.gmra.mxu1 %v3978_v34 }
 0x5d7   :  { %1663 = vmatmul.f32.vlgmr.msra.gmra.mxu2 %v3978_v34  ;;  %1893 = vmatpush.msrb.mxu0 %v3798_v37 }
 0x5d8   :  { %1976 = vmatpush.msrb.mxu1 %v3985_v55  ;;  %1996 = vmatpush.msra.mxu2 %v3685_v26 }
 0x5d9   :  { %1894 = vmatpush.msrb.mxu0 %v3803_v12 }
 0x5da   :  { %1977 = vmatpush.msrb.mxu1 %v3990_v13  ;;  %1997 = vmatpush.msra.mxu2 %v3690_v27 }
 0x5db   :  { %1895 = vmatpush.msrb.mxu0 %v3807_v60 }
 0x5dc   :  { %1978 = vmatpush.msrb.mxu1 %v3995_v38  ;;  %1998 = vmatpush.msra.mxu2 %v3695_v30 }
 0x5dd   :  { %1896 = vmatpush.msrb.mxu0 %v3816_v11 }
 0x5de   :  { %1979 = vmatpush.msrb.mxu1 %v4000_v59  ;;  %1999 = vmatpush.msra.mxu2 %v3700_v18 }
 0x5df   :  { %1897 = vmatpush.msrb.mxu0 %v3822_v29 }
 0x5e0   :  { %1980 = vmatpush.msrb.mxu1 %v4005_v36  ;;  %2000 = vmatpush.msra.mxu2 %v3705_v31 }
 0x5e1   :  { %1898 = vmatpush.msrb.mxu0 %v3826_v5 }
 0x5e2   :  { %1981 = vmatpush.msrb.mxu1 %v3631_v22  ;;  %2001 = vmatpush.msra.mxu2 %v3712_v49  ;;  %v4381_v22 = vld [vmem:[#allocation25_spill] sm:$0xff] }
 0x5e3   :  { %1899 = vmatpush.msrb.mxu0 %v3829_v42 }
 0x5e4   :  { %1982 = vmatpush.msrb.mxu1 %v3635_v35  ;;  %2002 = vmatpush.msra.mxu2 %v3716_v25  ;;  %v4382_v35 = vld [vmem:[#allocation19_spill] sm:$0xff] }
 0x5e5   :  { %1900 = vmatpush.msrb.mxu0 %v3834_v50 }
 0x5e6   :  { %1983 = vmatpush.msrb.mxu1 %v3637_v1  ;;  %2003 = vmatpush.msra.mxu2 %v3721_v28  ;;  %v4383_v1 = vld [vmem:[#allocation24_spill] sm:$0xff] }
 0x5e7   :  { %1901 = vmatpush.msrb.mxu0 %v3839_v3 }
 0x5e8   :  { %1984 = vmatpush.msrb.mxu1 %v3644_v53  ;;  %2004 = vmatpush.msra.mxu2 %v3726_v44  ;;  %v4384_v53 = vld [vmem:[#allocation27_spill] sm:$0xff] }
 0x5e9   :  { %1902 = vmatpush.msrb.mxu0 %v3844_v9 }
 0x5ea   :  { %1985 = vmatpush.msrb.mxu1 %v3646_v61  ;;  %2005 = vmatpush.msra.mxu2 %v3732_v54  ;;  %v4385_v61 = vld [vmem:[#allocation28_spill] sm:$0xff] }
 0x5eb   :  { %1903 = vmatpush.msrb.mxu0 %v3854_v6 }
 0x5ec   :  { %1986 = vmatpush.msrb.mxu1 %v3649_v8  ;;  %2006 = vmatpush.msra.mxu2 %v3737_v62  ;;  %v1347_v8 = vpop.f32.mrf.mxu0 }
 0x5ed   :  { %1904 = vmatpush.msrb.mxu0 %v4381_v22  ;;  %v1348_v39 = vadd.f32 %v1347_v8, %v3958_v15 }
 0x5ee   :  { %1987 = vmatpush.msrb.mxu1 %v3652_v45  ;;  %2007 = vmatpush.msra.mxu2 %v3742_v48  ;;  %v1385_v45 = vpop.f32.mrf.mxu1 }
 0x5ef   :  { %1905 = vmatpush.msrb.mxu0 %v4382_v35 }
 0x5f0   :  { %1988 = vmatpush.msrb.mxu1 %v3659_v63  ;;  %2008 = vmatpush.msra.mxu2 %v3747_v33 }
 0x5f1   :  { %1906 = vmatpush.msrb.mxu0 %v4383_v1 }
 0x5f2   :  { %1989 = vmatpush.msrb.mxu1 %v3661_v58  ;;  %2009 = vmatpush.msra.mxu2 %v3753_v47 }
 0x5f3   :  { %1907 = vmatpush.msrb.mxu0 %v4384_v53 }
 0x5f4   :  { %1990 = vmatpush.msrb.mxu1 %v3665_v19  ;;  %2010 = vmatpush.msra.mxu2 %v3758_v52  ;;  %v4042_v63 = vpop.f32.mrf.mxu0 }
 0x5f5   :  { %1908 = vmatpush.msrb.mxu0 %v4385_v61 }
 0x5f6   :  { %1991 = vmatpush.msrb.mxu1 %v3667_v40  ;;  %2011 = vmatpush.msra.mxu2 %v3763_v56  ;;  %v4044_v14 = vpop.f32.mrf.mxu1 }
 0x5f7   :  { %4386 = vst [vmem:[#allocation38_spill] sm:$0xff] %v4044_v14 }
 0x5fc   :  { %v4046_v58 = vpop.f32.mrf.mxu0 }
 0x5fd   :  { %4387 = vst [vmem:[#allocation34_spill] sm:$0xff] %v4046_v58 }
 0x5fe   :  { %v4048_v17 = vpop.f32.mrf.mxu1 }
 0x5ff   :  { %4388 = vst [vmem:[#allocation23_spill] sm:$0xff] %v4048_v17 }
 0x604   :  { %v4050_v4 = vpop.f32.mrf.mxu0 }
 0x605   :  { %4389 = vst [vmem:[#allocation39_spill] sm:$0xff] %v4050_v4 }
 0x606   :  { %v4052_v19 = vpop.f32.mrf.mxu1 }
 0x607   :  { %4390 = vst [vmem:[#allocation18_spill] sm:$0xff] %v4052_v19 }
 0x60c   :  { %v4054_v51 = vpop.f32.mrf.mxu0 }
 0x60d   :  { %4391 = vst [vmem:[#allocation36_spill] sm:$0xff] %v4054_v51 }
 0x60e   :  { %v4056_v20 = vpop.f32.mrf.mxu1 }
 0x60f   :  { %4392 = vst [vmem:[#allocation35_spill] sm:$0xff] %v4056_v20 }
 0x614   :  { %v4058_v40 = vpop.f32.mrf.mxu0 }
 0x615   :  { %4393 = vst [vmem:[#allocation22_spill] sm:$0xff] %v4058_v40 }
 0x616   :  { %v4060_v23 = vpop.f32.mrf.mxu1 }
 0x617   :  { %4394 = vst [vmem:[#allocation25_spill] sm:$0xff] %v4060_v23 }
 0x653   :  { %v1624_v41 = vpop.f32.mrf.mxu0  ;;  %v1644_v57 = vpop.f32.mrf.mxu1 }
 0x654   :  { %v1625_v24 = vadd.f32 %v1624_v41, %v4395_v7  ;;  %v1645_v43 = vadd.f32 %v1644_v57, %v4396_v32 }
 0x656   :  { %v1670_v21 = vadd.f32 %v1625_v24, %v1310_v46  ;;  %v1690_v16 = vadd.f32 %v1645_v43, %v1348_v39 }
 0x658   :  { %v2422_v51 = vmul.f32 -1.442695, %v1670_v21  ;;  %v2423_v19 = vmul.f32 -1.442695, %v1690_v16 }
 0x65a   :  { %2536 = vpow2.f32 %v2422_v51  ;;  %v1664_v24 = vpop.f32.mrf.mxu2 }
 0x65b   :  { %2538 = vpow2.f32 %v2423_v19 }
 0x660   :  { %v2537_v40 = vpop.eup %2536 }
 0x661   :  { %v2539_v20 = vpop.eup %2538  ;;  %v1674_v23 = vadd.f32 1.0, %v2537_v40  ;;  %v4397_v40 = vld [vmem:[#allocation31_spill] sm:$0xff] }
 0x662   :  { %v1694_v4 = vadd.f32 1.0, %v2539_v20  ;;  %v1665_v20 = vadd.f32 %v1664_v24, %v4397_v40 }
 0x663   :  { %2540 = vrcp.f32 %v1674_v23  ;;  %v1686_v7 = vand.u32 2147483648, %v1674_v23  ;;  %v1684_v46 = vand.u32 2147483647, %v1674_v23  ;;  %vm1680_vm1 = vweird.f32 %v1674_v23 }
 0x664   :  { %2542 = vrcp.f32 %v1694_v4  ;;  %vm1700_vm5 = vweird.f32 %v1694_v4 }
 0x665   :  { %v1687_v19 = vor.u32 1.1754944e-38, %v1686_v7  ;;  %vm1685_vm3 = vcmp.eq.f32.partialorder %v1684_v46, 8.507059e+37 }
 0x669   :  { %v2541_v17 = vpop.eup %2540 }
 0x66a   :  { %v2543_v0 = vpop.eup %2542  ;;  %v1676_v58 = vmul.f32 %v2541_v17, %v1674_v23  ;;  %vm1681_vm0 = vweird.f32 %v2541_v17 }
 0x66b   :  { %v1696_v8 = vmul.f32 %v2543_v0, %v1694_v4  ;;  %vm1682_vm2 = vmor %vm1680_vm1, %vm1681_vm0  ;;  %vm1701_vm4 = vweird.f32 %v2543_v0 }
 0x66c   :  { %v1677_v14 = vsub.f32 1.0, %v1676_v58  ;;  %v1386_v58 = vadd.f32 %v1385_v45, %v3974_v10  ;;  %vm1702_vm6 = vmor %vm1700_vm5, %vm1701_vm4 }
 0x66d   :  { %v1697_v41 = vsub.f32 1.0, %v1696_v8  ;;  %v1706_v8 = vand.u32 2147483648, %v1694_v4 }
 0x66e   :  { %v1678_v57 = vmul.f32 %v2541_v17, %v1677_v14  ;;  %v1704_v14 = vand.u32 2147483647, %v1694_v4 }
 0x66f   :  { %v1698_v39 = vmul.f32 %v2543_v0, %v1697_v41 }
 0x670   :  { %v1679_v51 = vadd.f32 %v2541_v17, %v1678_v57  ;;  %v1707_v57 = vor.u32 1.1754944e-38, %v1706_v8  ;;  %vm1705_vm7 = vcmp.eq.f32.partialorder %v1704_v14, 8.507059e+37 }
 0x671   :  { %v1699_v16 = vadd.f32 %v2543_v0, %v1698_v39  ;;  %v1722_v39 = vpop.permute.xlu2 %1721 }
 0x672   :  { %v1683_v43 = vsel %vm1682_vm2, %v2541_v17, %v1679_v51 }
 0x673   :  { %v1688_v21 = vsel %vm1685_vm3, %v1687_v19, %v1683_v43  ;;  %v1703_v32 = vsel %vm1702_vm6, %v2543_v0, %v1699_v16  ;;  %v4399_v43 = vld [vmem:[#allocation33_spill] sm:$0xff]  ;;  %v4401_v16 = vld [vmem:[#allocation32_spill] sm:$0xff] }
 0x674   :  { %v1710_v2 = vmul.f32 %v1688_v21, %v1665_v20  ;;  %v1708_v23 = vsel %vm1705_vm7, %v1707_v57, %v1703_v32  ;;  %v4400_v21 = vld [vmem:[#allocation37_spill] sm:$0xff] }
 0x675   :  { %v1713_v7 = vsub.f32 1.0, %v1708_v23  ;;  %v1715_v46 = vmul.f32 %v1708_v23, %v3978_v34 }
 0x676   :  { %v1711_v41 = vadd.f32 %v1710_v2, %v1386_v58 }
 0x678   :  { %2544 = vtanh.f32 %v1711_v41 }
 0x67e   :  { %v2545_v24 = vpop.eup %2544 }
 0x67f   :  { %v1714_v17 = vmul.f32 %v2545_v24, %v1713_v7 }
 0x681   :  { %v1716_v51 = vadd.f32 %v1715_v46, %v1714_v17 }
 0x683   :  { %v1718_v45 = vsub.f32 %v1716_v51, %v3978_v34  ;;  %v1727_v19 = vmul.f32 %v1722_v39, %v1716_v51 }
 0x685   :  { %v1724_v20 = vmul.f32 %v1722_v39, %v1718_v45  ;;  %2355 = vst [vmem:[#allocation11 + $0x8] sm:$0xff] %v1727_v19 }
 0x687   :  { %v4072_v4 = vadd.f32 %v1724_v20, %v3978_v34 }
 0x689   :  { %1746 = vmatmul.f32.vlgmr.msra.gmra.mxu3 %v4072_v4  ;;  %1766 = vmatmul.f32.vlgmr.msra.gmra.mxu0 %v4072_v4 }
 0x68a   :  { %1786 = vmatmul.f32.vlgmr.msra.gmra.mxu1 %v4072_v4  ;;  %2016 = vmatpush.msra.mxu3 %v3798_v37 }
 0x68b   :  { %2099 = vmatpush.msra.mxu0 %v3985_v55  ;;  %2119 = vmatpush.msra.mxu1 %v3685_v26  ;;  %v4093_v26 = vld [vmem:[#allocation8 + $0x270] sm:$0xff] }
 0x68c   :  { %2017 = vmatpush.msra.mxu3 %v3803_v12 }
 0x68d   :  { %2100 = vmatpush.msra.mxu0 %v3990_v13  ;;  %2120 = vmatpush.msra.mxu1 %v3690_v27  ;;  %v4098_v27 = vld [vmem:[#allocation8 + $0x258] sm:$0xff] }
 0x68e   :  { %2018 = vmatpush.msra.mxu3 %v3807_v60 }
 0x68f   :  { %2101 = vmatpush.msra.mxu0 %v3995_v38  ;;  %2121 = vmatpush.msra.mxu1 %v3695_v30  ;;  %v4103_v30 = vld [vmem:[#allocation8 + $0x240] sm:$0xff] }
 0x690   :  { %2019 = vmatpush.msra.mxu3 %v3816_v11 }
 0x691   :  { %2102 = vmatpush.msra.mxu0 %v4000_v59  ;;  %2122 = vmatpush.msra.mxu1 %v3700_v18  ;;  %v4108_v18 = vld [vmem:[#allocation8 + $0x228] sm:$0xff] }
 0x692   :  { %2020 = vmatpush.msra.mxu3 %v3822_v29 }
 0x693   :  { %2103 = vmatpush.msra.mxu0 %v4005_v36  ;;  %2123 = vmatpush.msra.mxu1 %v3705_v31  ;;  %v4113_v31 = vld [vmem:[#allocation8 + $0x210] sm:$0xff] }
 0x694   :  { %2021 = vmatpush.msra.mxu3 %v3826_v5 }
 0x695   :  { %2104 = vmatpush.msra.mxu0 %v4093_v26  ;;  %2124 = vmatpush.msra.mxu1 %v3712_v49  ;;  %v4118_v49 = vld [vmem:[#allocation8 + $0x1f8] sm:$0xff] }
 0x696   :  { %2022 = vmatpush.msra.mxu3 %v3829_v42 }
 0x697   :  { %2105 = vmatpush.msra.mxu0 %v4098_v27  ;;  %2125 = vmatpush.msra.mxu1 %v3716_v25  ;;  %v4123_v25 = vld [vmem:[#allocation8 + $0x1e0] sm:$0xff] }
 0x698   :  { %2023 = vmatpush.msra.mxu3 %v3834_v50 }
 0x699   :  { %2106 = vmatpush.msra.mxu0 %v4103_v30  ;;  %2126 = vmatpush.msra.mxu1 %v3721_v28  ;;  %v4128_v28 = vld [vmem:[#allocation8 + $0x1c8] sm:$0xff] }
 0x69a   :  { %2024 = vmatpush.msra.mxu3 %v3839_v3 }
 0x69b   :  { %2107 = vmatpush.msra.mxu0 %v4108_v18  ;;  %2127 = vmatpush.msra.mxu1 %v3726_v44  ;;  %v4133_v44 = vld [vmem:[#allocation8 + $0x1b0] sm:$0xff] }
 0x69c   :  { %2025 = vmatpush.msra.mxu3 %v3844_v9 }
 0x69d   :  { %2108 = vmatpush.msra.mxu0 %v4113_v31  ;;  %2128 = vmatpush.msra.mxu1 %v3732_v54  ;;  %v4138_v54 = vld [vmem:[#allocation8 + $0x198] sm:$0xff] }
 0x69e   :  { %2026 = vmatpush.msra.mxu3 %v3854_v6 }
 0x69f   :  { %2109 = vmatpush.msra.mxu0 %v4118_v49  ;;  %2129 = vmatpush.msra.mxu1 %v3737_v62  ;;  %v4143_v62 = vld [vmem:[#allocation8 + $0x180] sm:$0xff] }
 0x6a0   :  { %2027 = vmatpush.msra.mxu3 %v4381_v22 }
 0x6a1   :  { %2110 = vmatpush.msra.mxu0 %v4123_v25  ;;  %2130 = vmatpush.msra.mxu1 %v3742_v48 }
 0x6a2   :  { %2028 = vmatpush.msra.mxu3 %v4382_v35 }
 0x6a3   :  { %2111 = vmatpush.msra.mxu0 %v4128_v28  ;;  %2131 = vmatpush.msra.mxu1 %v3747_v33  ;;  %v1351_v33 = vadd.f32 %v4042_v63, %v3958_v15 }
 0x6a4   :  { %2029 = vmatpush.msra.mxu3 %v4383_v1 }
 0x6a5   :  { %2112 = vmatpush.msra.mxu0 %v4133_v44  ;;  %2132 = vmatpush.msra.mxu1 %v3753_v47  ;;  %v4398_v47 = vld [vmem:[#allocation20_spill] sm:$0xff] }
 0x6a6   :  { %2030 = vmatpush.msra.mxu3 %v4384_v53 }
 0x6a7   :  { %2113 = vmatpush.msra.mxu0 %v4138_v54  ;;  %2133 = vmatpush.msra.mxu1 %v3758_v52  ;;  %v1313_v52 = vadd.f32 %v4400_v21, %v4399_v43 }
 0x6a8   :  { %2031 = vmatpush.msra.mxu3 %v4385_v61 }
 0x6a9   :  { %2114 = vmatpush.msra.mxu0 %v4143_v62  ;;  %2134 = vmatpush.msra.mxu1 %v3763_v56 }
 0x706   :  { %v1767_v48 = vpop.f32.mrf.mxu0 }
 0x707   :  { %v1768_v2 = vadd.f32 %v1767_v48, %v4398_v47  ;;  %v1787_v48 = vpop.f32.mrf.mxu1 }
 0x709   :  { %v1813_v34 = vadd.f32 %v1768_v2, %v1351_v33 }
 0x70b   :  { %v2426_v32 = vmul.f32 -1.442695, %v1813_v34  ;;  %v1788_v34 = vadd.f32 %v1787_v48, %v4397_v40 }
 0x70c   :  { %v1747_v0 = vpop.f32.mrf.mxu3 }
 0x70d   :  { %2546 = vpow2.f32 %v2426_v32  ;;  %v1748_v58 = vadd.f32 %v1747_v0, %v4401_v16 }
 0x70f   :  { %v1793_v8 = vadd.f32 %v1748_v58, %v1313_v52  ;;  %v4402_v52 = vld [vmem:[#allocation38_spill] sm:$0xff] }
 0x710   :  { %v1389_v58 = vadd.f32 %v4402_v52, %v3974_v10 }
 0x711   :  { %v2425_v14 = vmul.f32 -1.442695, %v1793_v8 }
 0x713   :  { %v2547_v41 = vpop.eup %2546  ;;  %2548 = vpow2.f32 %v2425_v14 }
 0x714   :  { %v1817_v56 = vadd.f32 1.0, %v2547_v41 }
 0x716   :  { %2550 = vrcp.f32 %v1817_v56  ;;  %v1829_v8 = vand.u32 2147483648, %v1817_v56  ;;  %vm1823_vm13 = vweird.f32 %v1817_v56  ;;  %v1827_v41 = vand.u32 2147483647, %v1817_v56 }
 0x718   :  { %vm1828_vm15 = vcmp.eq.f32.partialorder %v1827_v41, 8.507059e+37 }
 0x719   :  { %v2549_v57 = vpop.eup %2548 }
 0x71a   :  { %v1797_v23 = vadd.f32 1.0, %v2549_v57 }
 0x71c   :  { %2552 = vrcp.f32 %v1797_v23  ;;  %v2551_v63 = vpop.eup %2550  ;;  %v1809_v39 = vand.u32 2147483648, %v1797_v23  ;;  %v1807_v19 = vand.u32 2147483647, %v1797_v23  ;;  %vm1803_vm9 = vweird.f32 %v1797_v23 }
 0x71d   :  { %v1819_v7 = vmul.f32 %v2551_v63, %v1817_v56  ;;  %vm1824_vm12 = vweird.f32 %v2551_v63 }
 0x71e   :  { %v1810_v2 = vor.u32 1.1754944e-38, %v1809_v39  ;;  %vm1808_vm11 = vcmp.eq.f32.partialorder %v1807_v19, 8.507059e+37  ;;  %vm1825_vm14 = vmor %vm1823_vm13, %vm1824_vm12  ;;  %v1845_v19 = vpop.permute.xlu0 %1844 }
 0x71f   :  { %v1820_v46 = vsub.f32 1.0, %v1819_v7 }
 0x721   :  { %v1821_v20 = vmul.f32 %v2551_v63, %v1820_v46 }
 0x722   :  { %v2553_v24 = vpop.eup %2552 }
 0x723   :  { %v1799_v17 = vmul.f32 %v2553_v24, %v1797_v23  ;;  %vm1804_vm8 = vweird.f32 %v2553_v24  ;;  %v1822_v0 = vadd.f32 %v2551_v63, %v1821_v20  ;;  %v1830_v23 = vor.u32 1.1754944e-38, %v1829_v8 }
 0x724   :  { %vm1805_vm10 = vmor %vm1803_vm9, %vm1804_vm8 }
 0x725   :  { %v1800_v51 = vsub.f32 1.0, %v1799_v17  ;;  %v1826_v7 = vsel %vm1825_vm14, %v2551_v63, %v1822_v0  ;;  %v2662_v63 = vld [vmem:[#allocation8 + $0x2f0] sm:$0xff] }
 0x726   :  { %v1831_v17 = vsel %vm1828_vm15, %v1830_v23, %v1826_v7 }
 0x727   :  { %v1801_v45 = vmul.f32 %v2553_v24, %v1800_v51  ;;  %v1836_v46 = vsub.f32 1.0, %v1831_v17  ;;  %v1838_v51 = vmul.f32 %v1831_v17, %v4072_v4 }
 0x729   :  { %v1802_v33 = vadd.f32 %v2553_v24, %v1801_v45 }
 0x72b   :  { %v1806_v32 = vsel %vm1805_vm10, %v2553_v24, %v1802_v33 }
 0x72c   :  { %v1811_v21 = vsel %vm1808_vm11, %v1810_v2, %v1806_v32  ;;  %v2663_v2 = vld [vmem:[#allocation8 + $0x2d8] sm:$0xff] }
 0x72d   :  { %v1833_v14 = vmul.f32 %v1811_v21, %v1788_v34 }
 0x72f   :  { %v1834_v57 = vadd.f32 %v1833_v14, %v1389_v58 }
 0x731   :  { %2554 = vtanh.f32 %v1834_v57 }
 0x737   :  { %v2555_v24 = vpop.eup %2554 }
 0x738   :  { %v1837_v39 = vmul.f32 %v2555_v24, %v1836_v46  ;;  %v4405_v24 = vld [vmem:[#allocation23_spill] sm:$0xff] }
 0x73a   :  { %v1839_v45 = vadd.f32 %v1838_v51, %v1837_v39  ;;  %v1392_v51 = vadd.f32 %v4405_v24, %v3974_v10 }
 0x73c   :  { %v1841_v20 = vsub.f32 %v1839_v45, %v4072_v4  ;;  %v1850_v48 = vmul.f32 %v1845_v19, %v1839_v45 }
 0x73e   :  { %v1847_v33 = vmul.f32 %v1845_v19, %v1841_v20  ;;  %2356 = vst [vmem:[#allocation11 + $0x10] sm:$0xff] %v1850_v48 }
 0x740   :  { %v4159_v56 = vadd.f32 %v1847_v33, %v4072_v4  ;;  %v2664_v4 = vld [vmem:[#allocation8 + $0x2c0] sm:$0xff] }
 0x742   :  { %1869 = vmatmul.f32.vlgmr.msrb.gmra.mxu2 %v4159_v56  ;;  %1889 = vmatmul.f32.vlgmr.msrb.gmra.mxu3 %v4159_v56 }
 0x743   :  { %1909 = vmatmul.f32.vlgmr.msrb.gmra.mxu0 %v4159_v56  ;;  %2139 = vmatpush.msrb.mxu2 %v3798_v37  ;;  %v2665_v37 = vld [vmem:[#allocation8 + $0x2a8] sm:$0xff] }
 0x744   :  { %2222 = vmatpush.msrb.mxu3 %v3985_v55  ;;  %2242 = vmatpush.msrb.mxu0 %v2662_v63  ;;  %v2676_v55 = vld [vmem:[#allocation8 + $0x1a0] sm:$0xff] }
 0x745   :  { %2140 = vmatpush.msrb.mxu2 %v3803_v12  ;;  %v2666_v12 = vld [vmem:[#allocation8 + $0x290] sm:$0xff] }
 0x746   :  { %2223 = vmatpush.msrb.mxu3 %v3990_v13  ;;  %2243 = vmatpush.msrb.mxu0 %v2663_v2  ;;  %v2677_v13 = vld [vmem:[#allocation8 + $0x188] sm:$0xff] }
 0x747   :  { %2141 = vmatpush.msrb.mxu2 %v3807_v60  ;;  %v2667_v60 = vld [vmem:[#allocation8 + $0x278] sm:$0xff] }
 0x748   :  { %2224 = vmatpush.msrb.mxu3 %v3995_v38  ;;  %2244 = vmatpush.msrb.mxu0 %v2664_v4 }
 0x749   :  { %2142 = vmatpush.msrb.mxu2 %v3816_v11  ;;  %v2668_v11 = vld [vmem:[#allocation8 + $0x260] sm:$0xff] }
 0x74a   :  { %2225 = vmatpush.msrb.mxu3 %v4000_v59  ;;  %2245 = vmatpush.msrb.mxu0 %v2665_v37 }
 0x74b   :  { %2143 = vmatpush.msrb.mxu2 %v3822_v29  ;;  %v2669_v29 = vld [vmem:[#allocation8 + $0x248] sm:$0xff] }
 0x74c   :  { %2226 = vmatpush.msrb.mxu3 %v4005_v36  ;;  %2246 = vmatpush.msrb.mxu0 %v2666_v12  ;;  %v4403_v36 = vld [vmem:[#allocation26_spill] sm:$0xff] }
 0x74d   :  { %2144 = vmatpush.msrb.mxu2 %v3826_v5  ;;  %v2670_v5 = vld [vmem:[#allocation8 + $0x230] sm:$0xff] }
 0x74e   :  { %2227 = vmatpush.msrb.mxu3 %v4093_v26  ;;  %2247 = vmatpush.msrb.mxu0 %v2667_v60 }
 0x74f   :  { %2145 = vmatpush.msrb.mxu2 %v3829_v42  ;;  %v2671_v42 = vld [vmem:[#allocation8 + $0x218] sm:$0xff] }
 0x750   :  { %2228 = vmatpush.msrb.mxu3 %v4098_v27  ;;  %2248 = vmatpush.msrb.mxu0 %v2668_v11  ;;  %v1968_v11 = vpop.permute.xlu1 %1967 }
 0x751   :  { %2146 = vmatpush.msrb.mxu2 %v3834_v50  ;;  %v2672_v50 = vld [vmem:[#allocation8 + $0x200] sm:$0xff] }
 0x752   :  { %2229 = vmatpush.msrb.mxu3 %v4103_v30  ;;  %2249 = vmatpush.msrb.mxu0 %v2669_v29 }
 0x753   :  { %2147 = vmatpush.msrb.mxu2 %v3839_v3  ;;  %v2673_v3 = vld [vmem:[#allocation8 + $0x1e8] sm:$0xff] }
 0x754   :  { %2230 = vmatpush.msrb.mxu3 %v4108_v18  ;;  %2250 = vmatpush.msrb.mxu0 %v2670_v5 }
 0x755   :  { %2148 = vmatpush.msrb.mxu2 %v3844_v9  ;;  %v2674_v9 = vld [vmem:[#allocation8 + $0x1d0] sm:$0xff] }
 0x756   :  { %2231 = vmatpush.msrb.mxu3 %v4113_v31  ;;  %2251 = vmatpush.msrb.mxu0 %v2671_v42 }
 0x757   :  { %2149 = vmatpush.msrb.mxu2 %v3854_v6  ;;  %v2675_v6 = vld [vmem:[#allocation8 + $0x1b8] sm:$0xff] }
 0x758   :  { %2232 = vmatpush.msrb.mxu3 %v4118_v49  ;;  %2252 = vmatpush.msrb.mxu0 %v2672_v50 }
 0x759   :  { %2150 = vmatpush.msrb.mxu2 %v4381_v22  ;;  %v1316_v22 = vadd.f32 %v4403_v36, %v4399_v43  ;;  %v2686_v36 = vld [vmem:[#allocation8 + $0x238] sm:$0xff] }
 0x75a   :  { %2233 = vmatpush.msrb.mxu3 %v4123_v25  ;;  %2253 = vmatpush.msrb.mxu0 %v2673_v3  ;;  %v2678_v3 = vld [vmem:[#allocation8 + $0x2f8] sm:$0xff] }
 0x75b   :  { %2151 = vmatpush.msrb.mxu2 %v4382_v35  ;;  %v4404_v35 = vld [vmem:[#allocation34_spill] sm:$0xff] }
 0x75c   :  { %2234 = vmatpush.msrb.mxu3 %v4128_v28  ;;  %2254 = vmatpush.msrb.mxu0 %v2674_v9  ;;  %v2679_v9 = vld [vmem:[#allocation8 + $0x2e0] sm:$0xff] }
 0x75d   :  { %2152 = vmatpush.msrb.mxu2 %v4383_v1  ;;  %v1354_v1 = vadd.f32 %v4404_v35, %v3958_v15  ;;  %v2688_v35 = vld [vmem:[#allocation8 + $0x208] sm:$0xff] }
 0x75e   :  { %2235 = vmatpush.msrb.mxu3 %v4133_v44  ;;  %2255 = vmatpush.msrb.mxu0 %v2675_v6  ;;  %v2680_v6 = vld [vmem:[#allocation8 + $0x2c8] sm:$0xff] }
 0x75f   :  { %2153 = vmatpush.msrb.mxu2 %v4384_v53 }
 0x760   :  { %2236 = vmatpush.msrb.mxu3 %v4138_v54  ;;  %2256 = vmatpush.msrb.mxu0 %v2676_v55  ;;  %v2681_v55 = vld [vmem:[#allocation8 + $0x2b0] sm:$0xff] }
 0x761   :  { %2154 = vmatpush.msrb.mxu2 %v4385_v61 }
 0x762   :  { %2237 = vmatpush.msrb.mxu3 %v4143_v62  ;;  %2257 = vmatpush.msrb.mxu0 %v2677_v13  ;;  %v2682_v13 = vld [vmem:[#allocation8 + $0x298] sm:$0xff] }
 0x7c0   :  { %v1910_v8 = vpop.f32.mrf.mxu0 }
 0x7c1   :  { %v1911_v7 = vadd.f32 %v1910_v8, %v4397_v40 }
 0x7c5   :  { %v1870_v38 = vpop.f32.mrf.mxu2  ;;  %v1890_v59 = vpop.f32.mrf.mxu3 }
 0x7c6   :  { %v1871_v53 = vadd.f32 %v1870_v38, %v4401_v16  ;;  %v1891_v26 = vadd.f32 %v1890_v59, %v4398_v47  ;;  %v2683_v38 = vld [vmem:[#allocation8 + $0x280] sm:$0xff]  ;;  %v2685_v59 = vld [vmem:[#allocation8 + $0x250] sm:$0xff] }
 0x7c8   :  { %v1916_v27 = vadd.f32 %v1871_v53, %v1316_v22  ;;  %v1936_v30 = vadd.f32 %v1891_v26, %v1354_v1  ;;  %v2687_v22 = vld [vmem:[#allocation8 + $0x220] sm:$0xff]  ;;  %v2689_v1 = vld [vmem:[#allocation8 + $0x1f0] sm:$0xff]  ;;  %v2690_v53 = vld [vmem:[#allocation8 + $0x1d8] sm:$0xff] }
 0x7c9   :  { %v2691_v26 = vld [vmem:[#allocation8 + $0x1c0] sm:$0xff] }
 0x7ca   :  { %v2428_v18 = vmul.f32 -1.442695, %v1916_v27  ;;  %v2429_v61 = vmul.f32 -1.442695, %v1936_v30  ;;  %v2692_v27 = vld [vmem:[#allocation8 + $0x1a8] sm:$0xff]  ;;  %v2693_v30 = vld [vmem:[#allocation8 + $0x190] sm:$0xff] }
 0x7cc   :  { %2556 = vpow2.f32 %v2428_v18 }
 0x7cd   :  { %2558 = vpow2.f32 %v2429_v61  ;;  %v4406_v61 = vld [vmem:[#allocation29_spill] sm:$0xff] }
 0x7d2   :  { %v2557_v31 = vpop.eup %2556 }
 0x7d3   :  { %v2559_v49 = vpop.eup %2558  ;;  %v1920_v25 = vadd.f32 1.0, %v2557_v31  ;;  %v1319_v31 = vadd.f32 %v4406_v61, %v4399_v43 }
 0x7d4   :  { %v1940_v28 = vadd.f32 1.0, %v2559_v49 }
 0x7d5   :  { %2560 = vrcp.f32 %v1920_v25  ;;  %v1932_v0 = vand.u32 2147483648, %v1920_v25  ;;  %v1930_v58 = vand.u32 2147483647, %v1920_v25  ;;  %vm1926_vm1 = vweird.f32 %v1920_v25 }
 0x7d6   :  { %2562 = vrcp.f32 %v1940_v28  ;;  %v1952_v45 = vand.u32 2147483648, %v1940_v28  ;;  %vm1946_vm5 = vweird.f32 %v1940_v28  ;;  %v1950_v19 = vand.u32 2147483647, %v1940_v28 }
 0x7d7   :  { %v1933_v57 = vor.u32 1.1754944e-38, %v1932_v0  ;;  %vm1931_vm3 = vcmp.eq.f32.partialorder %v1930_v58, 8.507059e+37 }
 0x7d8   :  { %v1953_v33 = vor.u32 1.1754944e-38, %v1952_v45  ;;  %vm1951_vm7 = vcmp.eq.f32.partialorder %v1950_v19, 8.507059e+37 }
 0x7db   :  { %v2561_v44 = vpop.eup %2560 }
 0x7dc   :  { %v2563_v54 = vpop.eup %2562  ;;  %v1922_v62 = vmul.f32 %v2561_v44, %v1920_v25  ;;  %vm1927_vm0 = vweird.f32 %v2561_v44 }
 0x7dd   :  { %v1942_v34 = vmul.f32 %v2563_v54, %v1940_v28  ;;  %vm1928_vm2 = vmor %vm1926_vm1, %vm1927_vm0  ;;  %vm1947_vm4 = vweird.f32 %v2563_v54 }
 0x7de   :  { %v1923_v32 = vsub.f32 1.0, %v1922_v62  ;;  %vm1948_vm6 = vmor %vm1946_vm5, %vm1947_vm4 }
 0x7df   :  { %v1943_v21 = vsub.f32 1.0, %v1942_v34 }
 0x7e0   :  { %v1924_v52 = vmul.f32 %v2561_v44, %v1923_v32 }
 0x7e1   :  { %v1944_v14 = vmul.f32 %v2563_v54, %v1943_v21 }
 0x7e2   :  { %v1925_v41 = vadd.f32 %v2561_v44, %v1924_v52 }
 0x7e3   :  { %v1945_v46 = vadd.f32 %v2563_v54, %v1944_v14 }
 0x7e4   :  { %v1929_v23 = vsel %vm1928_vm2, %v2561_v44, %v1925_v41 }
 0x7e5   :  { %v1934_v17 = vsel %vm1931_vm3, %v1933_v57, %v1929_v23  ;;  %v1949_v48 = vsel %vm1948_vm6, %v2563_v54, %v1945_v46  ;;  %v4407_v54 = vld [vmem:[#allocation39_spill] sm:$0xff] }
 0x7e6   :  { %v1956_v39 = vmul.f32 %v1934_v17, %v1911_v7  ;;  %v1954_v63 = vsel %vm1951_vm7, %v1953_v33, %v1949_v48  ;;  %v1357_v62 = vadd.f32 %v4407_v54, %v3958_v15  ;;  %v4408_v33 = vld [vmem:[#allocation18_spill] sm:$0xff] }
 0x7e7   :  { %v1959_v2 = vsub.f32 1.0, %v1954_v63  ;;  %v1961_v12 = vmul.f32 %v1954_v63, %v4159_v56  ;;  %v1395_v63 = vadd.f32 %v4408_v33, %v3974_v10 }
 0x7e8   :  { %v1957_v20 = vadd.f32 %v1956_v39, %v1392_v51 }
 0x7ea   :  { %2564 = vtanh.f32 %v1957_v20 }
 0x7f0   :  { %v2565_v4 = vpop.eup %2564 }
 0x7f1   :  { %v1960_v37 = vmul.f32 %v2565_v4, %v1959_v2 }
 0x7f3   :  { %v1962_v60 = vadd.f32 %v1961_v12, %v1960_v37 }
 0x7f5   :  { %v1964_v29 = vsub.f32 %v1962_v60, %v4159_v56  ;;  %v1973_v5 = vmul.f32 %v1968_v11, %v1962_v60 }
 0x7f7   :  { %v1970_v42 = vmul.f32 %v1968_v11, %v1964_v29  ;;  %2357 = vst [vmem:[#allocation11 + $0x18] sm:$0xff] %v1973_v5 }
 0x7f9   :  { %v4208_v50 = vadd.f32 %v1970_v42, %v4159_v56  ;;  %v2684_v56 = vld [vmem:[#allocation8 + $0x268] sm:$0xff] }
 0x7fb   :  { %1992 = vmatmul.f32.vlgmr.msrb.gmra.mxu1 %v4208_v50  ;;  %2012 = vmatmul.f32.vlgmr.msra.gmra.mxu2 %v4208_v50 }
 0x7fc   :  { %2032 = vmatmul.f32.vlgmr.msra.gmra.mxu3 %v4208_v50  ;;  %2262 = vmatpush.msrb.mxu1 %v2678_v3 }
 0x7fe   :  { %2263 = vmatpush.msrb.mxu1 %v2679_v9 }
 0x800   :  { %2264 = vmatpush.msrb.mxu1 %v2680_v6 }
 0x802   :  { %2265 = vmatpush.msrb.mxu1 %v2681_v55 }
 0x804   :  { %2266 = vmatpush.msrb.mxu1 %v2682_v13 }
 0x806   :  { %2267 = vmatpush.msrb.mxu1 %v2683_v38 }
 0x808   :  { %2268 = vmatpush.msrb.mxu1 %v2684_v56  ;;  %v2091_v56 = vpop.permute.xlu2 %2090 }
 0x80a   :  { %2269 = vmatpush.msrb.mxu1 %v2685_v59 }
 0x80c   :  { %2270 = vmatpush.msrb.mxu1 %v2686_v36 }
 0x80e   :  { %2271 = vmatpush.msrb.mxu1 %v2687_v22 }
 0x810   :  { %2272 = vmatpush.msrb.mxu1 %v2688_v35 }
 0x812   :  { %2273 = vmatpush.msrb.mxu1 %v2689_v1 }
 0x814   :  { %2274 = vmatpush.msrb.mxu1 %v2690_v53 }
 0x816   :  { %2275 = vmatpush.msrb.mxu1 %v2691_v26  ;;  %v4409_v26 = vld [vmem:[#allocation30_spill] sm:$0xff] }
 0x818   :  { %2276 = vmatpush.msrb.mxu1 %v2692_v27  ;;  %v1322_v27 = vadd.f32 %v4409_v26, %v4399_v43  ;;  %v4413_v26 = vld [vmem:[#allocation21_spill] sm:$0xff] }
 0x81a   :  { %2277 = vmatpush.msrb.mxu1 %v2693_v30  ;;  %v4410_v30 = vld [vmem:[#allocation36_spill] sm:$0xff] }
 0x878   :  { %v1993_v18 = vpop.f32.mrf.mxu1 }
 0x879   :  { %v1994_v49 = vadd.f32 %v1993_v18, %v4401_v16  ;;  %v1360_v18 = vadd.f32 %v4410_v30, %v3958_v15 }
 0x87b   :  { %v2039_v25 = vadd.f32 %v1994_v49, %v1319_v31 }
 0x87d   :  { %v2431_v28 = vmul.f32 -1.442695, %v2039_v25 }
 0x87e   :  { %v2013_v44 = vpop.f32.mrf.mxu2 }
 0x87f   :  { %2566 = vpow2.f32 %v2431_v28  ;;  %v2014_v34 = vadd.f32 %v2013_v44, %v4398_v47  ;;  %v2033_v24 = vpop.f32.mrf.mxu3 }
 0x880   :  { %v2034_v20 = vadd.f32 %v2033_v24, %v4397_v40 }
 0x881   :  { %v2059_v32 = vadd.f32 %v2014_v34, %v1357_v62 }
 0x883   :  { %v2432_v0 = vmul.f32 -1.442695, %v2059_v32 }
 0x885   :  { %v2567_v21 = vpop.eup %2566  ;;  %2568 = vpow2.f32 %v2432_v0 }
 0x886   :  { %v2043_v52 = vadd.f32 1.0, %v2567_v21 }
 0x888   :  { %2570 = vrcp.f32 %v2043_v52  ;;  %v2055_v7 = vand.u32 2147483648, %v2043_v52  ;;  %v2053_v17 = vand.u32 2147483647, %v2043_v52  ;;  %vm2049_vm9 = vweird.f32 %v2043_v52 }
 0x88a   :  { %v2056_v45 = vor.u32 1.1754944e-38, %v2055_v7  ;;  %vm2054_vm11 = vcmp.eq.f32.partialorder %v2053_v17, 8.507059e+37 }
 0x88b   :  { %v2569_v58 = vpop.eup %2568 }
 0x88c   :  { %v2063_v8 = vadd.f32 1.0, %v2569_v58 }
 0x88e   :  { %v2571_v14 = vpop.eup %2570  ;;  %2572 = vrcp.f32 %v2063_v8  ;;  %v2075_v37 = vand.u32 2147483648, %v2063_v8  ;;  %v2073_v60 = vand.u32 2147483647, %v2063_v8  ;;  %vm2069_vm13 = vweird.f32 %v2063_v8 }
 0x88f   :  { %v2045_v41 = vmul.f32 %v2571_v14, %v2043_v52  ;;  %vm2050_vm8 = vweird.f32 %v2571_v14 }
 0x890   :  { %vm2051_vm10 = vmor %vm2049_vm9, %vm2050_vm8  ;;  %v2076_v5 = vor.u32 1.1754944e-38, %v2075_v37  ;;  %vm2074_vm15 = vcmp.eq.f32.partialorder %v2073_v60, 8.507059e+37 }
 0x891   :  { %v2046_v57 = vsub.f32 1.0, %v2045_v41 }
 0x893   :  { %v2047_v23 = vmul.f32 %v2571_v14, %v2046_v57 }
 0x894   :  { %v2573_v46 = vpop.eup %2572 }
 0x895   :  { %v2065_v51 = vmul.f32 %v2573_v46, %v2063_v8  ;;  %v2048_v39 = vadd.f32 %v2571_v14, %v2047_v23  ;;  %vm2070_vm12 = vweird.f32 %v2573_v46 }
 0x896   :  { %vm2071_vm14 = vmor %vm2069_vm13, %vm2070_vm12 }
 0x897   :  { %v2066_v19 = vsub.f32 1.0, %v2065_v51  ;;  %v2052_v48 = vsel %vm2051_vm10, %v2571_v14, %v2048_v39 }
 0x898   :  { %v2057_v2 = vsel %vm2054_vm11, %v2056_v45, %v2052_v48 }
 0x899   :  { %v2067_v4 = vmul.f32 %v2573_v46, %v2066_v19  ;;  %v2079_v12 = vmul.f32 %v2057_v2, %v2034_v20  ;;  %v4411_v19 = vld [vmem:[#allocation35_spill] sm:$0xff] }
 0x89a   :  { %v1398_v20 = vadd.f32 %v4411_v19, %v3974_v10 }
 0x89b   :  { %v2068_v11 = vadd.f32 %v2573_v46, %v2067_v4  ;;  %v2080_v29 = vadd.f32 %v2079_v12, %v1395_v63 }
 0x89d   :  { %v2072_v42 = vsel %vm2071_vm14, %v2573_v46, %v2068_v11  ;;  %2574 = vtanh.f32 %v2080_v29 }
 0x89e   :  { %v2077_v3 = vsel %vm2074_vm15, %v2076_v5, %v2072_v42 }
 0x89f   :  { %v2082_v9 = vsub.f32 1.0, %v2077_v3  ;;  %v2084_v13 = vmul.f32 %v2077_v3, %v4208_v50  ;;  %v2214_v3 = vpop.permute.xlu0 %2213 }
 0x8a3   :  { %v2575_v6 = vpop.eup %2574 }
 0x8a4   :  { %v2083_v55 = vmul.f32 %v2575_v6, %v2082_v9 }
 0x8a6   :  { %v2085_v38 = vadd.f32 %v2084_v13, %v2083_v55 }
 0x8a8   :  { %v2087_v59 = vsub.f32 %v2085_v38, %v4208_v50  ;;  %v2096_v36 = vmul.f32 %v2091_v56, %v2085_v38 }
 0x8aa   :  { %v2093_v22 = vmul.f32 %v2091_v56, %v2087_v59  ;;  %2358 = vst [vmem:[#allocation11 + $0x20] sm:$0xff] %v2096_v36  ;;  %v4412_v56 = vld [vmem:[#allocation22_spill] sm:$0xff] }
 0x8ab   :  { %v1363_v59 = vadd.f32 %v4412_v56, %v3958_v15 }
 0x8ac   :  { %v4225_v35 = vadd.f32 %v2093_v22, %v4208_v50 }
 0x8ae   :  { %2115 = vmatmul.f32.vlgmr.msra.gmra.mxu0 %v4225_v35  ;;  %2135 = vmatmul.f32.vlgmr.msra.gmra.mxu1 %v4225_v35 }
 0x8af   :  { %2155 = vmatmul.f32.vlgmr.msrb.gmra.mxu2 %v4225_v35 }
 0x92b   :  { %v2116_v1 = vpop.f32.mrf.mxu0  ;;  %v2136_v53 = vpop.f32.mrf.mxu1 }
 0x92c   :  { %v2117_v61 = vadd.f32 %v2116_v1, %v4401_v16  ;;  %v2137_v31 = vadd.f32 %v2136_v53, %v4398_v47 }
 0x92e   :  { %v2162_v50 = vadd.f32 %v2117_v61, %v1322_v27  ;;  %v2182_v49 = vadd.f32 %v2137_v31, %v1360_v18  ;;  %v1325_v27 = vadd.f32 %v4413_v26, %v4399_v43 }
 0x930   :  { %v2434_v25 = vmul.f32 -1.442695, %v2162_v50  ;;  %v2435_v28 = vmul.f32 -1.442695, %v2182_v49 }
 0x932   :  { %2576 = vpow2.f32 %v2434_v25  ;;  %v2156_v23 = vpop.f32.mrf.mxu2 }
 0x933   :  { %2578 = vpow2.f32 %v2435_v28  ;;  %v2157_v24 = vadd.f32 %v2156_v23, %v4397_v40 }
 0x938   :  { %v2577_v44 = vpop.eup %2576 }
 0x939   :  { %v2579_v54 = vpop.eup %2578  ;;  %v2166_v62 = vadd.f32 1.0, %v2577_v44 }
 0x93a   :  { %v2186_v34 = vadd.f32 1.0, %v2579_v54 }
 0x93b   :  { %2580 = vrcp.f32 %v2166_v62  ;;  %v2178_v14 = vand.u32 2147483648, %v2166_v62  ;;  %v2176_v57 = vand.u32 2147483647, %v2166_v62  ;;  %vm2172_vm1 = vweird.f32 %v2166_v62 }
 0x93c   :  { %2582 = vrcp.f32 %v2186_v34  ;;  %v2198_v48 = vand.u32 2147483648, %v2186_v34  ;;  %vm2192_vm5 = vweird.f32 %v2186_v34  ;;  %v2196_v63 = vand.u32 2147483647, %v2186_v34 }
 0x93d   :  { %v2179_v46 = vor.u32 1.1754944e-38, %v2178_v14  ;;  %vm2177_vm3 = vcmp.eq.f32.partialorder %v2176_v57, 8.507059e+37 }
 0x93e   :  { %v2199_v37 = vor.u32 1.1754944e-38, %v2198_v48  ;;  %vm2197_vm7 = vcmp.eq.f32.partialorder %v2196_v63, 8.507059e+37  ;;  %v2337_v48 = vpop.permute.xlu1 %2336 }
 0x941   :  { %v2581_v32 = vpop.eup %2580 }
 0x942   :  { %v2583_v0 = vpop.eup %2582  ;;  %v2168_v21 = vmul.f32 %v2581_v32, %v2166_v62  ;;  %vm2173_vm0 = vweird.f32 %v2581_v32 }
 0x943   :  { %v2188_v52 = vmul.f32 %v2583_v0, %v2186_v34  ;;  %vm2174_vm2 = vmor %vm2172_vm1, %vm2173_vm0  ;;  %vm2193_vm4 = vweird.f32 %v2583_v0 }
 0x944   :  { %v2169_v58 = vsub.f32 1.0, %v2168_v21  ;;  %vm2194_vm6 = vmor %vm2192_vm5, %vm2193_vm4 }
 0x945   :  { %v2189_v8 = vsub.f32 1.0, %v2188_v52 }
 0x946   :  { %v2170_v41 = vmul.f32 %v2581_v32, %v2169_v58 }
 0x947   :  { %v2190_v7 = vmul.f32 %v2583_v0, %v2189_v8 }
 0x948   :  { %v2171_v17 = vadd.f32 %v2581_v32, %v2170_v41  ;;  %v4414_v41 = vld [vmem:[#allocation25_spill] sm:$0xff] }
 0x949   :  { %v2191_v45 = vadd.f32 %v2583_v0, %v2190_v7  ;;  %v1401_v57 = vadd.f32 %v4414_v41, %v3974_v10 }
 0x94a   :  { %v2175_v51 = vsel %vm2174_vm2, %v2581_v32, %v2171_v17 }
 0x94b   :  { %v2180_v39 = vsel %vm2177_vm3, %v2179_v46, %v2175_v51  ;;  %v2195_v4 = vsel %vm2194_vm6, %v2583_v0, %v2191_v45 }
 0x94c   :  { %v2202_v33 = vmul.f32 %v2180_v39, %v2157_v24  ;;  %v2200_v12 = vsel %vm2197_vm7, %v2199_v37, %v2195_v4 }
 0x94d   :  { %v2205_v60 = vsub.f32 1.0, %v2200_v12  ;;  %v2207_v5 = vmul.f32 %v2200_v12, %v4225_v35 }
 0x94e   :  { %v2203_v2 = vadd.f32 %v2202_v33, %v1398_v20 }
 0x950   :  { %2584 = vtanh.f32 %v2203_v2 }
 0x956   :  { %v2585_v11 = vpop.eup %2584 }
 0x957   :  { %v2206_v29 = vmul.f32 %v2585_v11, %v2205_v60 }
 0x959   :  { %v2208_v42 = vadd.f32 %v2207_v5, %v2206_v29 }
 0x95b   :  { %v2210_v9 = vsub.f32 %v2208_v42, %v4225_v35  ;;  %v2219_v6 = vmul.f32 %v2214_v3, %v2208_v42 }
 0x95d   :  { %v2216_v55 = vmul.f32 %v2214_v3, %v2210_v9  ;;  %2359 = vst [vmem:[#allocation11 + $0x28] sm:$0xff] %v2219_v6 }
 0x95f   :  { %v4242_v13 = vadd.f32 %v2216_v55, %v4225_v35 }
 0x961   :  { %2238 = vmatmul.f32.vlgmr.msrb.gmra.mxu3 %v4242_v13  ;;  %2258 = vmatmul.f32.vlgmr.msrb.gmra.mxu0 %v4242_v13 }
 0x962   :  { %2278 = vmatmul.f32.vlgmr.msrb.gmra.mxu1 %v4242_v13 }
 0x9de   :  { %v2259_v38 = vpop.f32.mrf.mxu0 }
 0x9df   :  { %v2260_v36 = vadd.f32 %v2259_v38, %v4398_v47  ;;  %v2279_v32 = vpop.f32.mrf.mxu1 }
 0x9e0   :  { %v2280_v52 = vadd.f32 %v2279_v32, %v4397_v40 }
 0x9e1   :  { %v2305_v22 = vadd.f32 %v2260_v36, %v1363_v59 }
 0x9e3   :  { %v2438_v1 = vmul.f32 -1.442695, %v2305_v22 }
 0x9e4   :  { %v2239_v53 = vpop.f32.mrf.mxu3 }
 0x9e5   :  { %2586 = vpow2.f32 %v2438_v1  ;;  %v2240_v35 = vadd.f32 %v2239_v53, %v4401_v16 }
 0x9e7   :  { %v2285_v30 = vadd.f32 %v2240_v35, %v1325_v27 }
 0x9e9   :  { %v2437_v18 = vmul.f32 -1.442695, %v2285_v30 }
 0x9eb   :  { %v2587_v61 = vpop.eup %2586  ;;  %2588 = vpow2.f32 %v2437_v18 }
 0x9ec   :  { %v2309_v31 = vadd.f32 1.0, %v2587_v61 }
 0x9ee   :  { %2590 = vrcp.f32 %v2309_v31  ;;  %v2321_v7 = vand.u32 2147483648, %v2309_v31  ;;  %vm2315_vm13 = vweird.f32 %v2309_v31  ;;  %v2319_v17 = vand.u32 2147483647, %v2309_v31 }
 0x9f0   :  { %v2322_v51 = vor.u32 1.1754944e-38, %v2321_v7  ;;  %vm2320_vm15 = vcmp.eq.f32.partialorder %v2319_v17, 8.507059e+37 }
 0x9f1   :  { %v2589_v50 = vpop.eup %2588 }
 0x9f2   :  { %v2289_v49 = vadd.f32 1.0, %v2589_v50 }
 0x9f4   :  { %2592 = vrcp.f32 %v2289_v49  ;;  %v2591_v15 = vpop.eup %2590  ;;  %v2301_v62 = vand.u32 2147483648, %v2289_v49  ;;  %v2299_v34 = vand.u32 2147483647, %v2289_v49  ;;  %vm2295_vm9 = vweird.f32 %v2289_v49 }
 0x9f5   :  { %v2311_v47 = vmul.f32 %v2591_v15, %v2309_v31  ;;  %vm2316_vm12 = vweird.f32 %v2591_v15 }
 0x9f6   :  { %v2302_v21 = vor.u32 1.1754944e-38, %v2301_v62  ;;  %vm2300_vm11 = vcmp.eq.f32.partialorder %v2299_v34, 8.507059e+37  ;;  %vm2317_vm14 = vmor %vm2315_vm13, %vm2316_vm12 }
 0x9f7   :  { %v2312_v44 = vsub.f32 1.0, %v2311_v47 }
 0x9f9   :  { %v2313_v16 = vmul.f32 %v2591_v15, %v2312_v44 }
 0x9fa   :  { %v2593_v25 = vpop.eup %2592 }
 0x9fb   :  { %v2291_v28 = vmul.f32 %v2593_v25, %v2289_v49  ;;  %vm2296_vm8 = vweird.f32 %v2593_v25  ;;  %v2314_v8 = vadd.f32 %v2591_v15, %v2313_v16 }
 0x9fc   :  { %vm2297_vm10 = vmor %vm2295_vm9, %vm2296_vm8 }
 0x9fd   :  { %v2292_v54 = vsub.f32 1.0, %v2291_v28  ;;  %v2318_v24 = vsel %vm2317_vm14, %v2591_v15, %v2314_v8 }
 0x9fe   :  { %v2323_v39 = vsel %vm2320_vm15, %v2322_v51, %v2318_v24 }
 0x9ff   :  { %v2293_v43 = vmul.f32 %v2593_v25, %v2292_v54  ;;  %v2328_v40 = vsub.f32 1.0, %v2323_v39  ;;  %v2330_v19 = vmul.f32 %v2323_v39, %v4242_v13 }
 0xa01   :  { %v2294_v0 = vadd.f32 %v2593_v25, %v2293_v43 }
 0xa03   :  { %v2298_v58 = vsel %vm2297_vm10, %v2593_v25, %v2294_v0 }
 0xa04   :  { %v2303_v14 = vsel %vm2300_vm11, %v2302_v21, %v2298_v58 }
 0xa05   :  { %v2325_v23 = vmul.f32 %v2303_v14, %v2280_v52 }
 0xa07   :  { %v2326_v46 = vadd.f32 %v2325_v23, %v1401_v57 }
 0xa09   :  { %2594 = vtanh.f32 %v2326_v46 }
 0xa0f   :  { %v2595_v45 = vpop.eup %2594 }
 0xa10   :  { %v2329_v20 = vmul.f32 %v2595_v45, %v2328_v40 }
 0xa12   :  { %v2331_v10 = vadd.f32 %v2330_v19, %v2329_v20 }
 0xa14   :  { %v2342_v33 = vmul.f32 %v2337_v48, %v2331_v10  ;;  %v2333_v63 = vsub.f32 %v2331_v10, %v4242_v13 }
 0xa16   :  { %2360 = vst [vmem:[#allocation11 + $0x30] sm:$0xff] %v2342_v33  ;;  %v2339_v2 = vmul.f32 %v2337_v48, %v2333_v63 }
 0xa17   :  { %2373 = dma.vmem_to_hbm [thread:$0]  %s2366_s25, 896, %s2368_s28, [#allocation7], %s2833_s11, %s2833_s11, %s2834_s12  }
 0xa18   :  { %v2340_v4 = vadd.f32 %v2339_v2, %v4242_v13 }
 0xa1a   :  { %2346 = vst [vmem:[#allocation12 + $0x8] sm:$0xff] %v2340_v4 }
 0xa1b   :  { %2386 = dma.vmem_to_hbm [thread:$0]  %s2379_s30, 256, %s2381_s10, [#allocation13], %s2833_s11, %s2833_s11, %s2834_s12  }
 0xa1c   :  { %2818 = dma.done.wait [#allocation7], 896  }
 0xa1d   :  { %2819 = vsyncadd [#allocation7], 4294966400 }
 0xa1e   :  { %2820 = dma.done.wait [#allocation13], 256  }
 0xa1f   :  { %2821 = vsyncadd [#allocation13], 4294967040 }
 0xa20   :  { %2395 = vsyncpa [#allocation6], 1 }
 0xa21   :  { %2396 = vsyncpa [#allocation9], 1 }
 0xa22   :  { %2397 = vsyncpa [#allocation7], 1 }
 0xa23   :  { %2398 = vsyncpa [#allocation13], 1 }

</bundles_post_ra>
